<compile_context>
chip_gen: v7x
topology: tpu7x:2x2x1
jax: 0.10.0
libtpu: 0.0.40
codegen_flags: <defaults>
</compile_context>

<pallas_src>
import functools

import jax
import jax.numpy as jnp
from jax.experimental import pallas as pl
from jax.experimental.pallas import tpu as pltpu


def _round_up(x, m):
    return ((x + m - 1) // m) * m


# ----------------------------- Pallas kernel ---------------------------------


def _make_kernel(num_layers, T, Bp, Hp):
    """Fused multi-layer LSTM + MLP-head kernel for a fixed (static) config.

    Ref layout (all padded / pre-transposed; matmul weights bf16, biases f32):
      x_ref                    : (T*Bp, INp)        layer-0 input sequence slab
      layer 0                  : w_ih_0 (INp, 4*Hp), w_hh_0 (Hp, 4*Hp), b_0 (1, 4*Hp)
      layers 1..L-1            : w_cat_l (2*Hp, 4*Hp) = [W_ih_l ; W_hh_l], b_l (1, 4*Hp)
      head                     : fc1_w (Hp, 256), fc1_b (1, 256),
                                 fc_w (256, OUTp), fc_b (1, OUTp)
      out_ref                  : (Bp, OUTp) f32
      gx_ref  (scratch)        : (T*Bp, 4*Hp) f32   hoisted layer-0 input projection
    """

    def kernel(*refs):
        idx = 0
        x_ref = refs[idx]; idx += 1
        wih0_ref, whh0_ref, b0_ref = refs[idx:idx + 3]; idx += 3
        upper = []                                   # layers 1..L-1: (w_cat, b)
        for _ in range(num_layers - 1):
            upper.append(tuple(refs[idx:idx + 2]))
            idx += 2
        fc1_w_ref, fc1_b_ref, fc_w_ref, fc_b_ref = refs[idx:idx + 4]; idx += 4
        out_ref = refs[idx]
        gx_ref = refs[idx + 1]

        # Hoisted layer-0 input projection over the whole sequence: one MXU call.
        gx_ref[...] = (
            jnp.dot(x_ref[...].astype(jnp.bfloat16), wih0_ref[...],
                    preferred_element_type=jnp.float32)
            + b0_ref[...])                           # (T*Bp, 4*Hp) f32

        whh0 = whh0_ref[...]                         # (Hp, 4*Hp) bf16
        w_cats = [w_ref[...] for (w_ref, _) in upper]   # (2*Hp, 4*Hp) bf16
        b_ups = [b_ref[...] for (_, b_ref) in upper]    # (1, 4*Hp) f32

        def cell(gates, c):
            # PyTorch gate order i, f, g, o; each gate is a full 128-lane tile,
            # so these slices are tile-aligned (no relayout / masked selects).
            i_g = jax.nn.sigmoid(gates[:, 0 * Hp:1 * Hp])
            f_g = jax.nn.sigmoid(gates[:, 1 * Hp:2 * Hp])
            g_g = jnp.tanh(gates[:, 2 * Hp:3 * Hp])
            o_g = jax.nn.sigmoid(gates[:, 3 * Hp:4 * Hp])
            c_new = f_g * c + i_g * g_g
            h_new = o_g * jnp.tanh(c_new)
            return h_new, c_new

        h = [jnp.zeros((Bp, Hp), jnp.float32) for _ in range(num_layers)]
        c = [jnp.zeros((Bp, Hp), jnp.float32) for _ in range(num_layers)]

        # T is small & static: fully unrolled wavefront over (time, layer) so the
        # scheduler overlaps layer l's MXU push with layer l-1's EUP/VPU gating.
        for t in range(T):
            row = t * Bp
            # ---- layer 0: hoisted gx + recurrent matmul
            gates0 = (gx_ref[pl.ds(row, Bp), :]
                      + jnp.dot(h[0].astype(jnp.bfloat16), whh0,
                                preferred_element_type=jnp.float32))
            h[0], c[0] = cell(gates0, c[0])
            # ---- layers 1..L-1: fused [h_below, h_self] @ [W_ih ; W_hh] + b
            for l in range(1, num_layers):
                lhs = jnp.concatenate([h[l - 1], h[l]], axis=1)   # (Bp, 2*Hp)
                gates = (jnp.dot(lhs.astype(jnp.bfloat16), w_cats[l - 1],
                                 preferred_element_type=jnp.float32)
                         + b_ups[l - 1])
                h[l], c[l] = cell(gates, c[l])

        # Head: relu -> fc_1 -> sigmoid -> fc -> sigmoid   (h[-1] == hn[:, -1, :])
        hn = jnp.maximum(h[num_layers - 1], 0.0)
        z1 = jax.nn.sigmoid(
            jnp.dot(hn.astype(jnp.bfloat16), fc1_w_ref[...],
                    preferred_element_type=jnp.float32) + fc1_b_ref[...])
        z2 = jax.nn.sigmoid(
            jnp.dot(z1.astype(jnp.bfloat16), fc_w_ref[...],
                    preferred_element_type=jnp.float32) + fc_b_ref[...])
        out_ref[...] = z2                            # (Bp, OUTp) lane-dense store

    return kernel


# ------------------------- padding helpers ------------------------------------


def _pad_gate_cols(w, H, Hp):
    """(rows, 4H) -> (rows, 4*Hp): gate g's H columns land at lane offset g*Hp."""
    rows = w.shape[0]
    out = jnp.zeros((rows, 4 * Hp), w.dtype)
    for g in range(4):
        out = out.at[:, g * Hp:g * Hp + H].set(w[:, g * H:(g + 1) * H])
    return out


def _pad_rows(w, rows_p):
    return jnp.pad(w, ((0, rows_p - w.shape[0]), (0, 0)))


def _pad_cols(w, cols_p):
    return jnp.pad(w, ((0, 0), (0, cols_p - w.shape[1])))


# ------------------------------ wrapper ---------------------------------------


def melody_lstm_emb_forward(x, params, *, num_layers, hidden_size, output_size):
    """x: (B, T, F) float32; last two columns are integer embedding indices."""
    B, T, _ = x.shape
    H = hidden_size
    OUT = output_size

    # --- glue: split indices, embedding lookup, concat (as in the torch forward)
    # TODO(synk): jnp.take clips out-of-range indices instead of erroring like nn.Embedding.
    cont = x[:, :, :-2]
    indices = x[:, :, -2:].astype(jnp.int32)
    emb = params["embedding"]
    e0 = jnp.take(emb, indices[:, :, 0], axis=0)
    e1 = jnp.take(emb, indices[:, :, 1], axis=0)
    x_in = jnp.concatenate([cont, e0, e1], axis=2).astype(jnp.float32)   # (B, T, IN)
    IN = x_in.shape[-1]

    # --- padded, kernel-friendly sizes
    Bp = _round_up(max(B, 8), 8)          # full sublanes
    Hp = _round_up(H, 128)                # one lane tile per gate
    INp = _round_up(IN, 128)
    OUTp = _round_up(OUT, 128)            # lane-dense output

    # (B, T, IN) -> (T, Bp, INp) -> (T*Bp, INp), time-major 2-D slab
    x_tb = jnp.transpose(x_in, (1, 0, 2))
    x_tb = jnp.pad(x_tb, ((0, 0), (0, Bp - B), (0, INp - IN)))
    x_slab = x_tb.reshape(T * Bp, INp)

    args = [x_slab]
    # layer 0: separate W_ih (hoisted projection) and W_hh (recurrent)
    wih0 = _pad_rows(_pad_gate_cols(params["w_ih_0"], H, Hp), INp).astype(jnp.bfloat16)
    whh0 = _pad_rows(_pad_gate_cols(params["w_hh_0"], H, Hp), Hp).astype(jnp.bfloat16)
    b0 = _pad_gate_cols(params["b_0"], H, Hp)                            # (1, 4Hp) f32
    args += [wih0, whh0, b0]
    # layers >= 1: fuse input + recurrent weights into one (2*Hp, 4*Hp) slab
    for l in range(1, num_layers):
        wih = _pad_rows(_pad_gate_cols(params[f"w_ih_{l}"], H, Hp), Hp)
        whh = _pad_rows(_pad_gate_cols(params[f"w_hh_{l}"], H, Hp), Hp)
        w_cat = jnp.concatenate([wih, whh], axis=0).astype(jnp.bfloat16) # (2Hp, 4Hp)
        b = _pad_gate_cols(params[f"b_{l}"], H, Hp)                      # (1, 4Hp) f32
        args += [w_cat, b]
    fc1_w = _pad_rows(params["fc1_w"], Hp).astype(jnp.bfloat16)          # (Hp, 256)
    fc1_b = params["fc1_b"]                                              # (1, 256)
    fc_w = _pad_cols(params["fc_w"], OUTp).astype(jnp.bfloat16)          # (256, OUTp)
    fc_b = _pad_cols(params["fc_b"], OUTp)                               # (1, OUTp)
    args += [fc1_w, fc1_b, fc_w, fc_b]

    kernel = _make_kernel(num_layers, T, Bp, Hp)

    # No grid, no BlockSpec pipelining: every operand is placed whole in VMEM
    # (weights are read once; double-buffering them would only waste VMEM).
    vmem_spec = pl.BlockSpec(memory_space=pltpu.MemorySpace.VMEM)

    out_p = pl.pallas_call(
        kernel,
        out_shape=jax.ShapeDtypeStruct((Bp, OUTp), jnp.float32),
        in_specs=[vmem_spec] * len(args),
        out_specs=vmem_spec,
        scratch_shapes=[pltpu.VMEM((T * Bp, 4 * Hp), jnp.float32)],   # hoisted X@W_ih_0 + b_0
        compiler_params=pltpu.CompilerParams(vmem_limit_bytes=64 * 1024 * 1024),
    )(*args)
    return out_p[:B, :OUT]


# --------------------------- pure-JAX reference --------------------------------


def melody_lstm_emb_reference(x, params, *, num_layers, hidden_size, output_size):
    B, T, _ = x.shape
    H = hidden_size
    cont = x[:, :, :-2]
    indices = x[:, :, -2:].astype(jnp.int32)
    emb = params["embedding"]
    seq = jnp.concatenate(
        [cont, jnp.take(emb, indices[:, :, 0], axis=0),
         jnp.take(emb, indices[:, :, 1], axis=0)], axis=2).astype(jnp.float32)
    for l in range(num_layers):
        wih, whh, b = params[f"w_ih_{l}"], params[f"w_hh_{l}"], params[f"b_{l}"]
        h = jnp.zeros((B, H), jnp.float32)
        c = jnp.zeros((B, H), jnp.float32)
        hs = []
        for t in range(T):
            g = (jnp.dot(seq[:, t, :], wih, preferred_element_type=jnp.float32)
                 + jnp.dot(h, whh, preferred_element_type=jnp.float32) + b)
            i_g = jax.nn.sigmoid(g[:, 0:H])
            f_g = jax.nn.sigmoid(g[:, H:2 * H])
            g_g = jnp.tanh(g[:, 2 * H:3 * H])
            o_g = jax.nn.sigmoid(g[:, 3 * H:4 * H])
            c = f_g * c + i_g * g_g
            h = o_g * jnp.tanh(c)
            hs.append(h)
        seq = jnp.stack(hs, axis=1)
    hn = jnp.maximum(seq[:, -1, :], 0.0)
    z1 = jax.nn.sigmoid(jnp.dot(hn, params["fc1_w"],
                                preferred_element_type=jnp.float32) + params["fc1_b"])
    return jax.nn.sigmoid(jnp.dot(z1, params["fc_w"],
                                  preferred_element_type=jnp.float32) + params["fc_b"])


# --------------------------- parameter init -----------------------------------


def init_params(key, *, input_size, hidden_size, output_size, num_layers,
                num_embeddings=51, embedding_dim=10):
    H = hidden_size
    params = {}
    k = 1.0 / jnp.sqrt(jnp.float32(H))

    def u(key, shape, scale):
        return jax.random.uniform(key, shape, jnp.float32, -scale, scale)

    keys = jax.random.split(key, 3 + 4 * num_layers + 4)
    ki = iter(keys)

    params["embedding"] = jax.random.normal(next(ki), (num_embeddings, embedding_dim),
                                            jnp.float32)

    for l in range(num_layers):
        in_dim = input_size if l == 0 else H
        # stored pre-transposed: (in, 4H) / (H, 4H); bias is b_ih + b_hh fused
        params[f"w_ih_{l}"] = u(next(ki), (in_dim, 4 * H), k)
        params[f"w_hh_{l}"] = u(next(ki), (H, 4 * H), k)
        params[f"b_{l}"] = u(next(ki), (1, 4 * H), k) + u(next(ki), (1, 4 * H), k)

    k1 = 1.0 / jnp.sqrt(jnp.float32(H))
    params["fc1_w"] = u(next(ki), (H, 256), k1)           # (H, 256), pre-transposed
    params["fc1_b"] = u(next(ki), (1, 256), k1)
    k2 = 1.0 / jnp.sqrt(jnp.float32(256))
    params["fc_w"] = u(next(ki), (256, output_size), k2)  # (256, OUT)
    params["fc_b"] = u(next(ki), (1, output_size), k2)
    return params


# ---------------------------------- main ---------------------------------------


if __name__ == "__main__":
    # continuous features = 4, two embedding index columns, emb_dim = 10
    #   => LSTM input_size = 4 + 2*10 = 24
    B, T = 2, 8
    CONT_FEATS = 4
    EMB_DIM = 10
    NUM_EMB = 51
    INPUT_SIZE = CONT_FEATS + 2 * EMB_DIM   # 24
    HIDDEN = 32
    OUTPUT = 16
    NUM_LAYERS = 2

    root = jax.random.PRNGKey(0)
    kx, kidx, kp = jax.random.split(root, 3)

    cont = jax.random.normal(kx, (B, T, CONT_FEATS), jnp.float32)
    idx = jax.random.randint(kidx, (B, T, 2), 0, NUM_EMB).astype(jnp.float32)
    x = jnp.concatenate([cont, idx], axis=2)            # (B, T, CONT_FEATS + 2)

    params = init_params(kp, input_size=INPUT_SIZE, hidden_size=HIDDEN,
                         output_size=OUTPUT, num_layers=NUM_LAYERS,
                         num_embeddings=NUM_EMB, embedding_dim=EMB_DIM)

    fwd = jax.jit(functools.partial(melody_lstm_emb_forward,
                                    num_layers=NUM_LAYERS,
                                    hidden_size=HIDDEN,
                                    output_size=OUTPUT))
    out = jax.block_until_ready(fwd(x, params))

    ref = melody_lstm_emb_reference(x, params, num_layers=NUM_LAYERS,
                                    hidden_size=HIDDEN, output_size=OUTPUT)

    assert out.shape == (B, OUTPUT), out.shape
    assert bool(jnp.all(jnp.isfinite(out)))
    assert bool(jnp.all((out >= 0.0) & (out <= 1.0)))   # final sigmoid range
    # bf16 MXU operands inside the kernel vs f32 reference -> loose tolerance.
    assert float(jnp.max(jnp.abs(out - ref))) < 5e-2
    print("KERNEL_OK")
</pallas_src>

<mosaic_0001>
module attributes {stable_mosaic.version = 11 : i64} {
  func.func @kernel(%arg0: memref<64x128xf32, #tpu.memory_space<vmem>>, %arg1: memref<128x512xbf16, #tpu.memory_space<vmem>>, %arg2: memref<128x512xbf16, #tpu.memory_space<vmem>>, %arg3: memref<1x512xf32, #tpu.memory_space<vmem>>, %arg4: memref<256x512xbf16, #tpu.memory_space<vmem>>, %arg5: memref<1x512xf32, #tpu.memory_space<vmem>>, %arg6: memref<128x256xbf16, #tpu.memory_space<vmem>>, %arg7: memref<1x256xf32, #tpu.memory_space<vmem>>, %arg8: memref<256x128xbf16, #tpu.memory_space<vmem>>, %arg9: memref<1x128xf32, #tpu.memory_space<vmem>>, %arg10: memref<8x128xf32, #tpu.memory_space<vmem>>, %arg11: memref<64x512xf32, #tpu.memory_space<vmem>>) attributes {dimension_semantics = [], scalar_prefetch = 0 : i64, scratch_operands = 1 : i64, tpu.core_type = #tpu.core_type<tc>} {
    %c0 = arith.constant 0 : index
    %c0_0 = arith.constant 0 : index
    %0 = vector.load %arg0[%c0, %c0_0] : memref<64x128xf32, #tpu.memory_space<vmem>>, vector<64x128xf32>
    %1 = arith.truncf %0 : vector<64x128xf32> to vector<64x128xbf16>
    %c0_1 = arith.constant 0 : index
    %c0_2 = arith.constant 0 : index
    %2 = vector.load %arg1[%c0_1, %c0_2] : memref<128x512xbf16, #tpu.memory_space<vmem>>, vector<128x512xbf16>
    %cst = arith.constant dense<0.000000e+00> : vector<64x512xf32>
    %3 = tpu.matmul %1, %2, %cst {dimension_numbers = #tpu.dot_dimension_numbers<[1], [0], [0], [1], [0, 0, 1, 1], [], []>} : vector<64x128xbf16>, vector<128x512xbf16>, vector<64x512xf32> -> vector<64x512xf32>
    %c0_3 = arith.constant 0 : index
    %c0_4 = arith.constant 0 : index
    %4 = vector.load %arg3[%c0_3, %c0_4] : memref<1x512xf32, #tpu.memory_space<vmem>>, vector<1x512xf32>
    %5 = vector.broadcast %4 : vector<1x512xf32> to vector<64x512xf32>
    %6 = arith.addf %3, %5 : vector<64x512xf32>
    %c0_5 = arith.constant 0 : index
    %c0_6 = arith.constant 0 : index
    %7 = vector.load %arg11[%c0_5, %c0_6] : memref<64x512xf32, #tpu.memory_space<vmem>>, vector<64x512xf32>
    tpu.vector_store %arg11[%c0_5, %c0_6], %6 {strides = array<i32>} : memref<64x512xf32, #tpu.memory_space<vmem>>, vector<64x512xf32>,
    %c0_7 = arith.constant 0 : index
    %c0_8 = arith.constant 0 : index
    %8 = vector.load %arg2[%c0_7, %c0_8] : memref<128x512xbf16, #tpu.memory_space<vmem>>, vector<128x512xbf16>
    %c0_9 = arith.constant 0 : index
    %c0_10 = arith.constant 0 : index
    %9 = vector.load %arg4[%c0_9, %c0_10] : memref<256x512xbf16, #tpu.memory_space<vmem>>, vector<256x512xbf16>
    %c0_11 = arith.constant 0 : index
    %c0_12 = arith.constant 0 : index
    %10 = vector.load %arg5[%c0_11, %c0_12] : memref<1x512xf32, #tpu.memory_space<vmem>>, vector<1x512xf32>
    %cst_13 = arith.constant 0.000000e+00 : f32
    %11 = vector.broadcast %cst_13 : f32 to vector<8x128xf32>
    %cst_14 = arith.constant 0.000000e+00 : f32
    %12 = vector.broadcast %cst_14 : f32 to vector<8x128xf32>
    %cst_15 = arith.constant 0.000000e+00 : f32
    %13 = vector.broadcast %cst_15 : f32 to vector<8x128xf32>
    %cst_16 = arith.constant 0.000000e+00 : f32
    %14 = vector.broadcast %cst_16 : f32 to vector<8x128xf32>
    %c0_17 = arith.constant 0 : index
    %c0_18 = arith.constant 0 : index
    %15 = vector.load %arg11[%c0_17, %c0_18] : memref<64x512xf32, #tpu.memory_space<vmem>>, vector<8x512xf32>
    %16 = arith.truncf %11 : vector<8x128xf32> to vector<8x128xbf16>
    %cst_19 = arith.constant dense<0.000000e+00> : vector<8x512xf32>
    %17 = tpu.matmul %16, %8, %cst_19 {dimension_numbers = #tpu.dot_dimension_numbers<[1], [0], [0], [1], [0, 0, 1, 1], [], []>} : vector<8x128xbf16>, vector<128x512xbf16>, vector<8x512xf32> -> vector<8x512xf32>
    %18 = arith.addf %15, %17 : vector<8x512xf32>
    %19 = vector.extract_strided_slice %18 {offsets = [0, 0], sizes = [8, 128], strides = [1, 1]} : vector<8x512xf32> to vector<8x128xf32>
    %20 = arith.negf %19 : vector<8x128xf32>
    %21 = math.exp %20 : vector<8x128xf32>
    %cst_20 = arith.constant 1.000000e+00 : f32
    %22 = vector.broadcast %cst_20 : f32 to vector<8x128xf32>
    %23 = arith.addf %22, %21 : vector<8x128xf32>
    %24 = arith.divf %22, %23 : vector<8x128xf32>
    %25 = vector.extract_strided_slice %18 {offsets = [0, 128], sizes = [8, 128], strides = [1, 1]} : vector<8x512xf32> to vector<8x128xf32>
    %26 = arith.negf %25 : vector<8x128xf32>
    %27 = math.exp %26 : vector<8x128xf32>
    %cst_21 = arith.constant 1.000000e+00 : f32
    %28 = vector.broadcast %cst_21 : f32 to vector<8x128xf32>
    %29 = arith.addf %28, %27 : vector<8x128xf32>
    %30 = arith.divf %28, %29 : vector<8x128xf32>
    %31 = vector.extract_strided_slice %18 {offsets = [0, 256], sizes = [8, 128], strides = [1, 1]} : vector<8x512xf32> to vector<8x128xf32>
    %32 = math.tanh %31 : vector<8x128xf32>
    %33 = vector.extract_strided_slice %18 {offsets = [0, 384], sizes = [8, 128], strides = [1, 1]} : vector<8x512xf32> to vector<8x128xf32>
    %34 = arith.negf %33 : vector<8x128xf32>
    %35 = math.exp %34 : vector<8x128xf32>
    %cst_22 = arith.constant 1.000000e+00 : f32
    %36 = vector.broadcast %cst_22 : f32 to vector<8x128xf32>
    %37 = arith.addf %36, %35 : vector<8x128xf32>
    %38 = arith.divf %36, %37 : vector<8x128xf32>
    %39 = arith.mulf %30, %13 : vector<8x128xf32>
    %40 = arith.mulf %24, %32 : vector<8x128xf32>
    %41 = arith.addf %39, %40 : vector<8x128xf32>
    %42 = math.tanh %41 : vector<8x128xf32>
    %43 = arith.mulf %38, %42 : vector<8x128xf32>
    %44 = tpu.concatenate %43, %12 in 1 : vector<8x128xf32>, vector<8x128xf32> -> vector<8x256xf32>
    %45 = arith.truncf %44 : vector<8x256xf32> to vector<8x256xbf16>
    %cst_23 = arith.constant dense<0.000000e+00> : vector<8x512xf32>
    %46 = tpu.matmul %45, %9, %cst_23 {dimension_numbers = #tpu.dot_dimension_numbers<[1], [0], [0], [1], [0, 0, 1, 1], [], []>} : vector<8x256xbf16>, vector<256x512xbf16>, vector<8x512xf32> -> vector<8x512xf32>
    %47 = vector.broadcast %10 : vector<1x512xf32> to vector<8x512xf32>
    %48 = arith.addf %46, %47 : vector<8x512xf32>
    %49 = vector.extract_strided_slice %48 {offsets = [0, 0], sizes = [8, 128], strides = [1, 1]} : vector<8x512xf32> to vector<8x128xf32>
    %50 = arith.negf %49 : vector<8x128xf32>
    %51 = math.exp %50 : vector<8x128xf32>
    %cst_24 = arith.constant 1.000000e+00 : f32
    %52 = vector.broadcast %cst_24 : f32 to vector<8x128xf32>
    %53 = arith.addf %52, %51 : vector<8x128xf32>
    %54 = arith.divf %52, %53 : vector<8x128xf32>
    %55 = vector.extract_strided_slice %48 {offsets = [0, 128], sizes = [8, 128], strides = [1, 1]} : vector<8x512xf32> to vector<8x128xf32>
    %56 = arith.negf %55 : vector<8x128xf32>
    %57 = math.exp %56 : vector<8x128xf32>
    %cst_25 = arith.constant 1.000000e+00 : f32
    %58 = vector.broadcast %cst_25 : f32 to vector<8x128xf32>
    %59 = arith.addf %58, %57 : vector<8x128xf32>
    %60 = arith.divf %58, %59 : vector<8x128xf32>
    %61 = vector.extract_strided_slice %48 {offsets = [0, 256], sizes = [8, 128], strides = [1, 1]} : vector<8x512xf32> to vector<8x128xf32>
    %62 = math.tanh %61 : vector<8x128xf32>
    %63 = vector.extract_strided_slice %48 {offsets = [0, 384], sizes = [8, 128], strides = [1, 1]} : vector<8x512xf32> to vector<8x128xf32>
    %64 = arith.negf %63 : vector<8x128xf32>
    %65 = math.exp %64 : vector<8x128xf32>
    %cst_26 = arith.constant 1.000000e+00 : f32
    %66 = vector.broadcast %cst_26 : f32 to vector<8x128xf32>
    %67 = arith.addf %66, %65 : vector<8x128xf32>
    %68 = arith.divf %66, %67 : vector<8x128xf32>
    %69 = arith.mulf %60, %14 : vector<8x128xf32>
    %70 = arith.mulf %54, %62 : vector<8x128xf32>
    %71 = arith.addf %69, %70 : vector<8x128xf32>
    %72 = math.tanh %71 : vector<8x128xf32>
    %73 = arith.mulf %68, %72 : vector<8x128xf32>
    %c8 = arith.constant 8 : index
    %c0_27 = arith.constant 0 : index
    %74 = vector.load %arg11[%c8, %c0_27] : memref<64x512xf32, #tpu.memory_space<vmem>>, vector<8x512xf32>
    %75 = arith.truncf %43 : vector<8x128xf32> to vector<8x128xbf16>
    %cst_28 = arith.constant dense<0.000000e+00> : vector<8x512xf32>
    %76 = tpu.matmul %75, %8, %cst_28 {dimension_numbers = #tpu.dot_dimension_numbers<[1], [0], [0], [1], [0, 0, 1, 1], [], []>} : vector<8x128xbf16>, vector<128x512xbf16>, vector<8x512xf32> -> vector<8x512xf32>
    %77 = arith.addf %74, %76 : vector<8x512xf32>
    %78 = vector.extract_strided_slice %77 {offsets = [0, 0], sizes = [8, 128], strides = [1, 1]} : vector<8x512xf32> to vector<8x128xf32>
    %79 = arith.negf %78 : vector<8x128xf32>
    %80 = math.exp %79 : vector<8x128xf32>
    %cst_29 = arith.constant 1.000000e+00 : f32
    %81 = vector.broadcast %cst_29 : f32 to vector<8x128xf32>
    %82 = arith.addf %81, %80 : vector<8x128xf32>
    %83 = arith.divf %81, %82 : vector<8x128xf32>
    %84 = vector.extract_strided_slice %77 {offsets = [0, 128], sizes = [8, 128], strides = [1, 1]} : vector<8x512xf32> to vector<8x128xf32>
    %85 = arith.negf %84 : vector<8x128xf32>
    %86 = math.exp %85 : vector<8x128xf32>
    %cst_30 = arith.constant 1.000000e+00 : f32
    %87 = vector.broadcast %cst_30 : f32 to vector<8x128xf32>
    %88 = arith.addf %87, %86 : vector<8x128xf32>
    %89 = arith.divf %87, %88 : vector<8x128xf32>
    %90 = vector.extract_strided_slice %77 {offsets = [0, 256], sizes = [8, 128], strides = [1, 1]} : vector<8x512xf32> to vector<8x128xf32>
    %91 = math.tanh %90 : vector<8x128xf32>
    %92 = vector.extract_strided_slice %77 {offsets = [0, 384], sizes = [8, 128], strides = [1, 1]} : vector<8x512xf32> to vector<8x128xf32>
    %93 = arith.negf %92 : vector<8x128xf32>
    %94 = math.exp %93 : vector<8x128xf32>
    %cst_31 = arith.constant 1.000000e+00 : f32
    %95 = vector.broadcast %cst_31 : f32 to vector<8x128xf32>
    %96 = arith.addf %95, %94 : vector<8x128xf32>
    %97 = arith.divf %95, %96 : vector<8x128xf32>
    %98 = arith.mulf %89, %41 : vector<8x128xf32>
    %99 = arith.mulf %83, %91 : vector<8x128xf32>
    %100 = arith.addf %98, %99 : vector<8x128xf32>
    %101 = math.tanh %100 : vector<8x128xf32>
    %102 = arith.mulf %97, %101 : vector<8x128xf32>
    %103 = tpu.concatenate %102, %73 in 1 : vector<8x128xf32>, vector<8x128xf32> -> vector<8x256xf32>
    %104 = arith.truncf %103 : vector<8x256xf32> to vector<8x256xbf16>
    %cst_32 = arith.constant dense<0.000000e+00> : vector<8x512xf32>
    %105 = tpu.matmul %104, %9, %cst_32 {dimension_numbers = #tpu.dot_dimension_numbers<[1], [0], [0], [1], [0, 0, 1, 1], [], []>} : vector<8x256xbf16>, vector<256x512xbf16>, vector<8x512xf32> -> vector<8x512xf32>
    %106 = vector.broadcast %10 : vector<1x512xf32> to vector<8x512xf32>
    %107 = arith.addf %105, %106 : vector<8x512xf32>
    %108 = vector.extract_strided_slice %107 {offsets = [0, 0], sizes = [8, 128], strides = [1, 1]} : vector<8x512xf32> to vector<8x128xf32>
    %109 = arith.negf %108 : vector<8x128xf32>
    %110 = math.exp %109 : vector<8x128xf32>
    %cst_33 = arith.constant 1.000000e+00 : f32
    %111 = vector.broadcast %cst_33 : f32 to vector<8x128xf32>
    %112 = arith.addf %111, %110 : vector<8x128xf32>
    %113 = arith.divf %111, %112 : vector<8x128xf32>
    %114 = vector.extract_strided_slice %107 {offsets = [0, 128], sizes = [8, 128], strides = [1, 1]} : vector<8x512xf32> to vector<8x128xf32>
    %115 = arith.negf %114 : vector<8x128xf32>
    %116 = math.exp %115 : vector<8x128xf32>
    %cst_34 = arith.constant 1.000000e+00 : f32
    %117 = vector.broadcast %cst_34 : f32 to vector<8x128xf32>
    %118 = arith.addf %117, %116 : vector<8x128xf32>
    %119 = arith.divf %117, %118 : vector<8x128xf32>
    %120 = vector.extract_strided_slice %107 {offsets = [0, 256], sizes = [8, 128], strides = [1, 1]} : vector<8x512xf32> to vector<8x128xf32>
    %121 = math.tanh %120 : vector<8x128xf32>
    %122 = vector.extract_strided_slice %107 {offsets = [0, 384], sizes = [8, 128], strides = [1, 1]} : vector<8x512xf32> to vector<8x128xf32>
    %123 = arith.negf %122 : vector<8x128xf32>
    %124 = math.exp %123 : vector<8x128xf32>
    %cst_35 = arith.constant 1.000000e+00 : f32
    %125 = vector.broadcast %cst_35 : f32 to vector<8x128xf32>
    %126 = arith.addf %125, %124 : vector<8x128xf32>
    %127 = arith.divf %125, %126 : vector<8x128xf32>
    %128 = arith.mulf %119, %71 : vector<8x128xf32>
    %129 = arith.mulf %113, %121 : vector<8x128xf32>
    %130 = arith.addf %128, %129 : vector<8x128xf32>
    %131 = math.tanh %130 : vector<8x128xf32>
    %132 = arith.mulf %127, %131 : vector<8x128xf32>
    %c16 = arith.constant 16 : index
    %c0_36 = arith.constant 0 : index
    %133 = vector.load %arg11[%c16, %c0_36] : memref<64x512xf32, #tpu.memory_space<vmem>>, vector<8x512xf32>
    %134 = arith.truncf %102 : vector<8x128xf32> to vector<8x128xbf16>
    %cst_37 = arith.constant dense<0.000000e+00> : vector<8x512xf32>
    %135 = tpu.matmul %134, %8, %cst_37 {dimension_numbers = #tpu.dot_dimension_numbers<[1], [0], [0], [1], [0, 0, 1, 1], [], []>} : vector<8x128xbf16>, vector<128x512xbf16>, vector<8x512xf32> -> vector<8x512xf32>
    %136 = arith.addf %133, %135 : vector<8x512xf32>
    %137 = vector.extract_strided_slice %136 {offsets = [0, 0], sizes = [8, 128], strides = [1, 1]} : vector<8x512xf32> to vector<8x128xf32>
    %138 = arith.negf %137 : vector<8x128xf32>
    %139 = math.exp %138 : vector<8x128xf32>
    %cst_38 = arith.constant 1.000000e+00 : f32
    %140 = vector.broadcast %cst_38 : f32 to vector<8x128xf32>
    %141 = arith.addf %140, %139 : vector<8x128xf32>
    %142 = arith.divf %140, %141 : vector<8x128xf32>
    %143 = vector.extract_strided_slice %136 {offsets = [0, 128], sizes = [8, 128], strides = [1, 1]} : vector<8x512xf32> to vector<8x128xf32>
    %144 = arith.negf %143 : vector<8x128xf32>
    %145 = math.exp %144 : vector<8x128xf32>
    %cst_39 = arith.constant 1.000000e+00 : f32
    %146 = vector.broadcast %cst_39 : f32 to vector<8x128xf32>
    %147 = arith.addf %146, %145 : vector<8x128xf32>
    %148 = arith.divf %146, %147 : vector<8x128xf32>
    %149 = vector.extract_strided_slice %136 {offsets = [0, 256], sizes = [8, 128], strides = [1, 1]} : vector<8x512xf32> to vector<8x128xf32>
    %150 = math.tanh %149 : vector<8x128xf32>
    %151 = vector.extract_strided_slice %136 {offsets = [0, 384], sizes = [8, 128], strides = [1, 1]} : vector<8x512xf32> to vector<8x128xf32>
    %152 = arith.negf %151 : vector<8x128xf32>
    %153 = math.exp %152 : vector<8x128xf32>
    %cst_40 = arith.constant 1.000000e+00 : f32
    %154 = vector.broadcast %cst_40 : f32 to vector<8x128xf32>
    %155 = arith.addf %154, %153 : vector<8x128xf32>
    %156 = arith.divf %154, %155 : vector<8x128xf32>
    %157 = arith.mulf %148, %100 : vector<8x128xf32>
    %158 = arith.mulf %142, %150 : vector<8x128xf32>
    %159 = arith.addf %157, %158 : vector<8x128xf32>
    %160 = math.tanh %159 : vector<8x128xf32>
    %161 = arith.mulf %156, %160 : vector<8x128xf32>
    %162 = tpu.concatenate %161, %132 in 1 : vector<8x128xf32>, vector<8x128xf32> -> vector<8x256xf32>
    %163 = arith.truncf %162 : vector<8x256xf32> to vector<8x256xbf16>
    %cst_41 = arith.constant dense<0.000000e+00> : vector<8x512xf32>
    %164 = tpu.matmul %163, %9, %cst_41 {dimension_numbers = #tpu.dot_dimension_numbers<[1], [0], [0], [1], [0, 0, 1, 1], [], []>} : vector<8x256xbf16>, vector<256x512xbf16>, vector<8x512xf32> -> vector<8x512xf32>
    %165 = vector.broadcast %10 : vector<1x512xf32> to vector<8x512xf32>
    %166 = arith.addf %164, %165 : vector<8x512xf32>
    %167 = vector.extract_strided_slice %166 {offsets = [0, 0], sizes = [8, 128], strides = [1, 1]} : vector<8x512xf32> to vector<8x128xf32>
    %168 = arith.negf %167 : vector<8x128xf32>
    %169 = math.exp %168 : vector<8x128xf32>
    %cst_42 = arith.constant 1.000000e+00 : f32
    %170 = vector.broadcast %cst_42 : f32 to vector<8x128xf32>
    %171 = arith.addf %170, %169 : vector<8x128xf32>
    %172 = arith.divf %170, %171 : vector<8x128xf32>
    %173 = vector.extract_strided_slice %166 {offsets = [0, 128], sizes = [8, 128], strides = [1, 1]} : vector<8x512xf32> to vector<8x128xf32>
    %174 = arith.negf %173 : vector<8x128xf32>
    %175 = math.exp %174 : vector<8x128xf32>
    %cst_43 = arith.constant 1.000000e+00 : f32
    %176 = vector.broadcast %cst_43 : f32 to vector<8x128xf32>
    %177 = arith.addf %176, %175 : vector<8x128xf32>
    %178 = arith.divf %176, %177 : vector<8x128xf32>
    %179 = vector.extract_strided_slice %166 {offsets = [0, 256], sizes = [8, 128], strides = [1, 1]} : vector<8x512xf32> to vector<8x128xf32>
    %180 = math.tanh %179 : vector<8x128xf32>
    %181 = vector.extract_strided_slice %166 {offsets = [0, 384], sizes = [8, 128], strides = [1, 1]} : vector<8x512xf32> to vector<8x128xf32>
    %182 = arith.negf %181 : vector<8x128xf32>
    %183 = math.exp %182 : vector<8x128xf32>
    %cst_44 = arith.constant 1.000000e+00 : f32
    %184 = vector.broadcast %cst_44 : f32 to vector<8x128xf32>
    %185 = arith.addf %184, %183 : vector<8x128xf32>
    %186 = arith.divf %184, %185 : vector<8x128xf32>
    %187 = arith.mulf %178, %130 : vector<8x128xf32>
    %188 = arith.mulf %172, %180 : vector<8x128xf32>
    %189 = arith.addf %187, %188 : vector<8x128xf32>
    %190 = math.tanh %189 : vector<8x128xf32>
    %191 = arith.mulf %186, %190 : vector<8x128xf32>
    %c24 = arith.constant 24 : index
    %c0_45 = arith.constant 0 : index
    %192 = vector.load %arg11[%c24, %c0_45] : memref<64x512xf32, #tpu.memory_space<vmem>>, vector<8x512xf32>
    %193 = arith.truncf %161 : vector<8x128xf32> to vector<8x128xbf16>
    %cst_46 = arith.constant dense<0.000000e+00> : vector<8x512xf32>
    %194 = tpu.matmul %193, %8, %cst_46 {dimension_numbers = #tpu.dot_dimension_numbers<[1], [0], [0], [1], [0, 0, 1, 1], [], []>} : vector<8x128xbf16>, vector<128x512xbf16>, vector<8x512xf32> -> vector<8x512xf32>
    %195 = arith.addf %192, %194 : vector<8x512xf32>
    %196 = vector.extract_strided_slice %195 {offsets = [0, 0], sizes = [8, 128], strides = [1, 1]} : vector<8x512xf32> to vector<8x128xf32>
    %197 = arith.negf %196 : vector<8x128xf32>
    %198 = math.exp %197 : vector<8x128xf32>
    %cst_47 = arith.constant 1.000000e+00 : f32
    %199 = vector.broadcast %cst_47 : f32 to vector<8x128xf32>
    %200 = arith.addf %199, %198 : vector<8x128xf32>
    %201 = arith.divf %199, %200 : vector<8x128xf32>
    %202 = vector.extract_strided_slice %195 {offsets = [0, 128], sizes = [8, 128], strides = [1, 1]} : vector<8x512xf32> to vector<8x128xf32>
    %203 = arith.negf %202 : vector<8x128xf32>
    %204 = math.exp %203 : vector<8x128xf32>
    %cst_48 = arith.constant 1.000000e+00 : f32
    %205 = vector.broadcast %cst_48 : f32 to vector<8x128xf32>
    %206 = arith.addf %205, %204 : vector<8x128xf32>
    %207 = arith.divf %205, %206 : vector<8x128xf32>
    %208 = vector.extract_strided_slice %195 {offsets = [0, 256], sizes = [8, 128], strides = [1, 1]} : vector<8x512xf32> to vector<8x128xf32>
    %209 = math.tanh %208 : vector<8x128xf32>
    %210 = vector.extract_strided_slice %195 {offsets = [0, 384], sizes = [8, 128], strides = [1, 1]} : vector<8x512xf32> to vector<8x128xf32>
    %211 = arith.negf %210 : vector<8x128xf32>
    %212 = math.exp %211 : vector<8x128xf32>
    %cst_49 = arith.constant 1.000000e+00 : f32
    %213 = vector.broadcast %cst_49 : f32 to vector<8x128xf32>
    %214 = arith.addf %213, %212 : vector<8x128xf32>
    %215 = arith.divf %213, %214 : vector<8x128xf32>
    %216 = arith.mulf %207, %159 : vector<8x128xf32>
    %217 = arith.mulf %201, %209 : vector<8x128xf32>
    %218 = arith.addf %216, %217 : vector<8x128xf32>
    %219 = math.tanh %218 : vector<8x128xf32>
    %220 = arith.mulf %215, %219 : vector<8x128xf32>
    %221 = tpu.concatenate %220, %191 in 1 : vector<8x128xf32>, vector<8x128xf32> -> vector<8x256xf32>
    %222 = arith.truncf %221 : vector<8x256xf32> to vector<8x256xbf16>
    %cst_50 = arith.constant dense<0.000000e+00> : vector<8x512xf32>
    %223 = tpu.matmul %222, %9, %cst_50 {dimension_numbers = #tpu.dot_dimension_numbers<[1], [0], [0], [1], [0, 0, 1, 1], [], []>} : vector<8x256xbf16>, vector<256x512xbf16>, vector<8x512xf32> -> vector<8x512xf32>
    %224 = vector.broadcast %10 : vector<1x512xf32> to vector<8x512xf32>
    %225 = arith.addf %223, %224 : vector<8x512xf32>
    %226 = vector.extract_strided_slice %225 {offsets = [0, 0], sizes = [8, 128], strides = [1, 1]} : vector<8x512xf32> to vector<8x128xf32>
    %227 = arith.negf %226 : vector<8x128xf32>
    %228 = math.exp %227 : vector<8x128xf32>
    %cst_51 = arith.constant 1.000000e+00 : f32
    %229 = vector.broadcast %cst_51 : f32 to vector<8x128xf32>
    %230 = arith.addf %229, %228 : vector<8x128xf32>
    %231 = arith.divf %229, %230 : vector<8x128xf32>
    %232 = vector.extract_strided_slice %225 {offsets = [0, 128], sizes = [8, 128], strides = [1, 1]} : vector<8x512xf32> to vector<8x128xf32>
    %233 = arith.negf %232 : vector<8x128xf32>
    %234 = math.exp %233 : vector<8x128xf32>
    %cst_52 = arith.constant 1.000000e+00 : f32
    %235 = vector.broadcast %cst_52 : f32 to vector<8x128xf32>
    %236 = arith.addf %235, %234 : vector<8x128xf32>
    %237 = arith.divf %235, %236 : vector<8x128xf32>
    %238 = vector.extract_strided_slice %225 {offsets = [0, 256], sizes = [8, 128], strides = [1, 1]} : vector<8x512xf32> to vector<8x128xf32>
    %239 = math.tanh %238 : vector<8x128xf32>
    %240 = vector.extract_strided_slice %225 {offsets = [0, 384], sizes = [8, 128], strides = [1, 1]} : vector<8x512xf32> to vector<8x128xf32>
    %241 = arith.negf %240 : vector<8x128xf32>
    %242 = math.exp %241 : vector<8x128xf32>
    %cst_53 = arith.constant 1.000000e+00 : f32
    %243 = vector.broadcast %cst_53 : f32 to vector<8x128xf32>
    %244 = arith.addf %243, %242 : vector<8x128xf32>
    %245 = arith.divf %243, %244 : vector<8x128xf32>
    %246 = arith.mulf %237, %189 : vector<8x128xf32>
    %247 = arith.mulf %231, %239 : vector<8x128xf32>
    %248 = arith.addf %246, %247 : vector<8x128xf32>
    %249 = math.tanh %248 : vector<8x128xf32>
    %250 = arith.mulf %245, %249 : vector<8x128xf32>
    %c32 = arith.constant 32 : index
    %c0_54 = arith.constant 0 : index
    %251 = vector.load %arg11[%c32, %c0_54] : memref<64x512xf32, #tpu.memory_space<vmem>>, vector<8x512xf32>
    %252 = arith.truncf %220 : vector<8x128xf32> to vector<8x128xbf16>
    %cst_55 = arith.constant dense<0.000000e+00> : vector<8x512xf32>
    %253 = tpu.matmul %252, %8, %cst_55 {dimension_numbers = #tpu.dot_dimension_numbers<[1], [0], [0], [1], [0, 0, 1, 1], [], []>} : vector<8x128xbf16>, vector<128x512xbf16>, vector<8x512xf32> -> vector<8x512xf32>
    %254 = arith.addf %251, %253 : vector<8x512xf32>
    %255 = vector.extract_strided_slice %254 {offsets = [0, 0], sizes = [8, 128], strides = [1, 1]} : vector<8x512xf32> to vector<8x128xf32>
    %256 = arith.negf %255 : vector<8x128xf32>
    %257 = math.exp %256 : vector<8x128xf32>
    %cst_56 = arith.constant 1.000000e+00 : f32
    %258 = vector.broadcast %cst_56 : f32 to vector<8x128xf32>
    %259 = arith.addf %258, %257 : vector<8x128xf32>
    %260 = arith.divf %258, %259 : vector<8x128xf32>
    %261 = vector.extract_strided_slice %254 {offsets = [0, 128], sizes = [8, 128], strides = [1, 1]} : vector<8x512xf32> to vector<8x128xf32>
    %262 = arith.negf %261 : vector<8x128xf32>
    %263 = math.exp %262 : vector<8x128xf32>
    %cst_57 = arith.constant 1.000000e+00 : f32
    %264 = vector.broadcast %cst_57 : f32 to vector<8x128xf32>
    %265 = arith.addf %264, %263 : vector<8x128xf32>
    %266 = arith.divf %264, %265 : vector<8x128xf32>
    %267 = vector.extract_strided_slice %254 {offsets = [0, 256], sizes = [8, 128], strides = [1, 1]} : vector<8x512xf32> to vector<8x128xf32>
    %268 = math.tanh %267 : vector<8x128xf32>
    %269 = vector.extract_strided_slice %254 {offsets = [0, 384], sizes = [8, 128], strides = [1, 1]} : vector<8x512xf32> to vector<8x128xf32>
    %270 = arith.negf %269 : vector<8x128xf32>
    %271 = math.exp %270 : vector<8x128xf32>
    %cst_58 = arith.constant 1.000000e+00 : f32
    %272 = vector.broadcast %cst_58 : f32 to vector<8x128xf32>
    %273 = arith.addf %272, %271 : vector<8x128xf32>
    %274 = arith.divf %272, %273 : vector<8x128xf32>
    %275 = arith.mulf %266, %218 : vector<8x128xf32>
    %276 = arith.mulf %260, %268 : vector<8x128xf32>
    %277 = arith.addf %275, %276 : vector<8x128xf32>
    %278 = math.tanh %277 : vector<8x128xf32>
    %279 = arith.mulf %274, %278 : vector<8x128xf32>
    %280 = tpu.concatenate %279, %250 in 1 : vector<8x128xf32>, vector<8x128xf32> -> vector<8x256xf32>
    %281 = arith.truncf %280 : vector<8x256xf32> to vector<8x256xbf16>
    %cst_59 = arith.constant dense<0.000000e+00> : vector<8x512xf32>
    %282 = tpu.matmul %281, %9, %cst_59 {dimension_numbers = #tpu.dot_dimension_numbers<[1], [0], [0], [1], [0, 0, 1, 1], [], []>} : vector<8x256xbf16>, vector<256x512xbf16>, vector<8x512xf32> -> vector<8x512xf32>
    %283 = vector.broadcast %10 : vector<1x512xf32> to vector<8x512xf32>
    %284 = arith.addf %282, %283 : vector<8x512xf32>
    %285 = vector.extract_strided_slice %284 {offsets = [0, 0], sizes = [8, 128], strides = [1, 1]} : vector<8x512xf32> to vector<8x128xf32>
    %286 = arith.negf %285 : vector<8x128xf32>
    %287 = math.exp %286 : vector<8x128xf32>
    %cst_60 = arith.constant 1.000000e+00 : f32
    %288 = vector.broadcast %cst_60 : f32 to vector<8x128xf32>
    %289 = arith.addf %288, %287 : vector<8x128xf32>
    %290 = arith.divf %288, %289 : vector<8x128xf32>
    %291 = vector.extract_strided_slice %284 {offsets = [0, 128], sizes = [8, 128], strides = [1, 1]} : vector<8x512xf32> to vector<8x128xf32>
    %292 = arith.negf %291 : vector<8x128xf32>
    %293 = math.exp %292 : vector<8x128xf32>
    %cst_61 = arith.constant 1.000000e+00 : f32
    %294 = vector.broadcast %cst_61 : f32 to vector<8x128xf32>
    %295 = arith.addf %294, %293 : vector<8x128xf32>
    %296 = arith.divf %294, %295 : vector<8x128xf32>
    %297 = vector.extract_strided_slice %284 {offsets = [0, 256], sizes = [8, 128], strides = [1, 1]} : vector<8x512xf32> to vector<8x128xf32>
    %298 = math.tanh %297 : vector<8x128xf32>
    %299 = vector.extract_strided_slice %284 {offsets = [0, 384], sizes = [8, 128], strides = [1, 1]} : vector<8x512xf32> to vector<8x128xf32>
    %300 = arith.negf %299 : vector<8x128xf32>
    %301 = math.exp %300 : vector<8x128xf32>
    %cst_62 = arith.constant 1.000000e+00 : f32
    %302 = vector.broadcast %cst_62 : f32 to vector<8x128xf32>
    %303 = arith.addf %302, %301 : vector<8x128xf32>
    %304 = arith.divf %302, %303 : vector<8x128xf32>
    %305 = arith.mulf %296, %248 : vector<8x128xf32>
    %306 = arith.mulf %290, %298 : vector<8x128xf32>
    %307 = arith.addf %305, %306 : vector<8x128xf32>
    %308 = math.tanh %307 : vector<8x128xf32>
    %309 = arith.mulf %304, %308 : vector<8x128xf32>
    %c40 = arith.constant 40 : index
    %c0_63 = arith.constant 0 : index
    %310 = vector.load %arg11[%c40, %c0_63] : memref<64x512xf32, #tpu.memory_space<vmem>>, vector<8x512xf32>
    %311 = arith.truncf %279 : vector<8x128xf32> to vector<8x128xbf16>
    %cst_64 = arith.constant dense<0.000000e+00> : vector<8x512xf32>
    %312 = tpu.matmul %311, %8, %cst_64 {dimension_numbers = #tpu.dot_dimension_numbers<[1], [0], [0], [1], [0, 0, 1, 1], [], []>} : vector<8x128xbf16>, vector<128x512xbf16>, vector<8x512xf32> -> vector<8x512xf32>
    %313 = arith.addf %310, %312 : vector<8x512xf32>
    %314 = vector.extract_strided_slice %313 {offsets = [0, 0], sizes = [8, 128], strides = [1, 1]} : vector<8x512xf32> to vector<8x128xf32>
    %315 = arith.negf %314 : vector<8x128xf32>
    %316 = math.exp %315 : vector<8x128xf32>
    %cst_65 = arith.constant 1.000000e+00 : f32
    %317 = vector.broadcast %cst_65 : f32 to vector<8x128xf32>
    %318 = arith.addf %317, %316 : vector<8x128xf32>
    %319 = arith.divf %317, %318 : vector<8x128xf32>
    %320 = vector.extract_strided_slice %313 {offsets = [0, 128], sizes = [8, 128], strides = [1, 1]} : vector<8x512xf32> to vector<8x128xf32>
    %321 = arith.negf %320 : vector<8x128xf32>
    %322 = math.exp %321 : vector<8x128xf32>
    %cst_66 = arith.constant 1.000000e+00 : f32
    %323 = vector.broadcast %cst_66 : f32 to vector<8x128xf32>
    %324 = arith.addf %323, %322 : vector<8x128xf32>
    %325 = arith.divf %323, %324 : vector<8x128xf32>
    %326 = vector.extract_strided_slice %313 {offsets = [0, 256], sizes = [8, 128], strides = [1, 1]} : vector<8x512xf32> to vector<8x128xf32>
    %327 = math.tanh %326 : vector<8x128xf32>
    %328 = vector.extract_strided_slice %313 {offsets = [0, 384], sizes = [8, 128], strides = [1, 1]} : vector<8x512xf32> to vector<8x128xf32>
    %329 = arith.negf %328 : vector<8x128xf32>
    %330 = math.exp %329 : vector<8x128xf32>
    %cst_67 = arith.constant 1.000000e+00 : f32
    %331 = vector.broadcast %cst_67 : f32 to vector<8x128xf32>
    %332 = arith.addf %331, %330 : vector<8x128xf32>
    %333 = arith.divf %331, %332 : vector<8x128xf32>
    %334 = arith.mulf %325, %277 : vector<8x128xf32>
    %335 = arith.mulf %319, %327 : vector<8x128xf32>
    %336 = arith.addf %334, %335 : vector<8x128xf32>
    %337 = math.tanh %336 : vector<8x128xf32>
    %338 = arith.mulf %333, %337 : vector<8x128xf32>
    %339 = tpu.concatenate %338, %309 in 1 : vector<8x128xf32>, vector<8x128xf32> -> vector<8x256xf32>
    %340 = arith.truncf %339 : vector<8x256xf32> to vector<8x256xbf16>
    %cst_68 = arith.constant dense<0.000000e+00> : vector<8x512xf32>
    %341 = tpu.matmul %340, %9, %cst_68 {dimension_numbers = #tpu.dot_dimension_numbers<[1], [0], [0], [1], [0, 0, 1, 1], [], []>} : vector<8x256xbf16>, vector<256x512xbf16>, vector<8x512xf32> -> vector<8x512xf32>
    %342 = vector.broadcast %10 : vector<1x512xf32> to vector<8x512xf32>
    %343 = arith.addf %341, %342 : vector<8x512xf32>
    %344 = vector.extract_strided_slice %343 {offsets = [0, 0], sizes = [8, 128], strides = [1, 1]} : vector<8x512xf32> to vector<8x128xf32>
    %345 = arith.negf %344 : vector<8x128xf32>
    %346 = math.exp %345 : vector<8x128xf32>
    %cst_69 = arith.constant 1.000000e+00 : f32
    %347 = vector.broadcast %cst_69 : f32 to vector<8x128xf32>
    %348 = arith.addf %347, %346 : vector<8x128xf32>
    %349 = arith.divf %347, %348 : vector<8x128xf32>
    %350 = vector.extract_strided_slice %343 {offsets = [0, 128], sizes = [8, 128], strides = [1, 1]} : vector<8x512xf32> to vector<8x128xf32>
    %351 = arith.negf %350 : vector<8x128xf32>
    %352 = math.exp %351 : vector<8x128xf32>
    %cst_70 = arith.constant 1.000000e+00 : f32
    %353 = vector.broadcast %cst_70 : f32 to vector<8x128xf32>
    %354 = arith.addf %353, %352 : vector<8x128xf32>
    %355 = arith.divf %353, %354 : vector<8x128xf32>
    %356 = vector.extract_strided_slice %343 {offsets = [0, 256], sizes = [8, 128], strides = [1, 1]} : vector<8x512xf32> to vector<8x128xf32>
    %357 = math.tanh %356 : vector<8x128xf32>
    %358 = vector.extract_strided_slice %343 {offsets = [0, 384], sizes = [8, 128], strides = [1, 1]} : vector<8x512xf32> to vector<8x128xf32>
    %359 = arith.negf %358 : vector<8x128xf32>
    %360 = math.exp %359 : vector<8x128xf32>
    %cst_71 = arith.constant 1.000000e+00 : f32
    %361 = vector.broadcast %cst_71 : f32 to vector<8x128xf32>
    %362 = arith.addf %361, %360 : vector<8x128xf32>
    %363 = arith.divf %361, %362 : vector<8x128xf32>
    %364 = arith.mulf %355, %307 : vector<8x128xf32>
    %365 = arith.mulf %349, %357 : vector<8x128xf32>
    %366 = arith.addf %364, %365 : vector<8x128xf32>
    %367 = math.tanh %366 : vector<8x128xf32>
    %368 = arith.mulf %363, %367 : vector<8x128xf32>
    %c48 = arith.constant 48 : index
    %c0_72 = arith.constant 0 : index
    %369 = vector.load %arg11[%c48, %c0_72] : memref<64x512xf32, #tpu.memory_space<vmem>>, vector<8x512xf32>
    %370 = arith.truncf %338 : vector<8x128xf32> to vector<8x128xbf16>
    %cst_73 = arith.constant dense<0.000000e+00> : vector<8x512xf32>
    %371 = tpu.matmul %370, %8, %cst_73 {dimension_numbers = #tpu.dot_dimension_numbers<[1], [0], [0], [1], [0, 0, 1, 1], [], []>} : vector<8x128xbf16>, vector<128x512xbf16>, vector<8x512xf32> -> vector<8x512xf32>
    %372 = arith.addf %369, %371 : vector<8x512xf32>
    %373 = vector.extract_strided_slice %372 {offsets = [0, 0], sizes = [8, 128], strides = [1, 1]} : vector<8x512xf32> to vector<8x128xf32>
    %374 = arith.negf %373 : vector<8x128xf32>
    %375 = math.exp %374 : vector<8x128xf32>
    %cst_74 = arith.constant 1.000000e+00 : f32
    %376 = vector.broadcast %cst_74 : f32 to vector<8x128xf32>
    %377 = arith.addf %376, %375 : vector<8x128xf32>
    %378 = arith.divf %376, %377 : vector<8x128xf32>
    %379 = vector.extract_strided_slice %372 {offsets = [0, 128], sizes = [8, 128], strides = [1, 1]} : vector<8x512xf32> to vector<8x128xf32>
    %380 = arith.negf %379 : vector<8x128xf32>
    %381 = math.exp %380 : vector<8x128xf32>
    %cst_75 = arith.constant 1.000000e+00 : f32
    %382 = vector.broadcast %cst_75 : f32 to vector<8x128xf32>
    %383 = arith.addf %382, %381 : vector<8x128xf32>
    %384 = arith.divf %382, %383 : vector<8x128xf32>
    %385 = vector.extract_strided_slice %372 {offsets = [0, 256], sizes = [8, 128], strides = [1, 1]} : vector<8x512xf32> to vector<8x128xf32>
    %386 = math.tanh %385 : vector<8x128xf32>
    %387 = vector.extract_strided_slice %372 {offsets = [0, 384], sizes = [8, 128], strides = [1, 1]} : vector<8x512xf32> to vector<8x128xf32>
    %388 = arith.negf %387 : vector<8x128xf32>
    %389 = math.exp %388 : vector<8x128xf32>
    %cst_76 = arith.constant 1.000000e+00 : f32
    %390 = vector.broadcast %cst_76 : f32 to vector<8x128xf32>
    %391 = arith.addf %390, %389 : vector<8x128xf32>
    %392 = arith.divf %390, %391 : vector<8x128xf32>
    %393 = arith.mulf %384, %336 : vector<8x128xf32>
    %394 = arith.mulf %378, %386 : vector<8x128xf32>
    %395 = arith.addf %393, %394 : vector<8x128xf32>
    %396 = math.tanh %395 : vector<8x128xf32>
    %397 = arith.mulf %392, %396 : vector<8x128xf32>
    %398 = tpu.concatenate %397, %368 in 1 : vector<8x128xf32>, vector<8x128xf32> -> vector<8x256xf32>
    %399 = arith.truncf %398 : vector<8x256xf32> to vector<8x256xbf16>
    %cst_77 = arith.constant dense<0.000000e+00> : vector<8x512xf32>
    %400 = tpu.matmul %399, %9, %cst_77 {dimension_numbers = #tpu.dot_dimension_numbers<[1], [0], [0], [1], [0, 0, 1, 1], [], []>} : vector<8x256xbf16>, vector<256x512xbf16>, vector<8x512xf32> -> vector<8x512xf32>
    %401 = vector.broadcast %10 : vector<1x512xf32> to vector<8x512xf32>
    %402 = arith.addf %400, %401 : vector<8x512xf32>
    %403 = vector.extract_strided_slice %402 {offsets = [0, 0], sizes = [8, 128], strides = [1, 1]} : vector<8x512xf32> to vector<8x128xf32>
    %404 = arith.negf %403 : vector<8x128xf32>
    %405 = math.exp %404 : vector<8x128xf32>
    %cst_78 = arith.constant 1.000000e+00 : f32
    %406 = vector.broadcast %cst_78 : f32 to vector<8x128xf32>
    %407 = arith.addf %406, %405 : vector<8x128xf32>
    %408 = arith.divf %406, %407 : vector<8x128xf32>
    %409 = vector.extract_strided_slice %402 {offsets = [0, 128], sizes = [8, 128], strides = [1, 1]} : vector<8x512xf32> to vector<8x128xf32>
    %410 = arith.negf %409 : vector<8x128xf32>
    %411 = math.exp %410 : vector<8x128xf32>
    %cst_79 = arith.constant 1.000000e+00 : f32
    %412 = vector.broadcast %cst_79 : f32 to vector<8x128xf32>
    %413 = arith.addf %412, %411 : vector<8x128xf32>
    %414 = arith.divf %412, %413 : vector<8x128xf32>
    %415 = vector.extract_strided_slice %402 {offsets = [0, 256], sizes = [8, 128], strides = [1, 1]} : vector<8x512xf32> to vector<8x128xf32>
    %416 = math.tanh %415 : vector<8x128xf32>
    %417 = vector.extract_strided_slice %402 {offsets = [0, 384], sizes = [8, 128], strides = [1, 1]} : vector<8x512xf32> to vector<8x128xf32>
    %418 = arith.negf %417 : vector<8x128xf32>
    %419 = math.exp %418 : vector<8x128xf32>
    %cst_80 = arith.constant 1.000000e+00 : f32
    %420 = vector.broadcast %cst_80 : f32 to vector<8x128xf32>
    %421 = arith.addf %420, %419 : vector<8x128xf32>
    %422 = arith.divf %420, %421 : vector<8x128xf32>
    %423 = arith.mulf %414, %366 : vector<8x128xf32>
    %424 = arith.mulf %408, %416 : vector<8x128xf32>
    %425 = arith.addf %423, %424 : vector<8x128xf32>
    %426 = math.tanh %425 : vector<8x128xf32>
    %427 = arith.mulf %422, %426 : vector<8x128xf32>
    %c56 = arith.constant 56 : index
    %c0_81 = arith.constant 0 : index
    %428 = vector.load %arg11[%c56, %c0_81] : memref<64x512xf32, #tpu.memory_space<vmem>>, vector<8x512xf32>
    %429 = arith.truncf %397 : vector<8x128xf32> to vector<8x128xbf16>
    %cst_82 = arith.constant dense<0.000000e+00> : vector<8x512xf32>
    %430 = tpu.matmul %429, %8, %cst_82 {dimension_numbers = #tpu.dot_dimension_numbers<[1], [0], [0], [1], [0, 0, 1, 1], [], []>} : vector<8x128xbf16>, vector<128x512xbf16>, vector<8x512xf32> -> vector<8x512xf32>
    %431 = arith.addf %428, %430 : vector<8x512xf32>
    %432 = vector.extract_strided_slice %431 {offsets = [0, 0], sizes = [8, 128], strides = [1, 1]} : vector<8x512xf32> to vector<8x128xf32>
    %433 = arith.negf %432 : vector<8x128xf32>
    %434 = math.exp %433 : vector<8x128xf32>
    %cst_83 = arith.constant 1.000000e+00 : f32
    %435 = vector.broadcast %cst_83 : f32 to vector<8x128xf32>
    %436 = arith.addf %435, %434 : vector<8x128xf32>
    %437 = arith.divf %435, %436 : vector<8x128xf32>
    %438 = vector.extract_strided_slice %431 {offsets = [0, 128], sizes = [8, 128], strides = [1, 1]} : vector<8x512xf32> to vector<8x128xf32>
    %439 = arith.negf %438 : vector<8x128xf32>
    %440 = math.exp %439 : vector<8x128xf32>
    %cst_84 = arith.constant 1.000000e+00 : f32
    %441 = vector.broadcast %cst_84 : f32 to vector<8x128xf32>
    %442 = arith.addf %441, %440 : vector<8x128xf32>
    %443 = arith.divf %441, %442 : vector<8x128xf32>
    %444 = vector.extract_strided_slice %431 {offsets = [0, 256], sizes = [8, 128], strides = [1, 1]} : vector<8x512xf32> to vector<8x128xf32>
    %445 = math.tanh %444 : vector<8x128xf32>
    %446 = vector.extract_strided_slice %431 {offsets = [0, 384], sizes = [8, 128], strides = [1, 1]} : vector<8x512xf32> to vector<8x128xf32>
    %447 = arith.negf %446 : vector<8x128xf32>
    %448 = math.exp %447 : vector<8x128xf32>
    %cst_85 = arith.constant 1.000000e+00 : f32
    %449 = vector.broadcast %cst_85 : f32 to vector<8x128xf32>
    %450 = arith.addf %449, %448 : vector<8x128xf32>
    %451 = arith.divf %449, %450 : vector<8x128xf32>
    %452 = arith.mulf %443, %395 : vector<8x128xf32>
    %453 = arith.mulf %437, %445 : vector<8x128xf32>
    %454 = arith.addf %452, %453 : vector<8x128xf32>
    %455 = math.tanh %454 : vector<8x128xf32>
    %456 = arith.mulf %451, %455 : vector<8x128xf32>
    %457 = tpu.concatenate %456, %427 in 1 : vector<8x128xf32>, vector<8x128xf32> -> vector<8x256xf32>
    %458 = arith.truncf %457 : vector<8x256xf32> to vector<8x256xbf16>
    %cst_86 = arith.constant dense<0.000000e+00> : vector<8x512xf32>
    %459 = tpu.matmul %458, %9, %cst_86 {dimension_numbers = #tpu.dot_dimension_numbers<[1], [0], [0], [1], [0, 0, 1, 1], [], []>} : vector<8x256xbf16>, vector<256x512xbf16>, vector<8x512xf32> -> vector<8x512xf32>
    %460 = vector.broadcast %10 : vector<1x512xf32> to vector<8x512xf32>
    %461 = arith.addf %459, %460 : vector<8x512xf32>
    %462 = vector.extract_strided_slice %461 {offsets = [0, 0], sizes = [8, 128], strides = [1, 1]} : vector<8x512xf32> to vector<8x128xf32>
    %463 = arith.negf %462 : vector<8x128xf32>
    %464 = math.exp %463 : vector<8x128xf32>
    %cst_87 = arith.constant 1.000000e+00 : f32
    %465 = vector.broadcast %cst_87 : f32 to vector<8x128xf32>
    %466 = arith.addf %465, %464 : vector<8x128xf32>
    %467 = arith.divf %465, %466 : vector<8x128xf32>
    %468 = vector.extract_strided_slice %461 {offsets = [0, 128], sizes = [8, 128], strides = [1, 1]} : vector<8x512xf32> to vector<8x128xf32>
    %469 = arith.negf %468 : vector<8x128xf32>
    %470 = math.exp %469 : vector<8x128xf32>
    %cst_88 = arith.constant 1.000000e+00 : f32
    %471 = vector.broadcast %cst_88 : f32 to vector<8x128xf32>
    %472 = arith.addf %471, %470 : vector<8x128xf32>
    %473 = arith.divf %471, %472 : vector<8x128xf32>
    %474 = vector.extract_strided_slice %461 {offsets = [0, 256], sizes = [8, 128], strides = [1, 1]} : vector<8x512xf32> to vector<8x128xf32>
    %475 = math.tanh %474 : vector<8x128xf32>
    %476 = vector.extract_strided_slice %461 {offsets = [0, 384], sizes = [8, 128], strides = [1, 1]} : vector<8x512xf32> to vector<8x128xf32>
    %477 = arith.negf %476 : vector<8x128xf32>
    %478 = math.exp %477 : vector<8x128xf32>
    %cst_89 = arith.constant 1.000000e+00 : f32
    %479 = vector.broadcast %cst_89 : f32 to vector<8x128xf32>
    %480 = arith.addf %479, %478 : vector<8x128xf32>
    %481 = arith.divf %479, %480 : vector<8x128xf32>
    %482 = arith.mulf %473, %425 : vector<8x128xf32>
    %483 = arith.mulf %467, %475 : vector<8x128xf32>
    %484 = arith.addf %482, %483 : vector<8x128xf32>
    %485 = math.tanh %484 : vector<8x128xf32>
    %486 = arith.mulf %481, %485 : vector<8x128xf32>
    %cst_90 = arith.constant 0.000000e+00 : f32
    %487 = vector.broadcast %cst_90 : f32 to vector<8x128xf32>
    %488 = arith.maximumf %486, %487 : vector<8x128xf32>
    %489 = arith.truncf %488 : vector<8x128xf32> to vector<8x128xbf16>
    %c0_91 = arith.constant 0 : index
    %c0_92 = arith.constant 0 : index
    %490 = vector.load %arg6[%c0_91, %c0_92] : memref<128x256xbf16, #tpu.memory_space<vmem>>, vector<128x256xbf16>
    %cst_93 = arith.constant dense<0.000000e+00> : vector<8x256xf32>
    %491 = tpu.matmul %489, %490, %cst_93 {dimension_numbers = #tpu.dot_dimension_numbers<[1], [0], [0], [1], [0, 0, 1, 1], [], []>} : vector<8x128xbf16>, vector<128x256xbf16>, vector<8x256xf32> -> vector<8x256xf32>
    %c0_94 = arith.constant 0 : index
    %c0_95 = arith.constant 0 : index
    %492 = vector.load %arg7[%c0_94, %c0_95] : memref<1x256xf32, #tpu.memory_space<vmem>>, vector<1x256xf32>
    %493 = vector.broadcast %492 : vector<1x256xf32> to vector<8x256xf32>
    %494 = arith.addf %491, %493 : vector<8x256xf32>
    %495 = arith.negf %494 : vector<8x256xf32>
    %496 = math.exp %495 : vector<8x256xf32>
    %cst_96 = arith.constant 1.000000e+00 : f32
    %497 = vector.broadcast %cst_96 : f32 to vector<8x256xf32>
    %498 = arith.addf %497, %496 : vector<8x256xf32>
    %499 = arith.divf %497, %498 : vector<8x256xf32>
    %500 = arith.truncf %499 : vector<8x256xf32> to vector<8x256xbf16>
    %c0_97 = arith.constant 0 : index
    %c0_98 = arith.constant 0 : index
    %501 = vector.load %arg8[%c0_97, %c0_98] : memref<256x128xbf16, #tpu.memory_space<vmem>>, vector<256x128xbf16>
    %cst_99 = arith.constant dense<0.000000e+00> : vector<8x128xf32>
    %502 = tpu.matmul %500, %501, %cst_99 {dimension_numbers = #tpu.dot_dimension_numbers<[1], [0], [0], [1], [0, 0, 1, 1], [], []>} : vector<8x256xbf16>, vector<256x128xbf16>, vector<8x128xf32> -> vector<8x128xf32>
    %c0_100 = arith.constant 0 : index
    %c0_101 = arith.constant 0 : index
    %503 = vector.load %arg9[%c0_100, %c0_101] : memref<1x128xf32, #tpu.memory_space<vmem>>, vector<1x128xf32>
    %504 = vector.broadcast %503 : vector<1x128xf32> to vector<8x128xf32>
    %505 = arith.addf %502, %504 : vector<8x128xf32>
    %506 = arith.negf %505 : vector<8x128xf32>
    %507 = math.exp %506 : vector<8x128xf32>
    %cst_102 = arith.constant 1.000000e+00 : f32
    %508 = vector.broadcast %cst_102 : f32 to vector<8x128xf32>
    %509 = arith.addf %508, %507 : vector<8x128xf32>
    %510 = arith.divf %508, %509 : vector<8x128xf32>
    %c0_103 = arith.constant 0 : index
    %c0_104 = arith.constant 0 : index
    %511 = vector.load %arg10[%c0_103, %c0_104] : memref<8x128xf32, #tpu.memory_space<vmem>>, vector<8x128xf32>
    tpu.vector_store %arg10[%c0_103, %c0_104], %510 {strides = array<i32>} : memref<8x128xf32, #tpu.memory_space<vmem>>, vector<8x128xf32>,
    return
  }
}

</mosaic_0001>

<bundles_post_ra>
// kernel: melody_lstm_emb_forward.1
= control target key start
LH: loop header
LB: loop body
LE: loop exit
PB: predicated region body
PF: predicated region fallthrough
CT: control target
= control target key end

     0   :  { %15 = vsyncpa [#allocation4], 0  ;;  %s6345_s0 = inlined_call_operand.hbm [shape: f32[64,128], index: 0, kind: input, shape index: {}]   ;;  %s6346_s1 = inlined_call_operand.hbm [shape: bf16[128,512], index: 1, kind: input, shape index: {}]   ;;  %s6347_s2 = inlined_call_operand.hbm [shape: bf16[128,512], index: 2, kind: input, shape index: {}]   ;;  %s6348_s3 = inlined_call_operand.hbm [shape: f32[1,512], index: 3, kind: input, shape index: {}]   ;;  %s6349_s4 = inlined_call_operand.hbm [shape: bf16[256,512], index: 4, kind: input, shape index: {}]   ;;  %s6350_s5 = inlined_call_operand.hbm [shape: f32[1,512], index: 5, kind: input, shape index: {}]   ;;  %s6351_s6 = inlined_call_operand.hbm [shape: bf16[128,256], index: 6, kind: input, shape index: {}]   ;;  %s6352_s7 = inlined_call_operand.hbm [shape: f32[1,256], index: 7, kind: input, shape index: {}]   ;;  %s6353_s8 = inlined_call_operand.hbm [shape: bf16[256,128], index: 8, kind: input, shape index: {}]   ;;  %s6354_s9 = inlined_call_operand.hbm [shape: f32[1,128], index: 9, kind: input, shape index: {}]   ;;  %s6355_s10 = inlined_call_operand.hbm [shape: f32[8,128], index: 10, kind: output, shape index: {}]  }
   0x1   :  { %16 = vsyncpa [#allocation7], 0 }
   0x2   :  { %17 = vsyncpa [#allocation10], 0 }
   0x3   :  { %18 = vsyncpa [#allocation13], 0 }
   0x4   :  { %19 = vsyncpa [#allocation16], 0 }
   0x5   :  { %20 = vsyncpa [#allocation19], 0 }
   0x6   :  { %21 = vsyncpa [#allocation5], 0  ;;  %s4511_s13 = smov [#allocation6]   ;;  %s4255_s17 = scalar_lea.hbm %s6346_s1, 4096 }
   0x7   :  { %s39_s14 = sshll.u32 %s4511_s13, 4  ;;  %p4256_p0 = scmp.ne.s32.totalorder %s6346_s1, %s4255_s17  ;;  %s40_s14 = int_to_ptr.vmem [resolvable:$true] %s39_s14 }
   0x8   :  { %p4259_p1 = scmp.lt.u32.totalorder %s4255_s17, %s6346_s1 }
   0xa   :  { %p4261_p2 = pnand %p4259_p1, %p4256_p0 }
   0xc   :  { %4264 = shalt.err (!%p4261_p2)
}
   0xd   :  { %s4265_s22 = scalar_lea.vmem %s40_s14, 4096  ;;  %p4270_p4 = scmp.lt.s32.totalorder %s40_s14, %s40_s14 }
   0xe   :  { %p4266_p3 = scmp.ne.s32.totalorder %s40_s14, %s4265_s22  ;;  %p4271_p5 = scmp.lt.s32.totalorder %s4265_s22, %s4265_s22 }
  0x10   :  { %p4272_p6 = por %p4271_p5, %p4270_p4 }
  0x12   :  { %p4273_p7 = pnand %p4272_p6, %p4266_p3 }
  0x14   :  { %4276 = shalt.err (!%p4273_p7)
}
  0x15   :  { %s4512_s23 = smov 256   ;;  %s4513_s24 = smov 16  }
  0x16   :  { %45 = dma.hbm_to_vmem [thread:$0]  %s6346_s1, 4096, %s40_s14, [#allocation7], %s4512_s23, %s4512_s23, %s4513_s24  }
  0x17   :  { %s4514_s27 = smov [#allocation9]   ;;  %s4515_s29 = smov [#allocation12]  }
  0x18   :  { %s64_s28 = sshll.u32 %s4514_s27, 4  ;;  %s86_s30 = sshll.u32 %s4515_s29, 4  ;;  %s65_s28 = int_to_ptr.vmem [resolvable:$true] %s64_s28  ;;  %s87_s30 = int_to_ptr.vmem [resolvable:$true] %s86_s30 }
  0x19   :  { %s4277_s13 = scalar_lea.hbm %s6348_s3, 64 }
  0x1a   :  { %p4278_p8 = scmp.ne.s32.totalorder %s6348_s3, %s4277_s13  ;;  %p4281_p9 = scmp.lt.u32.totalorder %s4277_s13, %s6348_s3 }
  0x1c   :  { %p4283_p10 = pnand %p4281_p9, %p4278_p8 }
  0x1e   :  { %4286 = shalt.err (!%p4283_p10)
}
  0x1f   :  { %s4287_s1 = scalar_lea.vmem %s65_s28, 64  ;;  %p4292_p12 = scmp.lt.s32.totalorder %s65_s28, %s65_s28 }
  0x20   :  { %p4288_p11 = scmp.ne.s32.totalorder %s65_s28, %s4287_s1  ;;  %p4293_p13 = scmp.lt.s32.totalorder %s4287_s1, %s4287_s1 }
  0x22   :  { %p4294_p0 = por %p4293_p13, %p4292_p12 }
  0x24   :  { %p4295_p1 = pnand %p4294_p0, %p4288_p11 }
  0x26   :  { %4298 = shalt.err (!%p4295_p1)
}
  0x27   :  { %67 = dma.hbm_to_vmem [thread:$0]  %s6348_s3, 64, %s65_s28, [#allocation10]  }
  0x28   :  { %s4299_s22 = scalar_lea.hbm %s6350_s5, 64 }
  0x29   :  { %p4300_p2 = scmp.ne.s32.totalorder %s6350_s5, %s4299_s22  ;;  %p4303_p3 = scmp.lt.u32.totalorder %s4299_s22, %s6350_s5 }
  0x2b   :  { %p4305_p4 = pnand %p4303_p3, %p4300_p2 }
  0x2d   :  { %4308 = shalt.err (!%p4305_p4)
}
  0x2e   :  { %s4309_s11 = scalar_lea.vmem %s87_s30, 64  ;;  %p4314_p6 = scmp.lt.s32.totalorder %s87_s30, %s87_s30 }
  0x2f   :  { %p4310_p5 = scmp.ne.s32.totalorder %s87_s30, %s4309_s11  ;;  %p4315_p7 = scmp.lt.s32.totalorder %s4309_s11, %s4309_s11 }
  0x31   :  { %p4316_p8 = por %p4315_p7, %p4314_p6 }
  0x33   :  { %p4317_p9 = pnand %p4316_p8, %p4310_p5 }
  0x35   :  { %4320 = shalt.err (!%p4317_p9)
}
  0x36   :  { %89 = dma.hbm_to_vmem [thread:$0]  %s6350_s5, 64, %s87_s30, [#allocation13]  }
  0x37   :  { %s4516_s12 = smov [#allocation15]   ;;  %s4517_s15 = smov [#allocation3]  }
  0x38   :  { %s108_s13 = sshll.u32 %s4516_s12, 4  ;;  %s27_s16 = sshll.u32 %s4517_s15, 4  ;;  %s109_s13 = int_to_ptr.vmem [resolvable:$true] %s108_s13  ;;  %s28_s16 = int_to_ptr.vmem [resolvable:$true] %s27_s16 }
  0x39   :  { %s4321_s1 = scalar_lea.hbm %s6352_s7, 32 }
  0x3a   :  { %p4322_p10 = scmp.ne.s32.totalorder %s6352_s7, %s4321_s1  ;;  %p4325_p11 = scmp.lt.u32.totalorder %s4321_s1, %s6352_s7 }
  0x3c   :  { %p4327_p12 = pnand %p4325_p11, %p4322_p10 }
  0x3e   :  { %4330 = shalt.err (!%p4327_p12)
}
  0x3f   :  { %s4331_s5 = scalar_lea.vmem %s109_s13, 32  ;;  %p4336_p0 = scmp.lt.s32.totalorder %s109_s13, %s109_s13 }
  0x40   :  { %p4332_p13 = scmp.ne.s32.totalorder %s109_s13, %s4331_s5  ;;  %p4337_p1 = scmp.lt.s32.totalorder %s4331_s5, %s4331_s5 }
  0x42   :  { %p4338_p2 = por %p4337_p1, %p4336_p0 }
  0x44   :  { %p4339_p3 = pnand %p4338_p2, %p4332_p13 }
  0x46   :  { %4342 = shalt.err (!%p4339_p3)
}
  0x47   :  { %111 = dma.hbm_to_vmem [thread:$0]  %s6352_s7, 32, %s109_s13, [#allocation16]  }
  0x48   :  { %s4343_s27 = scalar_lea.hbm %s6345_s0, 1024 }
  0x49   :  { %p4344_p4 = scmp.ne.s32.totalorder %s6345_s0, %s4343_s27  ;;  %p4347_p5 = scmp.lt.u32.totalorder %s4343_s27, %s6345_s0 }
  0x4b   :  { %p4349_p6 = pnand %p4347_p5, %p4344_p4 }
  0x4d   :  { %4352 = shalt.err (!%p4349_p6)
}
  0x4e   :  { %s4353_s12 = scalar_lea.vmem %s28_s16, 1024  ;;  %p4358_p8 = scmp.lt.s32.totalorder %s28_s16, %s28_s16 }
  0x4f   :  { %p4354_p7 = scmp.ne.s32.totalorder %s28_s16, %s4353_s12  ;;  %p4359_p9 = scmp.lt.s32.totalorder %s4353_s12, %s4353_s12 }
  0x51   :  { %p4360_p10 = por %p4359_p9, %p4358_p8 }
  0x53   :  { %p4361_p11 = pnand %p4360_p10, %p4354_p7 }
  0x55   :  { %4364 = shalt.err (!%p4361_p11)
}
  0x56   :  { %s4518_s7 = smov 128   ;;  %s4519_s13 = smov 8  }
  0x57   :  { %33 = dma.hbm_to_vmem [thread:$0]  %s6345_s0, 1024, %s28_s16, [#allocation4], %s4518_s7, %s4518_s7, %s4519_s13  }
  0x58   :  { %s4520_s18 = smov [#allocation8]   ;;  %s4521_s14 = smov [#allocation11]  }
  0x59   :  { %s51_s1 = sshll.u32 %s4520_s18, 4  ;;  %s73_s19 = sshll.u32 %s4521_s14, 4  ;;  %s52_s1 = int_to_ptr.vmem [resolvable:$true] %s51_s1  ;;  %s74_s19 = int_to_ptr.vmem [resolvable:$true] %s73_s19 }
  0x5a   :  { %s4365_s5 = scalar_lea.hbm %s6347_s2, 4096 }
  0x5b   :  { %p4366_p12 = scmp.ne.s32.totalorder %s6347_s2, %s4365_s5  ;;  %p4369_p13 = scmp.lt.u32.totalorder %s4365_s5, %s6347_s2 }
  0x5d   :  { %p4371_p0 = pnand %p4369_p13, %p4366_p12 }
  0x5f   :  { %4374 = shalt.err (!%p4371_p0)
}
  0x60   :  { %s4375_s0 = scalar_lea.vmem %s52_s1, 4096  ;;  %p4380_p2 = scmp.lt.s32.totalorder %s52_s1, %s52_s1 }
  0x61   :  { %p4376_p1 = scmp.ne.s32.totalorder %s52_s1, %s4375_s0  ;;  %p4381_p3 = scmp.lt.s32.totalorder %s4375_s0, %s4375_s0 }
  0x63   :  { %p4382_p4 = por %p4381_p3, %p4380_p2 }
  0x65   :  { %p4383_p5 = pnand %p4382_p4, %p4376_p1 }
  0x67   :  { %4386 = shalt.err (!%p4383_p5)
}
  0x68   :  { %57 = dma.hbm_to_vmem [thread:$0]  %s6347_s2, 4096, %s52_s1, [#allocation7], %s4512_s23, %s4512_s23, %s4513_s24  }
  0x69   :  { %s4387_s3 = scalar_lea.hbm %s6349_s4, 8192 }
  0x6a   :  { %p4388_p6 = scmp.ne.s32.totalorder %s6349_s4, %s4387_s3  ;;  %p4391_p7 = scmp.lt.u32.totalorder %s4387_s3, %s6349_s4 }
  0x6c   :  { %p4393_p8 = pnand %p4391_p7, %p4388_p6 }
  0x6e   :  { %4396 = shalt.err (!%p4393_p8)
}
  0x6f   :  { %s4397_s18 = scalar_lea.vmem %s74_s19, 8192  ;;  %p4402_p10 = scmp.lt.s32.totalorder %s74_s19, %s74_s19 }
  0x70   :  { %p4398_p9 = scmp.ne.s32.totalorder %s74_s19, %s4397_s18  ;;  %p4403_p11 = scmp.lt.s32.totalorder %s4397_s18, %s4397_s18 }
  0x72   :  { %p4404_p12 = por %p4403_p11, %p4402_p10 }
  0x74   :  { %p4405_p13 = pnand %p4404_p12, %p4398_p9 }
  0x76   :  { %4408 = shalt.err (!%p4405_p13)
}
  0x77   :  { %79 = dma.hbm_to_vmem [thread:$0]  %s6349_s4, 8192, %s74_s19, [#allocation10], %s4512_s23, %s4512_s23, %s4513_s24  }
  0x78   :  { %s4522_s14 = smov [#allocation14]   ;;  %s4523_s21 = smov [#allocation17]  }
  0x79   :  { %s95_s20 = sshll.u32 %s4522_s14, 4  ;;  %s117_s5 = sshll.u32 %s4523_s21, 4  ;;  %s96_s20 = int_to_ptr.vmem [resolvable:$true] %s95_s20  ;;  %s118_s5 = int_to_ptr.vmem [resolvable:$true] %s117_s5 }
  0x7a   :  { %s4409_s25 = scalar_lea.hbm %s6351_s6, 2048 }
  0x7b   :  { %p4410_p0 = scmp.ne.s32.totalorder %s6351_s6, %s4409_s25  ;;  %p4413_p1 = scmp.lt.u32.totalorder %s4409_s25, %s6351_s6 }
  0x7d   :  { %p4415_p2 = pnand %p4413_p1, %p4410_p0 }
  0x7f   :  { %4418 = shalt.err (!%p4415_p2)
}
  0x80   :  { %s4419_s4 = scalar_lea.vmem %s96_s20, 2048  ;;  %p4424_p4 = scmp.lt.s32.totalorder %s96_s20, %s96_s20 }
  0x81   :  { %p4420_p3 = scmp.ne.s32.totalorder %s96_s20, %s4419_s4  ;;  %p4425_p5 = scmp.lt.s32.totalorder %s4419_s4, %s4419_s4 }
  0x83   :  { %p4426_p6 = por %p4425_p5, %p4424_p4 }
  0x85   :  { %p4427_p7 = pnand %p4426_p6, %p4420_p3 }
  0x87   :  { %4430 = shalt.err (!%p4427_p7)
}
  0x88   :  { %101 = dma.hbm_to_vmem [thread:$0]  %s6351_s6, 2048, %s96_s20, [#allocation13], %s4518_s7, %s4518_s7, %s4519_s13  }
  0x89   :  { %s4431_s11 = scalar_lea.hbm %s6353_s8, 2048 }
  0x8a   :  { %p4432_p8 = scmp.ne.s32.totalorder %s6353_s8, %s4431_s11  ;;  %p4435_p9 = scmp.lt.u32.totalorder %s4431_s11, %s6353_s8 }
  0x8c   :  { %p4437_p10 = pnand %p4435_p9, %p4432_p8 }
  0x8e   :  { %4440 = shalt.err (!%p4437_p10)
}
  0x8f   :  { %s4441_s17 = scalar_lea.vmem %s118_s5, 2048  ;;  %p4446_p12 = scmp.lt.s32.totalorder %s118_s5, %s118_s5 }
  0x90   :  { %p4442_p11 = scmp.ne.s32.totalorder %s118_s5, %s4441_s17  ;;  %p4447_p13 = scmp.lt.s32.totalorder %s4441_s17, %s4441_s17 }
  0x92   :  { %p4448_p0 = por %p4447_p13, %p4446_p12 }
  0x94   :  { %p4449_p1 = pnand %p4448_p0, %p4442_p11 }
  0x96   :  { %4452 = shalt.err (!%p4449_p1)
}
  0x97   :  { %s4524_s6 = smov 64   ;;  %s4525_s7 = smov 4  }
  0x98   :  { %123 = dma.hbm_to_vmem [thread:$0]  %s6353_s8, 2048, %s118_s5, [#allocation16], %s4524_s6, %s4524_s6, %s4525_s7  }
  0x99   :  { %s4526_s2 = smov [#allocation18]   ;;  %s4453_s21 = scalar_lea.hbm %s6354_s9, 16 }
  0x9a   :  { %s130_s1 = sshll.u32 %s4526_s2, 4  ;;  %p4454_p2 = scmp.ne.s32.totalorder %s6354_s9, %s4453_s21  ;;  %s131_s1 = int_to_ptr.vmem [resolvable:$true] %s130_s1 }
  0x9b   :  { %p4457_p3 = scmp.lt.u32.totalorder %s4453_s21, %s6354_s9 }
  0x9d   :  { %p4459_p4 = pnand %p4457_p3, %p4454_p2 }
  0x9f   :  { %4462 = shalt.err (!%p4459_p4)
}
  0xa0   :  { %s4463_s0 = scalar_lea.vmem %s131_s1, 16  ;;  %s4467_s8 = scalar_lea.vmem %s131_s1, 32 }
  0xa1   :  { %p4464_p5 = scmp.ne.s32.totalorder %s131_s1, %s4463_s0  ;;  %p4468_p6 = scmp.lt.s32.totalorder %s131_s1, %s131_s1 }
  0xa2   :  { %p4469_p7 = scmp.lt.s32.totalorder %s4467_s8, %s4463_s0 }
  0xa4   :  { %p4470_p8 = por %p4469_p7, %p4468_p6 }
  0xa6   :  { %p4471_p9 = pnand %p4470_p8, %p4464_p5 }
  0xa8   :  { %4474 = shalt.err (!%p4471_p9)
}
  0xa9   :  { %133 = dma.hbm_to_vmem [thread:$0]  %s6354_s9, 16, %s131_s1, [#allocation19]  }
  0xaa   :  { %4497 = dma.done.wait [#allocation4], 1024  }
  0xab   :  { %4498 = vsyncadd [#allocation4], 4294966272 }
  0xac   :  { %4499 = dma.done.wait [#allocation7], 8192  }
  0xad   :  { %4500 = vsyncadd [#allocation7], 4294959104 }
  0xae   :  { %4501 = dma.done.wait [#allocation10], 8256  }
  0xaf   :  { %4502 = vsyncadd [#allocation10], 4294959040 }
  0xb0   :  { %4503 = dma.done.wait [#allocation13], 2112  }
  0xb1   :  { %4504 = vsyncadd [#allocation13], 4294965184 }
  0xb2   :  { %4505 = dma.done.wait [#allocation16], 2080  }
  0xb3   :  { %4506 = vsyncadd [#allocation16], 4294965216 }
  0xb4   :  { %4507 = dma.done.wait [#allocation19], 16  }
  0xb5   :  { %4508 = vsyncadd [#allocation19], 4294967280  ;;  %v6356_v0 = vmov 0   ;;  %v3563_v1 = vld [vmem:[#allocation6 + $0x4] ss:$16 sps:$4 sm:$0xff]   ;;  %v166_v34 = vld [vmem:[#allocation3 + $0x8] sm:$0xff] }
  0xb6   :  { %423 = vmatprep.mubr.bf16.mxu0 %v6356_v0  ;;  %496 = vmatprep.mubr.bf16.mxu1 %v6356_v0  ;;  %v3565_v2 = vld [vmem:[#allocation6 + $0xc] ss:$16 sps:$4 sm:$0xff]   ;;  %v3567_v3 = vld [vmem:[#allocation6] ss:$16 sps:$4 sm:$0xff]   ;;  %v3568_v4 = vld [vmem:[#allocation6 + $0x8] ss:$16 sps:$4 sm:$0xff]  }
  0xb7   :  { %391 = vmatprep.subr.bf16.mxu0 %v3563_v1  ;;  %464 = vmatprep.subr.bf16.mxu1 %v3565_v2  ;;  %v3569_v5 = vld [vmem:[#allocation6 + $0x24] ss:$16 sps:$4 sm:$0xff]   ;;  %v3571_v6 = vld [vmem:[#allocation6 + $0x2c] ss:$16 sps:$4 sm:$0xff]   ;;  %v3573_v7 = vld [vmem:[#allocation6 + $0x20] ss:$16 sps:$4 sm:$0xff]  }
  0xb8   :  { %392 = vmatpush1.bf16.msra.mxu0 %v3567_v3  ;;  %465 = vmatpush1.bf16.msra.mxu1 %v3568_v4  ;;  %v3574_v8 = vld [vmem:[#allocation6 + $0x28] ss:$16 sps:$4 sm:$0xff]   ;;  %v3575_v9 = vld [vmem:[#allocation6 + $0x44] ss:$16 sps:$4 sm:$0xff]   ;;  %v3577_v10 = vld [vmem:[#allocation6 + $0x4c] ss:$16 sps:$4 sm:$0xff]  }
  0xb9   :  { %393 = vmatprep.subr.bf16.mxu0 %v3569_v5  ;;  %466 = vmatprep.subr.bf16.mxu1 %v3571_v6  ;;  %v3579_v11 = vld [vmem:[#allocation6 + $0x40] ss:$16 sps:$4 sm:$0xff]   ;;  %v3580_v12 = vld [vmem:[#allocation6 + $0x48] ss:$16 sps:$4 sm:$0xff]   ;;  %v3581_v13 = vld [vmem:[#allocation6 + $0x64] ss:$16 sps:$4 sm:$0xff]  }
  0xba   :  { %v3583_v14 = vld [vmem:[#allocation6 + $0x6c] ss:$16 sps:$4 sm:$0xff]   ;;  %v3585_v15 = vld [vmem:[#allocation6 + $0x60] ss:$16 sps:$4 sm:$0xff]   ;;  %v3586_v16 = vld [vmem:[#allocation6 + $0x68] ss:$16 sps:$4 sm:$0xff]  }
  0xbb   :  { %v3587_v17 = vld [vmem:[#allocation6 + $0x84] ss:$16 sps:$4 sm:$0xff]   ;;  %v3589_v18 = vld [vmem:[#allocation6 + $0x8c] ss:$16 sps:$4 sm:$0xff]   ;;  %v3591_v19 = vld [vmem:[#allocation6 + $0x80] ss:$16 sps:$4 sm:$0xff]  }
  0xbc   :  { %394 = vmatpush1.bf16.msra.mxu0 %v3573_v7  ;;  %467 = vmatpush1.bf16.msra.mxu1 %v3574_v8  ;;  %v3592_v20 = vld [vmem:[#allocation6 + $0x88] ss:$16 sps:$4 sm:$0xff]   ;;  %v3593_v21 = vld [vmem:[#allocation6 + $0xa4] ss:$16 sps:$4 sm:$0xff]   ;;  %v3595_v22 = vld [vmem:[#allocation6 + $0xac] ss:$16 sps:$4 sm:$0xff]  }
  0xbd   :  { %395 = vmatprep.subr.bf16.mxu0 %v3575_v9  ;;  %468 = vmatprep.subr.bf16.mxu1 %v3577_v10  ;;  %v3597_v23 = vld [vmem:[#allocation6 + $0xa0] ss:$16 sps:$4 sm:$0xff]   ;;  %v3598_v24 = vld [vmem:[#allocation6 + $0xa8] ss:$16 sps:$4 sm:$0xff]   ;;  %v3599_v25 = vld [vmem:[#allocation6 + $0xc4] ss:$16 sps:$4 sm:$0xff]  }
  0xbe   :  { %v3601_v26 = vld [vmem:[#allocation6 + $0xcc] ss:$16 sps:$4 sm:$0xff]   ;;  %v3603_v27 = vld [vmem:[#allocation6 + $0xc0] ss:$16 sps:$4 sm:$0xff]   ;;  %v3604_v28 = vld [vmem:[#allocation6 + $0xc8] ss:$16 sps:$4 sm:$0xff]  }
  0xbf   :  { %v3605_v29 = vld [vmem:[#allocation6 + $0xe4] ss:$16 sps:$4 sm:$0xff]   ;;  %v3607_v30 = vld [vmem:[#allocation6 + $0xec] ss:$16 sps:$4 sm:$0xff]   ;;  %v3609_v31 = vld [vmem:[#allocation6 + $0xe0] ss:$16 sps:$4 sm:$0xff]  }
  0xc0   :  { %396 = vmatpush1.bf16.msra.mxu0 %v3579_v11  ;;  %469 = vmatpush1.bf16.msra.mxu1 %v3580_v12  ;;  %v3610_v32 = vld [vmem:[#allocation6 + $0xe8] ss:$16 sps:$4 sm:$0xff]   ;;  %v165_v33 = vld [vmem:[#allocation3] sm:$0xff]  ;;  %v4724_v36 = vld [vmem:[#allocation8 + $0xc] ss:$16 sps:$4 sm:$0xff]   ;;  %s4529_s9 = smov [#allocation20]  }
  0xc1   :  { %397 = vmatprep.subr.bf16.mxu0 %v3581_v13  ;;  %470 = vmatprep.subr.bf16.mxu1 %v3583_v14  ;;  %v4722_v35 = vld [vmem:[#allocation8 + $0x4] ss:$16 sps:$4 sm:$0xff]   ;;  %v173_v37 = vpack.c.bf16 %v166_v34, %v165_v33  ;;  %v4726_v38 = vld [vmem:[#allocation8] ss:$16 sps:$4 sm:$0xff]   ;;  %v4728_v39 = vld [vmem:[#allocation8 + $0x8] ss:$16 sps:$4 sm:$0xff]  }
  0xc2   :  { %v4732_v40 = vld [vmem:[#allocation8 + $0x24] ss:$16 sps:$4 sm:$0xff]   ;;  %v4734_v41 = vld [vmem:[#allocation8 + $0x2c] ss:$16 sps:$4 sm:$0xff]   ;;  %v4736_v42 = vld [vmem:[#allocation8 + $0x20] ss:$16 sps:$4 sm:$0xff]  }
  0xc3   :  { %v4738_v43 = vld [vmem:[#allocation8 + $0x28] ss:$16 sps:$4 sm:$0xff]   ;;  %v167_v44 = vld [vmem:[#allocation3 + $0x10] sm:$0xff]  ;;  %v4746_v47 = vld [vmem:[#allocation8 + $0x4c] ss:$16 sps:$4 sm:$0xff]   ;;  %s3296_s27 = sshll.u32 %s4529_s9, 4  ;;  %s3297_s27 = int_to_ptr.vmem [resolvable:$true] %s3296_s27 }
  0xc4   :  { %398 = vmatpush1.bf16.msra.mxu0 %v3585_v15  ;;  %471 = vmatpush1.bf16.msra.mxu1 %v3586_v16  ;;  %v168_v45 = vld [vmem:[#allocation3 + $0x18] sm:$0xff]  ;;  %v4742_v46 = vld [vmem:[#allocation8 + $0x44] ss:$16 sps:$4 sm:$0xff]   ;;  %v4750_v49 = vld [vmem:[#allocation8 + $0x40] ss:$16 sps:$4 sm:$0xff]   ;;  %s4475_s4 = scalar_lea.vmem %s3297_s27, 128  ;;  %p4480_p11 = scmp.lt.s32.totalorder %s3297_s27, %s3297_s27 }
  0xc5   :  { %399 = vmatprep.subr.bf16.mxu0 %v3587_v17  ;;  %472 = vmatprep.subr.bf16.mxu1 %v3589_v18  ;;  %v174_v48 = vpack.c.bf16 %v168_v45, %v167_v44  ;;  %v4752_v50 = vld [vmem:[#allocation8 + $0x48] ss:$16 sps:$4 sm:$0xff]   ;;  %v4756_v51 = vld [vmem:[#allocation8 + $0x64] ss:$16 sps:$4 sm:$0xff]   ;;  %v4760_v52 = vld [vmem:[#allocation8 + $0x6c] ss:$16 sps:$4 sm:$0xff]   ;;  %p4476_p10 = scmp.ne.s32.totalorder %s3297_s27, %s4475_s4  ;;  %p4481_p12 = scmp.lt.s32.totalorder %s4475_s4, %s4475_s4 }
  0xc6   :  { %v4762_v53 = vld [vmem:[#allocation8 + $0x60] ss:$16 sps:$4 sm:$0xff]   ;;  %v4764_v54 = vld [vmem:[#allocation8 + $0x68] ss:$16 sps:$4 sm:$0xff]   ;;  %v4770_v57 = vld [vmem:[#allocation8 + $0x84] ss:$16 sps:$4 sm:$0xff]  }
  0xc7   :  { %v169_v55 = vld [vmem:[#allocation3 + $0x20] sm:$0xff]  ;;  %v170_v56 = vld [vmem:[#allocation3 + $0x28] sm:$0xff]  ;;  %v171_v3 = vld [vmem:[#allocation3 + $0x30] sm:$0xff]  ;;  %p4482_p13 = por %p4481_p12, %p4480_p11 }
  0xc8   :  { %400 = vmatpush1.bf16.msra.mxu0 %v3591_v19  ;;  %473 = vmatpush1.bf16.msra.mxu1 %v3592_v20  ;;  %v4772_v58 = vld [vmem:[#allocation8 + $0x8c] ss:$16 sps:$4 sm:$0xff]   ;;  %v4776_v59 = vld [vmem:[#allocation8 + $0x80] ss:$16 sps:$4 sm:$0xff]   ;;  %v4778_v60 = vld [vmem:[#allocation8 + $0x88] ss:$16 sps:$4 sm:$0xff]   ;;  %v175_v61 = vpack.c.bf16 %v170_v56, %v169_v55 }
  0xc9   :  { %401 = vmatprep.subr.bf16.mxu0 %v3593_v21  ;;  %474 = vmatprep.subr.bf16.mxu1 %v3595_v22  ;;  %v4780_v62 = vld [vmem:[#allocation8 + $0xa4] ss:$16 sps:$4 sm:$0xff]   ;;  %v4782_v63 = vld [vmem:[#allocation8 + $0xac] ss:$16 sps:$4 sm:$0xff]   ;;  %v4788_v1 = vld [vmem:[#allocation8 + $0xa0] ss:$16 sps:$4 sm:$0xff]   ;;  %p4483_p0 = pnand %p4482_p13, %p4476_p10 }
  0xca   :  { %v4790_v2 = vld [vmem:[#allocation8 + $0xa8] ss:$16 sps:$4 sm:$0xff]   ;;  %v4792_v5 = vld [vmem:[#allocation8 + $0xc4] ss:$16 sps:$4 sm:$0xff]   ;;  %v4794_v6 = vld [vmem:[#allocation8 + $0xcc] ss:$16 sps:$4 sm:$0xff]  }
  0xcb   :  { %v172_v4 = vld [vmem:[#allocation3 + $0x38] sm:$0xff]  ;;  %v4802_v7 = vld [vmem:[#allocation8 + $0xc0] ss:$16 sps:$4 sm:$0xff]   ;;  %v4806_v10 = vld [vmem:[#allocation8 + $0xe4] ss:$16 sps:$4 sm:$0xff]  }
  0xcc   :  { %402 = vmatpush1.bf16.msra.mxu0 %v3597_v23  ;;  %475 = vmatpush1.bf16.msra.mxu1 %v3598_v24  ;;  %v4804_v8 = vld [vmem:[#allocation8 + $0xc8] ss:$16 sps:$4 sm:$0xff]   ;;  %v176_v9 = vpack.c.bf16 %v172_v4, %v171_v3  ;;  %v4808_v11 = vld [vmem:[#allocation8 + $0xec] ss:$16 sps:$4 sm:$0xff]   ;;  %v4814_v12 = vld [vmem:[#allocation8 + $0xe0] ss:$16 sps:$4 sm:$0xff]  }
  0xcd   :  { %403 = vmatprep.subr.bf16.mxu0 %v3599_v25  ;;  %476 = vmatprep.subr.bf16.mxu1 %v3601_v26  ;;  %v4816_v13 = vld [vmem:[#allocation8 + $0xe8] ss:$16 sps:$4 sm:$0xff]   ;;  %v4830_v15 = vld [vmem:[#allocation11 + $0xc] ss:$16 sps:$4 sm:$0xff]   ;;  %v4832_v16 = vld [vmem:[#allocation11] ss:$16 sps:$4 sm:$0xff]  }
  0xce   :  { %v4828_v14 = vld [vmem:[#allocation11 + $0x4] ss:$16 sps:$4 sm:$0xff]   ;;  %v4834_v17 = vld [vmem:[#allocation11 + $0x8] ss:$16 sps:$4 sm:$0xff]   ;;  %v4842_v19 = vld [vmem:[#allocation11 + $0x2c] ss:$16 sps:$4 sm:$0xff]  }
  0xcf   :  { %v4840_v18 = vld [vmem:[#allocation11 + $0x24] ss:$16 sps:$4 sm:$0xff]   ;;  %v4844_v20 = vld [vmem:[#allocation11 + $0x20] ss:$16 sps:$4 sm:$0xff]   ;;  %v4846_v21 = vld [vmem:[#allocation11 + $0x28] ss:$16 sps:$4 sm:$0xff]  }
  0xd0   :  { %404 = vmatpush1.bf16.msra.mxu0 %v3603_v27  ;;  %477 = vmatpush1.bf16.msra.mxu1 %v3604_v28  ;;  %v4852_v22 = vld [vmem:[#allocation11 + $0x44] ss:$16 sps:$4 sm:$0xff]   ;;  %v4854_v23 = vld [vmem:[#allocation11 + $0x4c] ss:$16 sps:$4 sm:$0xff]   ;;  %v4856_v24 = vld [vmem:[#allocation11 + $0x40] ss:$16 sps:$4 sm:$0xff]  }
  0xd1   :  { %405 = vmatprep.subr.bf16.mxu0 %v3605_v29  ;;  %478 = vmatprep.subr.bf16.mxu1 %v3607_v30  ;;  %6701 = vst [vmem:[#allocation28_spill] sm:$0xff] %v4854_v23  ;;  %6702 = vst [vmem:[#allocation29_spill] sm:$0xff] %v4856_v24  ;;  %v4858_v25 = vld [vmem:[#allocation11 + $0x48] ss:$16 sps:$4 sm:$0xff]   ;;  %v4864_v26 = vld [vmem:[#allocation11 + $0x64] ss:$16 sps:$4 sm:$0xff]  }
  0xd2   :  { %6703 = vst [vmem:[#allocation30_spill] sm:$0xff] %v4858_v25  ;;  %6704 = vst [vmem:[#allocation31_spill] sm:$0xff] %v4864_v26  ;;  %v4866_v27 = vld [vmem:[#allocation11 + $0x6c] ss:$16 sps:$4 sm:$0xff]   ;;  %v4868_v28 = vld [vmem:[#allocation11 + $0x60] ss:$16 sps:$4 sm:$0xff]  }
  0xd3   :  { %6705 = vst [vmem:[#allocation32_spill] sm:$0xff] %v4866_v27  ;;  %6706 = vst [vmem:[#allocation33_spill] sm:$0xff] %v4868_v28  ;;  %v4870_v29 = vld [vmem:[#allocation11 + $0x68] ss:$16 sps:$4 sm:$0xff]   ;;  %v4876_v30 = vld [vmem:[#allocation11 + $0x84] ss:$16 sps:$4 sm:$0xff]  }
  0xd4   :  { %406 = vmatpush1.bf16.msra.mxu0 %v3609_v31  ;;  %479 = vmatpush1.bf16.msra.mxu1 %v3610_v32  ;;  %6707 = vst [vmem:[#allocation34_spill] sm:$0xff] %v4870_v29  ;;  %6708 = vst [vmem:[#allocation35_spill] sm:$0xff] %v4876_v30  ;;  %v4878_v31 = vld [vmem:[#allocation11 + $0x8c] ss:$16 sps:$4 sm:$0xff]   ;;  %v4882_v32 = vld [vmem:[#allocation11 + $0x80] ss:$16 sps:$4 sm:$0xff]  }
  0xd5   :  { %830 = vmatprep.subr.bf16.mxu0 %v4722_v35  ;;  %871 = vmatprep.subr.bf16.mxu1 %v4724_v36  ;;  %6709 = vst [vmem:[#allocation36_spill] sm:$0xff] %v4878_v31  ;;  %6710 = vst [vmem:[#allocation37_spill] sm:$0xff] %v4882_v32  ;;  %v4884_v33 = vld [vmem:[#allocation11 + $0x88] ss:$16 sps:$4 sm:$0xff]   ;;  %v4888_v34 = vld [vmem:[#allocation11 + $0xa4] ss:$16 sps:$4 sm:$0xff]  }
  0xd6   :  { %6711 = vst [vmem:[#allocation38_spill] sm:$0xff] %v4884_v33  ;;  %6712 = vst [vmem:[#allocation39_spill] sm:$0xff] %v4888_v34  ;;  %v4892_v44 = vld [vmem:[#allocation11 + $0xa0] ss:$16 sps:$4 sm:$0xff]   ;;  %v4894_v45 = vld [vmem:[#allocation11 + $0xa8] ss:$16 sps:$4 sm:$0xff]  }
  0xd7   :  { %424 = vmatmul.mubr.bf16.vlgmr.msra.gmra.mrb[0].mxu0 %v173_v37  ;;  %497 = vmatmul.mubr.bf16.vlgmr.msra.gmra.mrb[0].mxu1 %v173_v37  ;;  %v4890_v37 = vld [vmem:[#allocation11 + $0xac] ss:$16 sps:$4 sm:$0xff]   ;;  %6714 = vst [vmem:[#allocation41_spill] sm:$0xff] %v4892_v44  ;;  %6715 = vst [vmem:[#allocation42_spill] sm:$0xff] %v4894_v45  ;;  %v4904_v56 = vld [vmem:[#allocation11 + $0xc0] ss:$16 sps:$4 sm:$0xff]  }
  0xd8   :  { %831 = vmatpush1.bf16.msra.mxu0 %v4726_v38  ;;  %872 = vmatpush1.bf16.msra.mxu1 %v4728_v39  ;;  %6713 = vst [vmem:[#allocation40_spill] sm:$0xff] %v4890_v37  ;;  %v4902_v55 = vld [vmem:[#allocation11 + $0xcc] ss:$16 sps:$4 sm:$0xff]   ;;  %6718 = vst [vmem:[#allocation45_spill] sm:$0xff] %v4904_v56  ;;  %v4912_v3 = vld [vmem:[#allocation11 + $0xe4] ss:$16 sps:$4 sm:$0xff]  }
  0xd9   :  { %832 = vmatprep.subr.bf16.mxu0 %v4732_v40  ;;  %873 = vmatprep.subr.bf16.mxu1 %v4734_v41  ;;  %6717 = vst [vmem:[#allocation44_spill] sm:$0xff] %v4902_v55  ;;  %6720 = vst [vmem:[#allocation47_spill] sm:$0xff] %v4912_v3  ;;  %v4914_v4 = vld [vmem:[#allocation11 + $0xec] ss:$16 sps:$4 sm:$0xff]  }
  0xda   :  { %433 = vmatprep.mubr.bf16.mxu0 %v6356_v0  ;;  %506 = vmatprep.mubr.bf16.mxu1 %v6356_v0  ;;  %6721 = vst [vmem:[#allocation48_spill] sm:$0xff] %v4914_v4 }
  0xdc   :  { %833 = vmatpush1.bf16.msra.mxu0 %v4736_v42  ;;  %874 = vmatpush1.bf16.msra.mxu1 %v4738_v43 }
  0xdd   :  { %834 = vmatprep.subr.bf16.mxu0 %v4742_v46  ;;  %875 = vmatprep.subr.bf16.mxu1 %v4746_v47 }
  0xdf   :  { %434 = vmatmul.mubr.bf16.gmra.mrb[4].mxu0 %v174_v48  ;;  %507 = vmatmul.mubr.bf16.gmra.mrb[4].mxu1 %v174_v48  ;;  %v4900_v48 = vld [vmem:[#allocation11 + $0xc4] ss:$16 sps:$4 sm:$0xff]  }
  0xe0   :  { %835 = vmatpush1.bf16.msra.mxu0 %v4750_v49  ;;  %876 = vmatpush1.bf16.msra.mxu1 %v4752_v50  ;;  %6716 = vst [vmem:[#allocation43_spill] sm:$0xff] %v4900_v48 }
  0xe1   :  { %836 = vmatprep.subr.bf16.mxu0 %v4756_v51  ;;  %877 = vmatprep.subr.bf16.mxu1 %v4760_v52 }
  0xe2   :  { %443 = vmatprep.mubr.bf16.mxu0 %v6356_v0  ;;  %516 = vmatprep.mubr.bf16.mxu1 %v6356_v0 }
  0xe4   :  { %837 = vmatpush1.bf16.msra.mxu0 %v4762_v53  ;;  %878 = vmatpush1.bf16.msra.mxu1 %v4764_v54 }
  0xe5   :  { %838 = vmatprep.subr.bf16.mxu0 %v4770_v57  ;;  %879 = vmatprep.subr.bf16.mxu1 %v4772_v58 }
  0xe7   :  { %444 = vmatmul.mubr.bf16.gmra.mrb[8].mxu0 %v175_v61  ;;  %517 = vmatmul.mubr.bf16.gmra.mrb[8].mxu1 %v175_v61  ;;  %v4906_v61 = vld [vmem:[#allocation11 + $0xc8] ss:$16 sps:$4 sm:$0xff]  }
  0xe8   :  { %839 = vmatpush1.bf16.msra.mxu0 %v4776_v59  ;;  %880 = vmatpush1.bf16.msra.mxu1 %v4778_v60  ;;  %6719 = vst [vmem:[#allocation46_spill] sm:$0xff] %v4906_v61 }
  0xe9   :  { %840 = vmatprep.subr.bf16.mxu0 %v4780_v62  ;;  %881 = vmatprep.subr.bf16.mxu1 %v4782_v63 }
  0xea   :  { %453 = vmatprep.mubr.bf16.mxu0 %v6356_v0  ;;  %526 = vmatprep.mubr.bf16.mxu1 %v6356_v0 }
  0xec   :  { %841 = vmatpush1.bf16.msra.mxu0 %v4788_v1  ;;  %882 = vmatpush1.bf16.msra.mxu1 %v4790_v2 }
  0xed   :  { %842 = vmatprep.subr.bf16.mxu0 %v4792_v5  ;;  %883 = vmatprep.subr.bf16.mxu1 %v4794_v6 }
  0xef   :  { %454 = vmatmul.mubr.bf16.gmra.mrb[12].mxu0 %v176_v9  ;;  %527 = vmatmul.mubr.bf16.gmra.mrb[12].mxu1 %v176_v9  ;;  %v4916_v9 = vld [vmem:[#allocation11 + $0xe0] ss:$16 sps:$4 sm:$0xff]  }
  0xf0   :  { %843 = vmatpush1.bf16.msra.mxu0 %v4802_v7  ;;  %884 = vmatpush1.bf16.msra.mxu1 %v4804_v8  ;;  %6722 = vst [vmem:[#allocation49_spill] sm:$0xff] %v4916_v9 }
  0xf1   :  { %844 = vmatprep.subr.bf16.mxu0 %v4806_v10  ;;  %885 = vmatprep.subr.bf16.mxu1 %v4808_v11 }
  0xf2   :  { %862 = vmatprep.mubr.bf16.mxu0 %v6356_v0  ;;  %903 = vmatprep.mubr.bf16.mxu1 %v6356_v0 }
  0xf4   :  { %845 = vmatpush1.bf16.msra.mxu0 %v4814_v12  ;;  %886 = vmatpush1.bf16.msra.mxu1 %v4816_v13 }
  0xf5   :  { %1283 = vmatprep.subr.bf16.mxu0 %v4828_v14  ;;  %1324 = vmatprep.subr.bf16.mxu1 %v4830_v15 }
  0xf7   :  { %863 = vmatmul.mubr.bf16.vlgmr.msra.gmra.mrb[16].mxu0 %v6356_v0  ;;  %904 = vmatmul.mubr.bf16.vlgmr.msra.gmra.mrb[16].mxu1 %v6356_v0  ;;  %v4918_v0 = vld [vmem:[#allocation11 + $0xe8] ss:$16 sps:$4 sm:$0xff]  }
  0xf8   :  { %1284 = vmatpush1.bf16.msra.mxu0 %v4832_v16  ;;  %1325 = vmatpush1.bf16.msra.mxu1 %v4834_v17  ;;  %6723 = vst [vmem:[#allocation50_spill] sm:$0xff] %v4918_v0 }
  0xf9   :  { %1285 = vmatprep.subr.bf16.mxu0 %v4840_v18  ;;  %1326 = vmatprep.subr.bf16.mxu1 %v4842_v19 }
  0xfc   :  { %1286 = vmatpush1.bf16.msra.mxu0 %v4844_v20  ;;  %1327 = vmatpush1.bf16.msra.mxu1 %v4846_v21 }
  0xfd   :  { %1287 = vmatprep.subr.bf16.mxu0 %v4852_v22  ;;  %1328 = vmatprep.subr.bf16.mxu1 %v4854_v23 }
 0x100   :  { %1288 = vmatpush1.bf16.msra.mxu0 %v4856_v24  ;;  %1329 = vmatpush1.bf16.msra.mxu1 %v4858_v25 }
 0x101   :  { %1289 = vmatprep.subr.bf16.mxu0 %v4864_v26  ;;  %1330 = vmatprep.subr.bf16.mxu1 %v4866_v27 }
 0x104   :  { %1290 = vmatpush1.bf16.msra.mxu0 %v4868_v28  ;;  %1331 = vmatpush1.bf16.msra.mxu1 %v4870_v29 }
 0x105   :  { %1291 = vmatprep.subr.bf16.mxu0 %v4876_v30  ;;  %1332 = vmatprep.subr.bf16.mxu1 %v4878_v31 }
 0x108   :  { %1292 = vmatpush1.bf16.msra.mxu0 %v4882_v32  ;;  %1333 = vmatpush1.bf16.msra.mxu1 %v4884_v33 }
 0x109   :  { %1293 = vmatprep.subr.bf16.mxu0 %v4888_v34  ;;  %1334 = vmatprep.subr.bf16.mxu1 %v4890_v37  ;;  %v4528_v37 = vmov 0.0|0.0  }
 0x10a   :  { %1315 = vmatprep.mubr.bf16.mxu0 %v4528_v37  ;;  %1356 = vmatprep.mubr.bf16.mxu1 %v4528_v37  ;;  %v211_v37 = vlaneseq }
 0x10c   :  { %1294 = vmatpush1.bf16.msra.mxu0 %v4892_v44  ;;  %1335 = vmatpush1.bf16.msra.mxu1 %v4894_v45  ;;  %v4992_v45 = vld [vmem:[#allocation11 + $0x1c4] ss:$16 sps:$4 sm:$0xff]   ;;  %v4994_v44 = vld [vmem:[#allocation11 + $0x1cc] ss:$16 sps:$4 sm:$0xff]  }
 0x10d   :  { %1295 = vmatprep.subr.bf16.mxu0 %v4900_v48  ;;  %1336 = vmatprep.subr.bf16.mxu1 %v4902_v55  ;;  %v4924_v55 = vld [vmem:[#allocation11 + $0x104] ss:$16 sps:$4 sm:$0xff]   ;;  %v4930_v48 = vld [vmem:[#allocation11 + $0x108] ss:$16 sps:$4 sm:$0xff]   ;;  %6748 = vst [vmem:[#allocation75_spill] sm:$0xff] %v4992_v45  ;;  %6749 = vst [vmem:[#allocation76_spill] sm:$0xff] %v4994_v44 }
 0x10e   :  { %6724 = vst [vmem:[#allocation51_spill] sm:$0xff] %v4924_v55  ;;  %6727 = vst [vmem:[#allocation54_spill] sm:$0xff] %v4930_v48 }
 0x110   :  { %1296 = vmatpush1.bf16.msra.mxu0 %v4904_v56  ;;  %1337 = vmatpush1.bf16.msra.mxu1 %v4906_v61  ;;  %v4926_v56 = vld [vmem:[#allocation11 + $0x10c] ss:$16 sps:$4 sm:$0xff]   ;;  %v4928_v61 = vld [vmem:[#allocation11 + $0x100] ss:$16 sps:$4 sm:$0xff]  }
 0x111   :  { %1297 = vmatprep.subr.bf16.mxu0 %v4912_v3  ;;  %1338 = vmatprep.subr.bf16.mxu1 %v4914_v4  ;;  %6725 = vst [vmem:[#allocation52_spill] sm:$0xff] %v4926_v56  ;;  %6726 = vst [vmem:[#allocation53_spill] sm:$0xff] %v4928_v61  ;;  %v4936_v4 = vld [vmem:[#allocation11 + $0x124] ss:$16 sps:$4 sm:$0xff]   ;;  %v4942_v3 = vld [vmem:[#allocation11 + $0x128] ss:$16 sps:$4 sm:$0xff]  }
 0x112   :  { %6728 = vst [vmem:[#allocation55_spill] sm:$0xff] %v4936_v4  ;;  %6731 = vst [vmem:[#allocation58_spill] sm:$0xff] %v4942_v3 }
 0x114   :  { %1298 = vmatpush1.bf16.msra.mxu0 %v4916_v9  ;;  %1339 = vmatpush1.bf16.msra.mxu1 %v4918_v0  ;;  %v4938_v9 = vld [vmem:[#allocation11 + $0x12c] ss:$16 sps:$4 sm:$0xff]   ;;  %v4940_v0 = vld [vmem:[#allocation11 + $0x120] ss:$16 sps:$4 sm:$0xff]  }
 0x115   :  { %1299 = vmatprep.subr.bf16.mxu0 %v4924_v55  ;;  %1340 = vmatprep.subr.bf16.mxu1 %v4926_v56  ;;  %6729 = vst [vmem:[#allocation56_spill] sm:$0xff] %v4938_v9  ;;  %6730 = vst [vmem:[#allocation57_spill] sm:$0xff] %v4940_v0  ;;  %v4948_v56 = vld [vmem:[#allocation11 + $0x144] ss:$16 sps:$4 sm:$0xff]   ;;  %v4954_v55 = vld [vmem:[#allocation11 + $0x148] ss:$16 sps:$4 sm:$0xff]  }
 0x116   :  { %6732 = vst [vmem:[#allocation59_spill] sm:$0xff] %v4948_v56  ;;  %6735 = vst [vmem:[#allocation62_spill] sm:$0xff] %v4954_v55 }
 0x118   :  { %1300 = vmatpush1.bf16.msra.mxu0 %v4928_v61  ;;  %1341 = vmatpush1.bf16.msra.mxu1 %v4930_v48  ;;  %v4950_v61 = vld [vmem:[#allocation11 + $0x14c] ss:$16 sps:$4 sm:$0xff]   ;;  %v4952_v48 = vld [vmem:[#allocation11 + $0x140] ss:$16 sps:$4 sm:$0xff]  }
 0x119   :  { %1301 = vmatprep.subr.bf16.mxu0 %v4936_v4  ;;  %1342 = vmatprep.subr.bf16.mxu1 %v4938_v9  ;;  %6733 = vst [vmem:[#allocation60_spill] sm:$0xff] %v4950_v61  ;;  %6734 = vst [vmem:[#allocation61_spill] sm:$0xff] %v4952_v48  ;;  %v4960_v9 = vld [vmem:[#allocation11 + $0x164] ss:$16 sps:$4 sm:$0xff]   ;;  %v4966_v4 = vld [vmem:[#allocation11 + $0x168] ss:$16 sps:$4 sm:$0xff]  }
 0x11a   :  { %6736 = vst [vmem:[#allocation63_spill] sm:$0xff] %v4960_v9  ;;  %6739 = vst [vmem:[#allocation66_spill] sm:$0xff] %v4966_v4 }
 0x11c   :  { %1302 = vmatpush1.bf16.msra.mxu0 %v4940_v0  ;;  %1343 = vmatpush1.bf16.msra.mxu1 %v4942_v3  ;;  %v4962_v0 = vld [vmem:[#allocation11 + $0x16c] ss:$16 sps:$4 sm:$0xff]   ;;  %v4964_v3 = vld [vmem:[#allocation11 + $0x160] ss:$16 sps:$4 sm:$0xff]  }
 0x11d   :  { %1303 = vmatprep.subr.bf16.mxu0 %v4948_v56  ;;  %1344 = vmatprep.subr.bf16.mxu1 %v4950_v61  ;;  %6737 = vst [vmem:[#allocation64_spill] sm:$0xff] %v4962_v0  ;;  %6738 = vst [vmem:[#allocation65_spill] sm:$0xff] %v4964_v3  ;;  %v4972_v61 = vld [vmem:[#allocation11 + $0x184] ss:$16 sps:$4 sm:$0xff]   ;;  %v4978_v56 = vld [vmem:[#allocation11 + $0x188] ss:$16 sps:$4 sm:$0xff]  }
 0x11e   :  { %6740 = vst [vmem:[#allocation67_spill] sm:$0xff] %v4972_v61  ;;  %6743 = vst [vmem:[#allocation70_spill] sm:$0xff] %v4978_v56 }
 0x120   :  { %1304 = vmatpush1.bf16.msra.mxu0 %v4952_v48  ;;  %1345 = vmatpush1.bf16.msra.mxu1 %v4954_v55  ;;  %v4974_v48 = vld [vmem:[#allocation11 + $0x18c] ss:$16 sps:$4 sm:$0xff]   ;;  %v4976_v55 = vld [vmem:[#allocation11 + $0x180] ss:$16 sps:$4 sm:$0xff]  }
 0x121   :  { %1305 = vmatprep.subr.bf16.mxu0 %v4960_v9  ;;  %1346 = vmatprep.subr.bf16.mxu1 %v4962_v0  ;;  %6741 = vst [vmem:[#allocation68_spill] sm:$0xff] %v4974_v48  ;;  %6742 = vst [vmem:[#allocation69_spill] sm:$0xff] %v4976_v55  ;;  %v4984_v0 = vld [vmem:[#allocation11 + $0x1a4] ss:$16 sps:$4 sm:$0xff]   ;;  %v4990_v9 = vld [vmem:[#allocation11 + $0x1a8] ss:$16 sps:$4 sm:$0xff]  }
 0x122   :  { %6744 = vst [vmem:[#allocation71_spill] sm:$0xff] %v4984_v0  ;;  %6747 = vst [vmem:[#allocation74_spill] sm:$0xff] %v4990_v9 }
 0x124   :  { %1306 = vmatpush1.bf16.msra.mxu0 %v4964_v3  ;;  %1347 = vmatpush1.bf16.msra.mxu1 %v4966_v4  ;;  %v4986_v3 = vld [vmem:[#allocation11 + $0x1ac] ss:$16 sps:$4 sm:$0xff]   ;;  %v4988_v4 = vld [vmem:[#allocation11 + $0x1a0] ss:$16 sps:$4 sm:$0xff]  }
 0x125   :  { %1307 = vmatprep.subr.bf16.mxu0 %v4972_v61  ;;  %1348 = vmatprep.subr.bf16.mxu1 %v4974_v48  ;;  %6745 = vst [vmem:[#allocation72_spill] sm:$0xff] %v4986_v3  ;;  %6746 = vst [vmem:[#allocation73_spill] sm:$0xff] %v4988_v4  ;;  %v5006_v48 = vld [vmem:[#allocation11 + $0x1e4] ss:$16 sps:$4 sm:$0xff]   ;;  %v5008_v61 = vld [vmem:[#allocation11 + $0x1ec] ss:$16 sps:$4 sm:$0xff]  }
 0x126   :  { %6752 = vst [vmem:[#allocation79_spill] sm:$0xff] %v5006_v48  ;;  %6753 = vst [vmem:[#allocation80_spill] sm:$0xff] %v5008_v61 }
 0x128   :  { %1308 = vmatpush1.bf16.msra.mxu0 %v4976_v55  ;;  %1349 = vmatpush1.bf16.msra.mxu1 %v4978_v56  ;;  %v5000_v56 = vld [vmem:[#allocation11 + $0x1c0] ss:$16 sps:$4 sm:$0xff]   ;;  %v5002_v55 = vld [vmem:[#allocation11 + $0x1c8] ss:$16 sps:$4 sm:$0xff]  }
 0x129   :  { %1309 = vmatprep.subr.bf16.mxu0 %v4984_v0  ;;  %1350 = vmatprep.subr.bf16.mxu1 %v4986_v3  ;;  %6750 = vst [vmem:[#allocation77_spill] sm:$0xff] %v5000_v56  ;;  %6751 = vst [vmem:[#allocation78_spill] sm:$0xff] %v5002_v55 }
 0x12c   :  { %1310 = vmatpush1.bf16.msra.mxu0 %v4988_v4  ;;  %1351 = vmatpush1.bf16.msra.mxu1 %v4990_v9  ;;  %v5012_v9 = vld [vmem:[#allocation11 + $0x1e0] ss:$16 sps:$4 sm:$0xff]   ;;  %v5014_v4 = vld [vmem:[#allocation11 + $0x1e8] ss:$16 sps:$4 sm:$0xff]  }
 0x12d   :  { %1311 = vmatprep.subr.bf16.mxu0 %v4992_v45  ;;  %1352 = vmatprep.subr.bf16.mxu1 %v4994_v44  ;;  %6754 = vst [vmem:[#allocation81_spill] sm:$0xff] %v5012_v9  ;;  %6755 = vst [vmem:[#allocation82_spill] sm:$0xff] %v5014_v4 }
 0x130   :  { %1312 = vmatpush1.bf16.msra.mxu0 %v5000_v56  ;;  %1353 = vmatpush1.bf16.msra.mxu1 %v5002_v55  ;;  %v5022_v56 = vshrl.u32 %v211_v37, 7 }
 0x131   :  { %1313 = vmatprep.subr.bf16.mxu0 %v5006_v48  ;;  %1354 = vmatprep.subr.bf16.mxu1 %v5008_v61  ;;  %v209_v48 = vld [vmem:[#allocation9] sm:$0xf] }
 0x132   :  { %6756 = vst [vmem:[#allocation83_spill] sm:$0xff] %v5022_v56  ;;  %v6452_v55 = vsub.s32 2, %v5022_v56  ;;  %v6459_v44 = vsub.s32 3, %v5022_v56  ;;  %v5027_v45 = vsub.s32 0, %v5022_v56  ;;  %v5030_v61 = vsub.s32 1, %v5022_v56 }
 0x134   :  { %1314 = vmatpush1.bf16.msra.mxu0 %v5012_v9  ;;  %1355 = vmatpush1.bf16.msra.mxu1 %v5014_v4  ;;  %6757 = vst [vmem:[#allocation84_spill] sm:$0xff] %v5027_v45  ;;  %6758 = vst [vmem:[#allocation85_spill] sm:$0xff] %v5030_v61  ;;  %v5034_v4 = vrot.slane %v209_v48, %v6452_v55  ;;  %v5042_v37 = vrot.slane %v209_v48, %v6459_v44 }
 0x135   :  { %1393 = vmatprep.subr.bf16.mxu0 %v4722_v35  ;;  %1434 = vmatprep.subr.bf16.mxu1 %v4724_v36  ;;  %v214_v9 = vrot.slane %v209_v48, %v5027_v45  ;;  %v218_v34 = vrot.slane %v209_v48, %v5030_v61 }
 0x1aa   :  { %v5036_v35 = vpop.f32.mrb[0].mxu0  ;;  %v5038_v36 = vpop.f32.mrb[0].mxu1 }
 0x1ab   :  { %v427_v3 = vpop.f32.mrb[1].mxu0  ;;  %v500_v0 = vpop.f32.mrb[1].mxu1 }
 0x1ac   :  { %v429_v33 = vpop.f32.mrb[2].mxu0  ;;  %v502_v32 = vpop.f32.mrb[2].mxu1 }
 0x1ad   :  { %v5046_v31 = vadd.f32 %v429_v33, %v214_v9  ;;  %v431_v55 = vpop.f32.mrb[3].mxu0  ;;  %v5049_v30 = vadd.f32 %v502_v32, %v5034_v4  ;;  %v504_v29 = vpop.f32.mrb[3].mxu1 }
 0x1ae   :  { %v5051_v28 = vadd.f32 %v431_v55, %v218_v34  ;;  %v5054_v44 = vadd.f32 %v504_v29, %v5042_v37 }
 0x1af   :  { %6759 = vst [vmem:[#allocation86_spill] sm:$0xff] %v5046_v31  ;;  %6760 = vst [vmem:[#allocation87_spill] sm:$0xff] %v5049_v30 }
 0x1b0   :  { %6761 = vst [vmem:[#allocation88_spill] sm:$0xff] %v5051_v28  ;;  %6762 = vst [vmem:[#allocation89_spill] sm:$0xff] %v5054_v44 }
 0x1b2   :  { %v435_v56 = vpop.f32.mrb[4].mxu0  ;;  %v508_v45 = vpop.f32.mrb[4].mxu1 }
 0x1b3   :  { %v5056_v27 = vadd.f32 %v435_v56, %v214_v9  ;;  %v437_v26 = vpop.f32.mrb[5].mxu0  ;;  %v5059_v48 = vadd.f32 %v508_v45, %v5034_v4  ;;  %v510_v33 = vpop.f32.mrb[5].mxu1 }
 0x1b4   :  { %v5061_v31 = vadd.f32 %v437_v26, %v218_v34  ;;  %v439_v61 = vpop.f32.mrb[6].mxu0  ;;  %v5064_v32 = vadd.f32 %v510_v33, %v5042_v37  ;;  %v512_v55 = vpop.f32.mrb[6].mxu1 }
 0x1b5   :  { %6763 = vst [vmem:[#allocation90_spill] sm:$0xff] %v5056_v27  ;;  %6764 = vst [vmem:[#allocation91_spill] sm:$0xff] %v5059_v48  ;;  %v5066_v28 = vadd.f32 %v439_v61, %v214_v9  ;;  %v441_v29 = vpop.f32.mrb[7].mxu0  ;;  %v5069_v44 = vadd.f32 %v512_v55, %v5034_v4  ;;  %v514_v56 = vpop.f32.mrb[7].mxu1 }
 0x1b6   :  { %6765 = vst [vmem:[#allocation92_spill] sm:$0xff] %v5061_v31  ;;  %6766 = vst [vmem:[#allocation93_spill] sm:$0xff] %v5064_v32  ;;  %v5071_v27 = vadd.f32 %v441_v29, %v218_v34  ;;  %v5074_v45 = vadd.f32 %v514_v56, %v5042_v37 }
 0x1b7   :  { %6767 = vst [vmem:[#allocation94_spill] sm:$0xff] %v5066_v28  ;;  %6768 = vst [vmem:[#allocation95_spill] sm:$0xff] %v5069_v44 }
 0x1b8   :  { %6769 = vst [vmem:[#allocation96_spill] sm:$0xff] %v5071_v27  ;;  %6770 = vst [vmem:[#allocation97_spill] sm:$0xff] %v5074_v45 }
 0x1ba   :  { %v445_v48 = vpop.f32.mrb[8].mxu0  ;;  %v518_v26 = vpop.f32.mrb[8].mxu1 }
 0x1bb   :  { %v5076_v31 = vadd.f32 %v445_v48, %v214_v9  ;;  %v447_v30 = vpop.f32.mrb[9].mxu0  ;;  %v5079_v33 = vadd.f32 %v518_v26, %v5034_v4  ;;  %v520_v61 = vpop.f32.mrb[9].mxu1 }
 0x1bc   :  { %v5081_v28 = vadd.f32 %v447_v30, %v218_v34  ;;  %v449_v32 = vpop.f32.mrb[10].mxu0  ;;  %v5084_v55 = vadd.f32 %v520_v61, %v5042_v37  ;;  %v522_v29 = vpop.f32.mrb[10].mxu1 }
 0x1bd   :  { %6771 = vst [vmem:[#allocation98_spill] sm:$0xff] %v5076_v31  ;;  %6772 = vst [vmem:[#allocation99_spill] sm:$0xff] %v5079_v33  ;;  %v5086_v27 = vadd.f32 %v449_v32, %v214_v9  ;;  %v451_v56 = vpop.f32.mrb[11].mxu0  ;;  %v5089_v45 = vadd.f32 %v522_v29, %v5034_v4  ;;  %v524_v48 = vpop.f32.mrb[11].mxu1 }
 0x1be   :  { %6773 = vst [vmem:[#allocation100_spill] sm:$0xff] %v5081_v28  ;;  %6774 = vst [vmem:[#allocation101_spill] sm:$0xff] %v5084_v55  ;;  %v5091_v31 = vadd.f32 %v451_v56, %v218_v34  ;;  %v5094_v26 = vadd.f32 %v524_v48, %v5042_v37 }
 0x1bf   :  { %6775 = vst [vmem:[#allocation102_spill] sm:$0xff] %v5086_v27  ;;  %6776 = vst [vmem:[#allocation103_spill] sm:$0xff] %v5089_v45 }
 0x1c0   :  { %6777 = vst [vmem:[#allocation104_spill] sm:$0xff] %v5091_v31  ;;  %6778 = vst [vmem:[#allocation105_spill] sm:$0xff] %v5094_v26 }
 0x1c2   :  { %v455_v33 = vpop.f32.mrb[12].mxu0  ;;  %v528_v30 = vpop.f32.mrb[12].mxu1 }
 0x1c3   :  { %v5096_v28 = vadd.f32 %v455_v33, %v214_v9  ;;  %v457_v44 = vpop.f32.mrb[13].mxu0  ;;  %v5099_v61 = vadd.f32 %v528_v30, %v5034_v4  ;;  %v530_v32 = vpop.f32.mrb[13].mxu1 }
 0x1c4   :  { %v5101_v27 = vadd.f32 %v457_v44, %v218_v34  ;;  %v459_v55 = vpop.f32.mrb[14].mxu0  ;;  %v5104_v29 = vadd.f32 %v530_v32, %v5042_v37  ;;  %v532_v56 = vpop.f32.mrb[14].mxu1  ;;  %v426_v44 = vadd.f32 %v5036_v35, %v214_v9  ;;  %v428_v32 = vadd.f32 %v427_v3, %v218_v34 }
 0x1c5   :  { %6779 = vst [vmem:[#allocation106_spill] sm:$0xff] %v5096_v28  ;;  %6780 = vst [vmem:[#allocation107_spill] sm:$0xff] %v5099_v61  ;;  %v5106_v31 = vadd.f32 %v459_v55, %v214_v9  ;;  %v461_v48 = vpop.f32.mrb[15].mxu0  ;;  %v5109_v26 = vadd.f32 %v532_v56, %v5034_v4  ;;  %v534_v33 = vpop.f32.mrb[15].mxu1 }
 0x1c6   :  { %6781 = vst [vmem:[#allocation108_spill] sm:$0xff] %v5101_v27  ;;  %6782 = vst [vmem:[#allocation109_spill] sm:$0xff] %v5104_v29  ;;  %v5111_v28 = vadd.f32 %v461_v48, %v218_v34  ;;  %v5114_v30 = vadd.f32 %v534_v33, %v5042_v37  ;;  %v499_v27 = vadd.f32 %v5038_v36, %v5034_v4 }
 0x1c7   :  { %6783 = vst [vmem:[#allocation110_spill] sm:$0xff] %v5106_v31  ;;  %6784 = vst [vmem:[#allocation111_spill] sm:$0xff] %v5109_v26  ;;  %v501_v29 = vadd.f32 %v500_v0, %v5042_v37 }
 0x1c8   :  { %6785 = vst [vmem:[#allocation112_spill] sm:$0xff] %v5111_v28  ;;  %6786 = vst [vmem:[#allocation113_spill] sm:$0xff] %v5114_v30 }
 0x1ca   :  { %v864_v55 = vpop.f32.mrb[16].mxu0  ;;  %v905_v31 = vpop.f32.mrb[16].mxu1 }
 0x1cb   :  { %v912_v61 = vadd.f32 %v864_v55, %v426_v44  ;;  %v914_v45 = vadd.f32 %v905_v31, %v499_v27  ;;  %v866_v56 = vpop.f32.mrb[17].mxu0  ;;  %v907_v26 = vpop.f32.mrb[17].mxu1  ;;  %v6818_v44 = vld [vmem:[#allocation58_spill] sm:$0xff]  ;;  %v6820_v55 = vld [vmem:[#allocation60_spill] sm:$0xff] }
 0x1cc   :  { %v913_v25 = vadd.f32 %v866_v56, %v428_v32  ;;  %v915_v48 = vadd.f32 %v907_v26, %v501_v29  ;;  %v868_v28 = vpop.f32.mrb[18].mxu0  ;;  %v909_v24 = vpop.f32.mrb[18].mxu1  ;;  %v6819_v32 = vld [vmem:[#allocation59_spill] sm:$0xff]  ;;  %v6821_v56 = vld [vmem:[#allocation61_spill] sm:$0xff] }
 0x1cd   :  { %v3374_v33 = vmul.f32 -1.442695, %v912_v61  ;;  %v869_v30 = vpop.f32.mrb[19].mxu0  ;;  %v910_v23 = vpop.f32.mrb[19].mxu1 }
 0x1ce   :  { %v3375_v9 = vmul.f32 -1.442695, %v913_v25  ;;  %v3376_v4 = vmul.f32 -1.442695, %v915_v48  ;;  %v6822_v48 = vld [vmem:[#allocation62_spill] sm:$0xff] }
 0x1cf   :  { %3795 = vpow2.f32 %v3374_v33  ;;  %v6823_v33 = vld [vmem:[#allocation63_spill] sm:$0xff] }
 0x1d0   :  { %3797 = vpow2.f32 %v3375_v9  ;;  %v6824_v9 = vld [vmem:[#allocation64_spill] sm:$0xff] }
 0x1d1   :  { %3799 = vpow2.f32 %v3376_v4  ;;  %v6825_v4 = vld [vmem:[#allocation65_spill] sm:$0xff] }
 0x1d2   :  { %3801 = vtanh.f32 %v914_v45  ;;  %v6787_v45 = vmov 0  }
 0x1d9   :  { %v3796_v34 = vpop.eup %3795 }
 0x1da   :  { %v3798_v3 = vpop.eup %3797  ;;  %v919_v0 = vadd.f32 1.0, %v3796_v34  ;;  %v6826_v34 = vld [vmem:[#allocation66_spill] sm:$0xff] }
 0x1db   :  { %v925_v35 = vadd.f32 1.0, %v3798_v3  ;;  %v3800_v27 = vpop.eup %3799  ;;  %v6827_v3 = vld [vmem:[#allocation67_spill] sm:$0xff] }
 0x1dc   :  { %3803 = vrcp.f32 %v919_v0  ;;  %v3802_v31 = vpop.eup %3801  ;;  %v932_v37 = vadd.f32 1.0, %v3800_v27  ;;  %v6828_v0 = vld [vmem:[#allocation68_spill] sm:$0xff]  ;;  %v6830_v27 = vld [vmem:[#allocation70_spill] sm:$0xff] }
 0x1dd   :  { %3805 = vrcp.f32 %v925_v35  ;;  %v6829_v35 = vld [vmem:[#allocation69_spill] sm:$0xff] }
 0x1de   :  { %3807 = vrcp.f32 %v932_v37  ;;  %v6835_v37 = vld [vmem:[#allocation75_spill] sm:$0xff] }
 0x1e6   :  { %v3804_v36 = vpop.eup %3803 }
 0x1e7   :  { %v3806_v28 = vpop.eup %3805  ;;  %v936_v24 = vmul.f32 %v3804_v36, %v3802_v31  ;;  %v6831_v31 = vld [vmem:[#allocation71_spill] sm:$0xff]  ;;  %v6832_v36 = vld [vmem:[#allocation72_spill] sm:$0xff] }
 0x1e8   :  { %v935_v26 = vmul.f32 0.0, %v3806_v28  ;;  %v3808_v25 = vpop.eup %3807  ;;  %v6833_v28 = vld [vmem:[#allocation73_spill] sm:$0xff] }
 0x1ea   :  { %v5120_v23 = vadd.f32 %v936_v24, %v935_v26  ;;  %v6834_v24 = vld [vmem:[#allocation74_spill] sm:$0xff]  ;;  %v6836_v26 = vld [vmem:[#allocation76_spill] sm:$0xff] }
 0x1ec   :  { %3809 = vtanh.f32 %v5120_v23 }
 0x1f6   :  { %v3810_v61 = vpop.eup %3809 }
 0x1f7   :  { %v939_v29 = vmul.f32 %v3810_v61, %v3808_v25  ;;  %v6837_v25 = vld [vmem:[#allocation77_spill] sm:$0xff]  ;;  %v6838_v61 = vld [vmem:[#allocation78_spill] sm:$0xff] }
 0x1f9   :  { %v940_v30 = vpack.c.bf16 %v939_v29, %v939_v29  ;;  %v6839_v29 = vld [vmem:[#allocation79_spill] sm:$0xff] }
 0x1fb   :  { %1316 = vmatmul.mubr.bf16.vlgmr.msra.gmra.mrb[20].mxu0 %v940_v30  ;;  %1357 = vmatmul.mubr.bf16.vlgmr.msra.gmra.mrb[20].mxu1 %v940_v30 }
 0x1fc   :  { %1394 = vmatpush1.bf16.msra.mxu0 %v4726_v38  ;;  %1435 = vmatpush1.bf16.msra.mxu1 %v4728_v39  ;;  %v6788_v38 = vld [vmem:[#allocation28_spill] sm:$0xff]  ;;  %v6789_v39 = vld [vmem:[#allocation29_spill] sm:$0xff] }
 0x1fd   :  { %1395 = vmatprep.subr.bf16.mxu0 %v4732_v40  ;;  %1436 = vmatprep.subr.bf16.mxu1 %v4734_v41  ;;  %v6790_v40 = vld [vmem:[#allocation30_spill] sm:$0xff]  ;;  %v6791_v41 = vld [vmem:[#allocation31_spill] sm:$0xff] }
 0x1fe   :  { %1425 = vmatprep.mubr.bf16.mxu0 %v6787_v45  ;;  %1466 = vmatprep.mubr.bf16.mxu1 %v6787_v45 }
 0x200   :  { %1396 = vmatpush1.bf16.msra.mxu0 %v4736_v42  ;;  %1437 = vmatpush1.bf16.msra.mxu1 %v4738_v43  ;;  %v6792_v42 = vld [vmem:[#allocation32_spill] sm:$0xff]  ;;  %v6793_v43 = vld [vmem:[#allocation33_spill] sm:$0xff] }
 0x201   :  { %1397 = vmatprep.subr.bf16.mxu0 %v4742_v46  ;;  %1438 = vmatprep.subr.bf16.mxu1 %v4746_v47  ;;  %v6794_v46 = vld [vmem:[#allocation34_spill] sm:$0xff]  ;;  %v6795_v47 = vld [vmem:[#allocation35_spill] sm:$0xff] }
 0x204   :  { %1398 = vmatpush1.bf16.msra.mxu0 %v4750_v49  ;;  %1439 = vmatpush1.bf16.msra.mxu1 %v4752_v50  ;;  %v6796_v49 = vld [vmem:[#allocation36_spill] sm:$0xff]  ;;  %v6797_v50 = vld [vmem:[#allocation37_spill] sm:$0xff] }
 0x205   :  { %1399 = vmatprep.subr.bf16.mxu0 %v4756_v51  ;;  %1440 = vmatprep.subr.bf16.mxu1 %v4760_v52  ;;  %v6798_v51 = vld [vmem:[#allocation38_spill] sm:$0xff]  ;;  %v6799_v52 = vld [vmem:[#allocation39_spill] sm:$0xff] }
 0x208   :  { %1400 = vmatpush1.bf16.msra.mxu0 %v4762_v53  ;;  %1441 = vmatpush1.bf16.msra.mxu1 %v4764_v54  ;;  %v6800_v53 = vld [vmem:[#allocation40_spill] sm:$0xff]  ;;  %v6801_v54 = vld [vmem:[#allocation41_spill] sm:$0xff] }
 0x209   :  { %1401 = vmatprep.subr.bf16.mxu0 %v4770_v57  ;;  %1442 = vmatprep.subr.bf16.mxu1 %v4772_v58  ;;  %v6802_v57 = vld [vmem:[#allocation42_spill] sm:$0xff]  ;;  %v6803_v58 = vld [vmem:[#allocation43_spill] sm:$0xff] }
 0x20c   :  { %1402 = vmatpush1.bf16.msra.mxu0 %v4776_v59  ;;  %1443 = vmatpush1.bf16.msra.mxu1 %v4778_v60  ;;  %v6804_v59 = vld [vmem:[#allocation44_spill] sm:$0xff]  ;;  %v6805_v60 = vld [vmem:[#allocation45_spill] sm:$0xff] }
 0x20d   :  { %1403 = vmatprep.subr.bf16.mxu0 %v4780_v62  ;;  %1444 = vmatprep.subr.bf16.mxu1 %v4782_v63  ;;  %v6806_v62 = vld [vmem:[#allocation46_spill] sm:$0xff]  ;;  %v6807_v63 = vld [vmem:[#allocation47_spill] sm:$0xff] }
 0x210   :  { %1404 = vmatpush1.bf16.msra.mxu0 %v4788_v1  ;;  %1445 = vmatpush1.bf16.msra.mxu1 %v4790_v2  ;;  %v6808_v1 = vld [vmem:[#allocation48_spill] sm:$0xff]  ;;  %v6809_v2 = vld [vmem:[#allocation49_spill] sm:$0xff] }
 0x211   :  { %1405 = vmatprep.subr.bf16.mxu0 %v4792_v5  ;;  %1446 = vmatprep.subr.bf16.mxu1 %v4794_v6  ;;  %v6810_v5 = vld [vmem:[#allocation50_spill] sm:$0xff]  ;;  %v6811_v6 = vld [vmem:[#allocation51_spill] sm:$0xff] }
 0x214   :  { %1406 = vmatpush1.bf16.msra.mxu0 %v4802_v7  ;;  %1447 = vmatpush1.bf16.msra.mxu1 %v4804_v8  ;;  %v6812_v7 = vld [vmem:[#allocation52_spill] sm:$0xff]  ;;  %v6813_v8 = vld [vmem:[#allocation53_spill] sm:$0xff] }
 0x215   :  { %1407 = vmatprep.subr.bf16.mxu0 %v4806_v10  ;;  %1448 = vmatprep.subr.bf16.mxu1 %v4808_v11  ;;  %v6814_v10 = vld [vmem:[#allocation54_spill] sm:$0xff]  ;;  %v6815_v11 = vld [vmem:[#allocation55_spill] sm:$0xff] }
 0x218   :  { %1408 = vmatpush1.bf16.msra.mxu0 %v4814_v12  ;;  %1449 = vmatpush1.bf16.msra.mxu1 %v4816_v13  ;;  %v6816_v12 = vld [vmem:[#allocation56_spill] sm:$0xff]  ;;  %v6817_v13 = vld [vmem:[#allocation57_spill] sm:$0xff] }
 0x219   :  { %1505 = vmatprep.subr.bf16.mxu0 %v4828_v14  ;;  %1546 = vmatprep.subr.bf16.mxu1 %v4830_v15 }
 0x21b   :  { %1426 = vmatmul.mubr.bf16.vlgmr.msra.gmra.mrb[24].mxu0 %v940_v30  ;;  %1467 = vmatmul.mubr.bf16.vlgmr.msra.gmra.mrb[24].mxu1 %v940_v30  ;;  %v6840_v30 = vld [vmem:[#allocation80_spill] sm:$0xff] }
 0x21c   :  { %1506 = vmatpush1.bf16.msra.mxu0 %v4832_v16  ;;  %1547 = vmatpush1.bf16.msra.mxu1 %v4834_v17 }
 0x21d   :  { %1507 = vmatprep.subr.bf16.mxu0 %v4840_v18  ;;  %1548 = vmatprep.subr.bf16.mxu1 %v4842_v19 }
 0x220   :  { %1508 = vmatpush1.bf16.msra.mxu0 %v4844_v20  ;;  %1549 = vmatpush1.bf16.msra.mxu1 %v4846_v21 }
 0x221   :  { %1509 = vmatprep.subr.bf16.mxu0 %v4852_v22  ;;  %1550 = vmatprep.subr.bf16.mxu1 %v6788_v38 }
 0x224   :  { %1510 = vmatpush1.bf16.msra.mxu0 %v6789_v39  ;;  %1551 = vmatpush1.bf16.msra.mxu1 %v6790_v40 }
 0x225   :  { %1511 = vmatprep.subr.bf16.mxu0 %v6791_v41  ;;  %1552 = vmatprep.subr.bf16.mxu1 %v6792_v42 }
 0x228   :  { %1512 = vmatpush1.bf16.msra.mxu0 %v6793_v43  ;;  %1553 = vmatpush1.bf16.msra.mxu1 %v6794_v46 }
 0x229   :  { %1513 = vmatprep.subr.bf16.mxu0 %v6795_v47  ;;  %1554 = vmatprep.subr.bf16.mxu1 %v6796_v49 }
 0x22c   :  { %1514 = vmatpush1.bf16.msra.mxu0 %v6797_v50  ;;  %1555 = vmatpush1.bf16.msra.mxu1 %v6798_v51 }
 0x22d   :  { %1515 = vmatprep.subr.bf16.mxu0 %v6799_v52  ;;  %1556 = vmatprep.subr.bf16.mxu1 %v6800_v53 }
 0x230   :  { %1516 = vmatpush1.bf16.msra.mxu0 %v6801_v54  ;;  %1557 = vmatpush1.bf16.msra.mxu1 %v6802_v57 }
 0x231   :  { %1517 = vmatprep.subr.bf16.mxu0 %v6803_v58  ;;  %1558 = vmatprep.subr.bf16.mxu1 %v6804_v59 }
 0x234   :  { %1518 = vmatpush1.bf16.msra.mxu0 %v6805_v60  ;;  %1559 = vmatpush1.bf16.msra.mxu1 %v6806_v62 }
 0x235   :  { %1519 = vmatprep.subr.bf16.mxu0 %v6807_v63  ;;  %1560 = vmatprep.subr.bf16.mxu1 %v6808_v1 }
 0x238   :  { %1520 = vmatpush1.bf16.msra.mxu0 %v6809_v2  ;;  %1561 = vmatpush1.bf16.msra.mxu1 %v6810_v5 }
 0x239   :  { %1521 = vmatprep.subr.bf16.mxu0 %v6811_v6  ;;  %1562 = vmatprep.subr.bf16.mxu1 %v6812_v7 }
 0x23c   :  { %1522 = vmatpush1.bf16.msra.mxu0 %v6813_v8  ;;  %1563 = vmatpush1.bf16.msra.mxu1 %v6814_v10 }
 0x23d   :  { %1523 = vmatprep.subr.bf16.mxu0 %v6815_v11  ;;  %1564 = vmatprep.subr.bf16.mxu1 %v6816_v12 }
 0x240   :  { %1524 = vmatpush1.bf16.msra.mxu0 %v6817_v13  ;;  %1565 = vmatpush1.bf16.msra.mxu1 %v6818_v44 }
 0x241   :  { %1525 = vmatprep.subr.bf16.mxu0 %v6819_v32  ;;  %1566 = vmatprep.subr.bf16.mxu1 %v6820_v55 }
 0x244   :  { %1526 = vmatpush1.bf16.msra.mxu0 %v6821_v56  ;;  %1567 = vmatpush1.bf16.msra.mxu1 %v6822_v48 }
 0x245   :  { %1527 = vmatprep.subr.bf16.mxu0 %v6823_v33  ;;  %1568 = vmatprep.subr.bf16.mxu1 %v6824_v9  ;;  %v6849_v33 = vld [vmem:[#allocation83_spill] sm:$0xff] }
 0x248   :  { %1528 = vmatpush1.bf16.msra.mxu0 %v6825_v4  ;;  %1569 = vmatpush1.bf16.msra.mxu1 %v6826_v34 }
 0x249   :  { %1529 = vmatprep.subr.bf16.mxu0 %v6827_v3  ;;  %1570 = vmatprep.subr.bf16.mxu1 %v6828_v0 }
 0x24c   :  { %1530 = vmatpush1.bf16.msra.mxu0 %v6829_v35  ;;  %1571 = vmatpush1.bf16.msra.mxu1 %v6830_v27  ;;  %v6841_v27 = vld [vmem:[#allocation81_spill] sm:$0xff] }
 0x24d   :  { %1531 = vmatprep.subr.bf16.mxu0 %v6831_v31  ;;  %1572 = vmatprep.subr.bf16.mxu1 %v6832_v36  ;;  %v6842_v31 = vld [vmem:[#allocation82_spill] sm:$0xff] }
 0x24e   :  { %v5219_v36 = vld [vmem:[#allocation8 + $0x4] ss:$16 sps:$4 sm:$0xff]  }
 0x24f   :  { %6843 = vst [vmem:[#allocation28_spill] sm:$0xff] %v5219_v36 }
 0x250   :  { %1532 = vmatpush1.bf16.msra.mxu0 %v6833_v28  ;;  %1573 = vmatpush1.bf16.msra.mxu1 %v6834_v24  ;;  %v5222_v24 = vld [vmem:[#allocation8 + $0xc] ss:$16 sps:$4 sm:$0xff]  }
 0x251   :  { %1533 = vmatprep.subr.bf16.mxu0 %v6835_v37  ;;  %1574 = vmatprep.subr.bf16.mxu1 %v6836_v26  ;;  %6844 = vst [vmem:[#allocation29_spill] sm:$0xff] %v5222_v24  ;;  %v665_v26 = vld [vmem:[#allocation12] sm:$0xf] }
 0x254   :  { %1534 = vmatpush1.bf16.msra.mxu0 %v6837_v25  ;;  %1575 = vmatpush1.bf16.msra.mxu1 %v6838_v61  ;;  %v6845_v25 = vld [vmem:[#allocation84_spill] sm:$0xff]  ;;  %v6847_v61 = vld [vmem:[#allocation85_spill] sm:$0xff] }
 0x255   :  { %1535 = vmatprep.subr.bf16.mxu0 %v6839_v29  ;;  %1576 = vmatprep.subr.bf16.mxu1 %v6840_v30  ;;  %v5226_v37 = vrot.slane %v665_v26, %v6845_v25  ;;  %v5229_v29 = vrot.slane %v665_v26, %v6847_v61  ;;  %v6850_v25 = vsub.s32 3, %v6849_v33 }
 0x257   :  { %6846 = vst [vmem:[#allocation30_spill] sm:$0xff] %v5226_v37  ;;  %6848 = vst [vmem:[#allocation31_spill] sm:$0xff] %v5229_v29  ;;  %v5235_v48 = vrot.slane %v665_v26, %v6850_v25 }
 0x258   :  { %1536 = vmatpush1.bf16.msra.mxu0 %v6841_v27  ;;  %1577 = vmatpush1.bf16.msra.mxu1 %v6842_v31 }
 0x259   :  { %1615 = vmatprep.subr.bf16.mxu0 %v5219_v36  ;;  %1656 = vmatprep.subr.bf16.mxu1 %v5222_v24  ;;  %6851 = vst [vmem:[#allocation32_spill] sm:$0xff] %v5235_v48 }
 0x2ce   :  { %v1317_v30 = vpop.f32.mrb[20].mxu0  ;;  %v1358_v28 = vpop.f32.mrb[20].mxu1 }
 0x2cf   :  { %v1318_v27 = vadd.f32 %v1317_v30, %v5226_v37  ;;  %v1319_v31 = vpop.f32.mrb[21].mxu0  ;;  %v1360_v35 = vpop.f32.mrb[21].mxu1  ;;  %v6852_v30 = vsub.s32 2, %v6849_v33 }
 0x2d0   :  { %v1320_v0 = vadd.f32 %v1319_v31, %v5229_v29  ;;  %v1321_v36 = vpop.f32.mrb[22].mxu0  ;;  %v1362_v3 = vpop.f32.mrb[22].mxu1  ;;  %v1361_v61 = vadd.f32 %v1360_v35, %v5235_v48  ;;  %v6858_v48 = vld [vmem:[#allocation89_spill] sm:$0xff] }
 0x2d1   :  { %v3441_v34 = vmul.f32 -1.442695, %v1318_v27  ;;  %v1322_v4 = vpop.f32.mrb[23].mxu0  ;;  %v1363_v24 = vpop.f32.mrb[23].mxu1  ;;  %v5240_v37 = vrot.slane %v665_v26, %v6852_v30 }
 0x2d2   :  { %v3442_v9 = vmul.f32 -1.442695, %v1320_v0  ;;  %v3443_v56 = vmul.f32 -1.442695, %v1361_v61 }
 0x2d3   :  { %3811 = vpow2.f32 %v3441_v34  ;;  %6853 = vst [vmem:[#allocation33_spill] sm:$0xff] %v5240_v37  ;;  %v1359_v31 = vadd.f32 %v1358_v28, %v5240_v37  ;;  %v6855_v28 = vld [vmem:[#allocation86_spill] sm:$0xff] }
 0x2d4   :  { %3813 = vpow2.f32 %v3442_v9 }
 0x2d5   :  { %3815 = vpow2.f32 %v3443_v56 }
 0x2d6   :  { %3817 = vtanh.f32 %v1359_v31 }
 0x2dd   :  { %v3812_v3 = vpop.eup %3811 }
 0x2de   :  { %v3814_v27 = vpop.eup %3813  ;;  %v1368_v4 = vadd.f32 1.0, %v3812_v3  ;;  %v6856_v3 = vld [vmem:[#allocation87_spill] sm:$0xff] }
 0x2df   :  { %v1374_v0 = vadd.f32 1.0, %v3814_v27  ;;  %v3816_v36 = vpop.eup %3815 }
 0x2e0   :  { %3819 = vrcp.f32 %v1368_v4  ;;  %v3818_v34 = vpop.eup %3817  ;;  %v1381_v25 = vadd.f32 1.0, %v3816_v36  ;;  %v6857_v4 = vld [vmem:[#allocation88_spill] sm:$0xff] }
 0x2e1   :  { %3821 = vrcp.f32 %v1374_v0 }
 0x2e2   :  { %3823 = vrcp.f32 %v1381_v25 }
 0x2ea   :  { %v3820_v9 = vpop.eup %3819 }
 0x2eb   :  { %v3822_v24 = vpop.eup %3821  ;;  %v1385_v35 = vmul.f32 %v3820_v9, %v3818_v34 }
 0x2ec   :  { %v1384_v33 = vmul.f32 0.0, %v3822_v24  ;;  %v3824_v25 = vpop.eup %3823 }
 0x2ee   :  { %v5243_v26 = vadd.f32 %v1385_v35, %v1384_v33  ;;  %v1427_v61 = vpop.f32.mrb[24].mxu0  ;;  %v1468_v30 = vpop.f32.mrb[24].mxu1 }
 0x2ef   :  { %v1475_v37 = vadd.f32 %v1427_v61, %v6855_v28  ;;  %v1477_v56 = vadd.f32 %v1468_v30, %v6856_v3  ;;  %v1429_v31 = vpop.f32.mrb[25].mxu0  ;;  %v1470_v27 = vpop.f32.mrb[25].mxu1 }
 0x2f0   :  { %6854 = vst [vmem:[#allocation34_spill] sm:$0xff] %v5243_v26  ;;  %3825 = vtanh.f32 %v5243_v26  ;;  %v1476_v0 = vadd.f32 %v1429_v31, %v6857_v4  ;;  %v1478_v29 = vadd.f32 %v1470_v27, %v6858_v48  ;;  %v1431_v34 = vpop.f32.mrb[26].mxu0  ;;  %v1472_v36 = vpop.f32.mrb[26].mxu1 }
 0x2f1   :  { %v3444_v9 = vmul.f32 -1.442695, %v1475_v37  ;;  %v1432_v24 = vpop.f32.mrb[27].mxu0  ;;  %v1473_v35 = vpop.f32.mrb[27].mxu1 }
 0x2f2   :  { %v3445_v33 = vmul.f32 -1.442695, %v1476_v0  ;;  %v3446_v28 = vmul.f32 -1.442695, %v1478_v29  ;;  %v5267_v35 = vld [vmem:[#allocation8 + $0x2c] ss:$16 sps:$4 sm:$0xff]  }
 0x2f3   :  { %3827 = vpow2.f32 %v3444_v9 }
 0x2f4   :  { %3829 = vpow2.f32 %v3445_v33  ;;  %v5272_v33 = vld [vmem:[#allocation8 + $0x20] ss:$16 sps:$4 sm:$0xff]  }
 0x2f5   :  { %3831 = vpow2.f32 %v3446_v28  ;;  %v5281_v28 = vld [vmem:[#allocation8 + $0x4c] ss:$16 sps:$4 sm:$0xff]  }
 0x2f6   :  { %3833 = vtanh.f32 %v1477_v56 }
 0x2fa   :  { %v3826_v61 = vpop.eup %3825 }
 0x2fb   :  { %v1388_v30 = vmul.f32 %v3826_v61, %v3824_v25  ;;  %v5275_v25 = vld [vmem:[#allocation8 + $0x28] ss:$16 sps:$4 sm:$0xff]   ;;  %v5278_v61 = vld [vmem:[#allocation8 + $0x44] ss:$16 sps:$4 sm:$0xff]  }
 0x2fd   :  { %v3828_v3 = vpop.eup %3827  ;;  %v1504_v55 = vpack.c.bf16 %v1388_v30, %v1388_v30  ;;  %v5284_v30 = vld [vmem:[#allocation8 + $0x40] ss:$16 sps:$4 sm:$0xff]  }
 0x2fe   :  { %v3830_v32 = vpop.eup %3829  ;;  %v1482_v26 = vadd.f32 1.0, %v3828_v3  ;;  %v5287_v3 = vld [vmem:[#allocation8 + $0x48] ss:$16 sps:$4 sm:$0xff]  }
 0x2ff   :  { %v1488_v31 = vadd.f32 1.0, %v3830_v32  ;;  %1537 = vmatprep.mubr.bf16.mxu0 %v1504_v55  ;;  %1578 = vmatprep.mubr.bf16.mxu1 %v1504_v55  ;;  %v3832_v48 = vpop.eup %3831  ;;  %v5258_v55 = vld [vmem:[#allocation8] ss:$16 sps:$4 sm:$0xff]  }
 0x300   :  { %3835 = vrcp.f32 %v1482_v26  ;;  %v3834_v37 = vpop.eup %3833  ;;  %v1495_v34 = vadd.f32 1.0, %v3832_v48  ;;  %v5261_v26 = vld [vmem:[#allocation8 + $0x8] ss:$16 sps:$4 sm:$0xff]   ;;  %v5293_v48 = vld [vmem:[#allocation8 + $0x6c] ss:$16 sps:$4 sm:$0xff]  }
 0x301   :  { %3837 = vrcp.f32 %v1488_v31  ;;  %v5290_v31 = vld [vmem:[#allocation8 + $0x64] ss:$16 sps:$4 sm:$0xff]  }
 0x302   :  { %3839 = vrcp.f32 %v1495_v34  ;;  %v5308_v34 = vld [vmem:[#allocation8 + $0x80] ss:$16 sps:$4 sm:$0xff]  }
 0x303   :  { %6860 = vst [vmem:[#allocation36_spill] sm:$0xff] %v5308_v34 }
 0x30a   :  { %v3836_v27 = vpop.eup %3835 }
 0x30b   :  { %v3838_v4 = vpop.eup %3837  ;;  %v1499_v0 = vmul.f32 %v3836_v27, %v3834_v37  ;;  %v5296_v37 = vld [vmem:[#allocation8 + $0x60] ss:$16 sps:$4 sm:$0xff]   ;;  %v5299_v27 = vld [vmem:[#allocation8 + $0x68] ss:$16 sps:$4 sm:$0xff]  }
 0x30c   :  { %v1498_v29 = vmul.f32 %v3838_v4, %v5120_v23  ;;  %v3840_v9 = vpop.eup %3839  ;;  %v5264_v23 = vld [vmem:[#allocation8 + $0x24] ss:$16 sps:$4 sm:$0xff]  }
 0x30d   :  { %v5302_v4 = vld [vmem:[#allocation8 + $0x84] ss:$16 sps:$4 sm:$0xff]  }
 0x30e   :  { %v5251_v36 = vadd.f32 %v1499_v0, %v1498_v29  ;;  %v5305_v0 = vld [vmem:[#allocation8 + $0x8c] ss:$16 sps:$4 sm:$0xff]   ;;  %v5311_v29 = vld [vmem:[#allocation8 + $0x88] ss:$16 sps:$4 sm:$0xff]  }
 0x30f   :  { %6859 = vst [vmem:[#allocation35_spill] sm:$0xff] %v5305_v0  ;;  %6861 = vst [vmem:[#allocation37_spill] sm:$0xff] %v5311_v29 }
 0x310   :  { %3841 = vtanh.f32 %v5251_v36 }
 0x31a   :  { %v3842_v56 = vpop.eup %3841 }
 0x31b   :  { %v1502_v32 = vmul.f32 %v3842_v56, %v3840_v9  ;;  %v5314_v9 = vld [vmem:[#allocation8 + $0xa4] ss:$16 sps:$4 sm:$0xff]   ;;  %v5317_v56 = vld [vmem:[#allocation8 + $0xac] ss:$16 sps:$4 sm:$0xff]  }
 0x31c   :  { %6862 = vst [vmem:[#allocation38_spill] sm:$0xff] %v5314_v9  ;;  %6863 = vst [vmem:[#allocation39_spill] sm:$0xff] %v5317_v56 }
 0x31d   :  { %v5254_v24 = vpack.c.bf16 %v1502_v32, %v1502_v32  ;;  %v5320_v32 = vld [vmem:[#allocation8 + $0xa0] ss:$16 sps:$4 sm:$0xff]  }
 0x31e   :  { %6864 = vst [vmem:[#allocation40_spill] sm:$0xff] %v5320_v32 }
 0x31f   :  { %1538 = vmatmul.mubr.bf16.vlgmr.msra.gmra.mrb[28].mxu0 %v5254_v24  ;;  %1579 = vmatmul.mubr.bf16.vlgmr.msra.gmra.mrb[28].mxu1 %v5254_v24 }
 0x320   :  { %1616 = vmatpush1.bf16.msra.mxu0 %v5258_v55  ;;  %1657 = vmatpush1.bf16.msra.mxu1 %v5261_v26 }
 0x321   :  { %1617 = vmatprep.subr.bf16.mxu0 %v5264_v23  ;;  %1658 = vmatprep.subr.bf16.mxu1 %v5267_v35 }
 0x322   :  { %1647 = vmatprep.mubr.bf16.mxu0 %v6787_v45  ;;  %1688 = vmatprep.mubr.bf16.mxu1 %v6787_v45 }
 0x324   :  { %1618 = vmatpush1.bf16.msra.mxu0 %v5272_v33  ;;  %1659 = vmatpush1.bf16.msra.mxu1 %v5275_v25 }
 0x325   :  { %1619 = vmatprep.subr.bf16.mxu0 %v5278_v61  ;;  %1660 = vmatprep.subr.bf16.mxu1 %v5281_v28 }
 0x328   :  { %1620 = vmatpush1.bf16.msra.mxu0 %v5284_v30  ;;  %1661 = vmatpush1.bf16.msra.mxu1 %v5287_v3 }
 0x329   :  { %1621 = vmatprep.subr.bf16.mxu0 %v5290_v31  ;;  %1662 = vmatprep.subr.bf16.mxu1 %v5293_v48 }
 0x32c   :  { %1622 = vmatpush1.bf16.msra.mxu0 %v5296_v37  ;;  %1663 = vmatpush1.bf16.msra.mxu1 %v5299_v27 }
 0x32d   :  { %1623 = vmatprep.subr.bf16.mxu0 %v5302_v4  ;;  %1664 = vmatprep.subr.bf16.mxu1 %v5305_v0  ;;  %v5323_v0 = vld [vmem:[#allocation8 + $0xa8] ss:$16 sps:$4 sm:$0xff]  }
 0x32e   :  { %6865 = vst [vmem:[#allocation41_spill] sm:$0xff] %v5323_v0 }
 0x330   :  { %1624 = vmatpush1.bf16.msra.mxu0 %v5308_v34  ;;  %1665 = vmatpush1.bf16.msra.mxu1 %v5311_v29  ;;  %v5326_v34 = vld [vmem:[#allocation8 + $0xc4] ss:$16 sps:$4 sm:$0xff]   ;;  %v5329_v29 = vld [vmem:[#allocation8 + $0xcc] ss:$16 sps:$4 sm:$0xff]  }
 0x331   :  { %1625 = vmatprep.subr.bf16.mxu0 %v5314_v9  ;;  %1666 = vmatprep.subr.bf16.mxu1 %v5317_v56  ;;  %6866 = vst [vmem:[#allocation42_spill] sm:$0xff] %v5326_v34  ;;  %6867 = vst [vmem:[#allocation43_spill] sm:$0xff] %v5329_v29  ;;  %v5332_v9 = vld [vmem:[#allocation8 + $0xc0] ss:$16 sps:$4 sm:$0xff]   ;;  %v5335_v56 = vld [vmem:[#allocation8 + $0xc8] ss:$16 sps:$4 sm:$0xff]  }
 0x334   :  { %1626 = vmatpush1.bf16.msra.mxu0 %v5320_v32  ;;  %1667 = vmatpush1.bf16.msra.mxu1 %v5323_v0  ;;  %v5338_v32 = vld [vmem:[#allocation8 + $0xe4] ss:$16 sps:$4 sm:$0xff]   ;;  %v5341_v0 = vld [vmem:[#allocation8 + $0xec] ss:$16 sps:$4 sm:$0xff]  }
 0x335   :  { %1627 = vmatprep.subr.bf16.mxu0 %v5326_v34  ;;  %1668 = vmatprep.subr.bf16.mxu1 %v5329_v29  ;;  %v5344_v34 = vld [vmem:[#allocation8 + $0xe0] ss:$16 sps:$4 sm:$0xff]   ;;  %v5347_v29 = vld [vmem:[#allocation8 + $0xe8] ss:$16 sps:$4 sm:$0xff]  }
 0x338   :  { %1628 = vmatpush1.bf16.msra.mxu0 %v5332_v9  ;;  %1669 = vmatpush1.bf16.msra.mxu1 %v5335_v56 }
 0x339   :  { %1629 = vmatprep.subr.bf16.mxu0 %v5338_v32  ;;  %1670 = vmatprep.subr.bf16.mxu1 %v5341_v0 }
 0x33c   :  { %1630 = vmatpush1.bf16.msra.mxu0 %v5344_v34  ;;  %1671 = vmatpush1.bf16.msra.mxu1 %v5347_v29 }
 0x33d   :  { %1727 = vmatprep.subr.bf16.mxu0 %v4828_v14  ;;  %1768 = vmatprep.subr.bf16.mxu1 %v4830_v15  ;;  %v6868_v14 = vld [vmem:[#allocation59_spill] sm:$0xff]  ;;  %v6869_v15 = vld [vmem:[#allocation60_spill] sm:$0xff] }
 0x33f   :  { %1648 = vmatmul.mubr.bf16.vlgmr.msra.gmra.mrb[32].mxu0 %v5254_v24  ;;  %1689 = vmatmul.mubr.bf16.vlgmr.msra.gmra.mrb[32].mxu1 %v5254_v24  ;;  %v6896_v24 = vld [vmem:[#allocation32_spill] sm:$0xff] }
 0x340   :  { %1728 = vmatpush1.bf16.msra.mxu0 %v4832_v16  ;;  %1769 = vmatpush1.bf16.msra.mxu1 %v4834_v17  ;;  %v6870_v16 = vld [vmem:[#allocation61_spill] sm:$0xff]  ;;  %v6871_v17 = vld [vmem:[#allocation62_spill] sm:$0xff] }
 0x341   :  { %1729 = vmatprep.subr.bf16.mxu0 %v4840_v18  ;;  %1770 = vmatprep.subr.bf16.mxu1 %v4842_v19  ;;  %v6872_v18 = vld [vmem:[#allocation63_spill] sm:$0xff]  ;;  %v6873_v19 = vld [vmem:[#allocation64_spill] sm:$0xff] }
 0x344   :  { %1730 = vmatpush1.bf16.msra.mxu0 %v4844_v20  ;;  %1771 = vmatpush1.bf16.msra.mxu1 %v4846_v21  ;;  %v6874_v20 = vld [vmem:[#allocation65_spill] sm:$0xff]  ;;  %v6875_v21 = vld [vmem:[#allocation66_spill] sm:$0xff] }
 0x345   :  { %1731 = vmatprep.subr.bf16.mxu0 %v4852_v22  ;;  %1772 = vmatprep.subr.bf16.mxu1 %v6788_v38  ;;  %v6876_v22 = vld [vmem:[#allocation67_spill] sm:$0xff]  ;;  %v6877_v38 = vld [vmem:[#allocation68_spill] sm:$0xff] }
 0x348   :  { %1732 = vmatpush1.bf16.msra.mxu0 %v6789_v39  ;;  %1773 = vmatpush1.bf16.msra.mxu1 %v6790_v40  ;;  %v6878_v39 = vld [vmem:[#allocation69_spill] sm:$0xff]  ;;  %v6879_v40 = vld [vmem:[#allocation70_spill] sm:$0xff] }
 0x349   :  { %1733 = vmatprep.subr.bf16.mxu0 %v6791_v41  ;;  %1774 = vmatprep.subr.bf16.mxu1 %v6792_v42  ;;  %v6880_v41 = vld [vmem:[#allocation71_spill] sm:$0xff]  ;;  %v6881_v42 = vld [vmem:[#allocation72_spill] sm:$0xff] }
 0x34c   :  { %1734 = vmatpush1.bf16.msra.mxu0 %v6793_v43  ;;  %1775 = vmatpush1.bf16.msra.mxu1 %v6794_v46  ;;  %v6882_v43 = vld [vmem:[#allocation73_spill] sm:$0xff]  ;;  %v6883_v46 = vld [vmem:[#allocation74_spill] sm:$0xff] }
 0x34d   :  { %1735 = vmatprep.subr.bf16.mxu0 %v6795_v47  ;;  %1776 = vmatprep.subr.bf16.mxu1 %v6796_v49  ;;  %v6884_v47 = vld [vmem:[#allocation75_spill] sm:$0xff]  ;;  %v6885_v49 = vld [vmem:[#allocation76_spill] sm:$0xff] }
 0x350   :  { %1736 = vmatpush1.bf16.msra.mxu0 %v6797_v50  ;;  %1777 = vmatpush1.bf16.msra.mxu1 %v6798_v51  ;;  %v6886_v50 = vld [vmem:[#allocation77_spill] sm:$0xff]  ;;  %v6887_v51 = vld [vmem:[#allocation78_spill] sm:$0xff] }
 0x351   :  { %1737 = vmatprep.subr.bf16.mxu0 %v6799_v52  ;;  %1778 = vmatprep.subr.bf16.mxu1 %v6800_v53  ;;  %v6888_v52 = vld [vmem:[#allocation79_spill] sm:$0xff]  ;;  %v6889_v53 = vld [vmem:[#allocation80_spill] sm:$0xff] }
 0x354   :  { %1738 = vmatpush1.bf16.msra.mxu0 %v6801_v54  ;;  %1779 = vmatpush1.bf16.msra.mxu1 %v6802_v57  ;;  %v6890_v54 = vld [vmem:[#allocation81_spill] sm:$0xff]  ;;  %v6891_v57 = vld [vmem:[#allocation82_spill] sm:$0xff] }
 0x355   :  { %1739 = vmatprep.subr.bf16.mxu0 %v6803_v58  ;;  %1780 = vmatprep.subr.bf16.mxu1 %v6804_v59  ;;  %v6892_v58 = vld [vmem:[#allocation28_spill] sm:$0xff]  ;;  %v6893_v59 = vld [vmem:[#allocation29_spill] sm:$0xff] }
 0x358   :  { %1740 = vmatpush1.bf16.msra.mxu0 %v6805_v60  ;;  %1781 = vmatpush1.bf16.msra.mxu1 %v6806_v62 }
 0x359   :  { %1741 = vmatprep.subr.bf16.mxu0 %v6807_v63  ;;  %1782 = vmatprep.subr.bf16.mxu1 %v6808_v1  ;;  %v6894_v63 = vld [vmem:[#allocation30_spill] sm:$0xff] }
 0x35c   :  { %1742 = vmatpush1.bf16.msra.mxu0 %v6809_v2  ;;  %1783 = vmatpush1.bf16.msra.mxu1 %v6810_v5 }
 0x35d   :  { %1743 = vmatprep.subr.bf16.mxu0 %v6811_v6  ;;  %1784 = vmatprep.subr.bf16.mxu1 %v6812_v7  ;;  %v6895_v6 = vld [vmem:[#allocation31_spill] sm:$0xff] }
 0x360   :  { %1744 = vmatpush1.bf16.msra.mxu0 %v6813_v8  ;;  %1785 = vmatpush1.bf16.msra.mxu1 %v6814_v10 }
 0x361   :  { %1745 = vmatprep.subr.bf16.mxu0 %v6815_v11  ;;  %1786 = vmatprep.subr.bf16.mxu1 %v6816_v12 }
 0x364   :  { %1746 = vmatpush1.bf16.msra.mxu0 %v6817_v13  ;;  %1787 = vmatpush1.bf16.msra.mxu1 %v6818_v44 }
 0x365   :  { %1747 = vmatprep.subr.bf16.mxu0 %v6868_v14  ;;  %1788 = vmatprep.subr.bf16.mxu1 %v6869_v15 }
 0x368   :  { %1748 = vmatpush1.bf16.msra.mxu0 %v6870_v16  ;;  %1789 = vmatpush1.bf16.msra.mxu1 %v6871_v17  ;;  %v6897_v16 = vld [vmem:[#allocation33_spill] sm:$0xff] }
 0x369   :  { %1749 = vmatprep.subr.bf16.mxu0 %v6872_v18  ;;  %1790 = vmatprep.subr.bf16.mxu1 %v6873_v19 }
 0x36c   :  { %1750 = vmatpush1.bf16.msra.mxu0 %v6874_v20  ;;  %1791 = vmatpush1.bf16.msra.mxu1 %v6875_v21 }
 0x36d   :  { %1751 = vmatprep.subr.bf16.mxu0 %v6876_v22  ;;  %1792 = vmatprep.subr.bf16.mxu1 %v6877_v38 }
 0x370   :  { %1752 = vmatpush1.bf16.msra.mxu0 %v6878_v39  ;;  %1793 = vmatpush1.bf16.msra.mxu1 %v6879_v40 }
 0x371   :  { %1753 = vmatprep.subr.bf16.mxu0 %v6880_v41  ;;  %1794 = vmatprep.subr.bf16.mxu1 %v6881_v42 }
 0x374   :  { %1754 = vmatpush1.bf16.msra.mxu0 %v6882_v43  ;;  %1795 = vmatpush1.bf16.msra.mxu1 %v6883_v46  ;;  %v6898_v43 = vld [vmem:[#allocation34_spill] sm:$0xff] }
 0x375   :  { %1755 = vmatprep.subr.bf16.mxu0 %v6884_v47  ;;  %1796 = vmatprep.subr.bf16.mxu1 %v6885_v49 }
 0x378   :  { %1756 = vmatpush1.bf16.msra.mxu0 %v6886_v50  ;;  %1797 = vmatpush1.bf16.msra.mxu1 %v6887_v51  ;;  %v6899_v51 = vld [vmem:[#allocation90_spill] sm:$0xff] }
 0x379   :  { %1757 = vmatprep.subr.bf16.mxu0 %v6888_v52  ;;  %1798 = vmatprep.subr.bf16.mxu1 %v6889_v53  ;;  %v6900_v53 = vld [vmem:[#allocation91_spill] sm:$0xff] }
 0x37c   :  { %1758 = vmatpush1.bf16.msra.mxu0 %v6890_v54  ;;  %1799 = vmatpush1.bf16.msra.mxu1 %v6891_v57 }
 0x37d   :  { %1837 = vmatprep.subr.bf16.mxu0 %v6892_v58  ;;  %1878 = vmatprep.subr.bf16.mxu1 %v6893_v59 }
 0x3f2   :  { %v1539_v60 = vpop.f32.mrb[28].mxu0  ;;  %v1580_v62 = vpop.f32.mrb[28].mxu1 }
 0x3f3   :  { %v1540_v1 = vadd.f32 %v1539_v60, %v6894_v63  ;;  %v1541_v2 = vpop.f32.mrb[29].mxu0  ;;  %v1582_v5 = vpop.f32.mrb[29].mxu1  ;;  %v1581_v17 = vadd.f32 %v1580_v62, %v6897_v16  ;;  %v6901_v62 = vld [vmem:[#allocation92_spill] sm:$0xff] }
 0x3f4   :  { %v1542_v7 = vadd.f32 %v1541_v2, %v6895_v6  ;;  %v1543_v8 = vpop.f32.mrb[30].mxu0  ;;  %v1584_v10 = vpop.f32.mrb[30].mxu1  ;;  %v1583_v14 = vadd.f32 %v1582_v5, %v6896_v24  ;;  %v6902_v2 = vld [vmem:[#allocation93_spill] sm:$0xff] }
 0x3f5   :  { %v3447_v11 = vmul.f32 -1.442695, %v1540_v1  ;;  %v1544_v12 = vpop.f32.mrb[31].mxu0  ;;  %v1585_v13 = vpop.f32.mrb[31].mxu1 }
 0x3f6   :  { %v3448_v44 = vmul.f32 -1.442695, %v1542_v7  ;;  %v3449_v15 = vmul.f32 -1.442695, %v1583_v14 }
 0x3f7   :  { %3843 = vpow2.f32 %v3447_v11 }
 0x3f8   :  { %3845 = vpow2.f32 %v3448_v44 }
 0x3f9   :  { %3847 = vpow2.f32 %v3449_v15 }
 0x3fa   :  { %3849 = vtanh.f32 %v1581_v17 }
 0x401   :  { %v3844_v18 = vpop.eup %3843 }
 0x402   :  { %v3846_v19 = vpop.eup %3845  ;;  %v1590_v20 = vadd.f32 1.0, %v3844_v18 }
 0x403   :  { %v1596_v21 = vadd.f32 1.0, %v3846_v19  ;;  %v3848_v22 = vpop.eup %3847 }
 0x404   :  { %3851 = vrcp.f32 %v1590_v20  ;;  %v3850_v38 = vpop.eup %3849  ;;  %v1603_v42 = vadd.f32 1.0, %v3848_v22 }
 0x405   :  { %3853 = vrcp.f32 %v1596_v21 }
 0x406   :  { %3855 = vrcp.f32 %v1603_v42 }
 0x40e   :  { %v3852_v39 = vpop.eup %3851 }
 0x40f   :  { %v3854_v40 = vpop.eup %3853  ;;  %v1607_v41 = vmul.f32 %v3852_v39, %v3850_v38 }
 0x410   :  { %v1606_v46 = vmul.f32 %v3854_v40, %v6898_v43  ;;  %v3856_v44 = vpop.eup %3855 }
 0x412   :  { %v1649_v47 = vpop.f32.mrb[32].mxu0  ;;  %v1690_v49 = vpop.f32.mrb[32].mxu1  ;;  %v5423_v50 = vadd.f32 %v1607_v41, %v1606_v46 }
 0x413   :  { %v1697_v52 = vadd.f32 %v1649_v47, %v6899_v51  ;;  %v1699_v54 = vadd.f32 %v1690_v49, %v6900_v53  ;;  %v1651_v57 = vpop.f32.mrb[33].mxu0  ;;  %v1692_v60 = vpop.f32.mrb[33].mxu1 }
 0x414   :  { %v1698_v1 = vadd.f32 %v1651_v57, %v6901_v62  ;;  %v1700_v5 = vadd.f32 %v1692_v60, %v6902_v2  ;;  %v1653_v7 = vpop.f32.mrb[34].mxu0  ;;  %v1694_v8 = vpop.f32.mrb[34].mxu1  ;;  %3857 = vtanh.f32 %v5423_v50  ;;  %v6905_v57 = vld [vmem:[#allocation37_spill] sm:$0xff]  ;;  %v6906_v60 = vld [vmem:[#allocation38_spill] sm:$0xff]  ;;  %v6907_v62 = vld [vmem:[#allocation39_spill] sm:$0xff] }
 0x415   :  { %v3450_v10 = vmul.f32 -1.442695, %v1697_v52  ;;  %v1654_v11 = vpop.f32.mrb[35].mxu0  ;;  %v1695_v12 = vpop.f32.mrb[35].mxu1  ;;  %v6909_v2 = vld [vmem:[#allocation41_spill] sm:$0xff]  ;;  %v6911_v7 = vld [vmem:[#allocation43_spill] sm:$0xff] }
 0x416   :  { %v3451_v13 = vmul.f32 -1.442695, %v1698_v1  ;;  %v3452_v15 = vmul.f32 -1.442695, %v1700_v5  ;;  %v6908_v1 = vld [vmem:[#allocation40_spill] sm:$0xff]  ;;  %v6910_v5 = vld [vmem:[#allocation42_spill] sm:$0xff] }
 0x417   :  { %3859 = vpow2.f32 %v3450_v10  ;;  %v5466_v8 = vld [vmem:[#allocation11 + $0x4] ss:$16 sps:$4 sm:$0xff]   ;;  %v5469_v10 = vld [vmem:[#allocation11 + $0xc] ss:$16 sps:$4 sm:$0xff]   ;;  %v5472_v11 = vld [vmem:[#allocation11] ss:$16 sps:$4 sm:$0xff]  }
 0x418   :  { %3861 = vpow2.f32 %v3451_v13  ;;  %v5475_v12 = vld [vmem:[#allocation11 + $0x8] ss:$16 sps:$4 sm:$0xff]   ;;  %v5478_v13 = vld [vmem:[#allocation11 + $0x24] ss:$16 sps:$4 sm:$0xff]  }
 0x419   :  { %3863 = vpow2.f32 %v3452_v15  ;;  %v5487_v15 = vld [vmem:[#allocation11 + $0x28] ss:$16 sps:$4 sm:$0xff]  }
 0x41a   :  { %3865 = vtanh.f32 %v1699_v54  ;;  %v6904_v54 = vld [vmem:[#allocation36_spill] sm:$0xff] }
 0x41e   :  { %v3858_v14 = vpop.eup %3857 }
 0x41f   :  { %v1610_v17 = vmul.f32 %v3858_v14, %v3856_v44  ;;  %v5481_v44 = vld [vmem:[#allocation11 + $0x2c] ss:$16 sps:$4 sm:$0xff]   ;;  %v5484_v14 = vld [vmem:[#allocation11 + $0x20] ss:$16 sps:$4 sm:$0xff]  }
 0x421   :  { %v3860_v18 = vpop.eup %3859  ;;  %v1726_v19 = vpack.c.bf16 %v1610_v17, %v1610_v17  ;;  %v5490_v17 = vld [vmem:[#allocation11 + $0x44] ss:$16 sps:$4 sm:$0xff]  }
 0x422   :  { %v3862_v20 = vpop.eup %3861  ;;  %v1704_v21 = vadd.f32 1.0, %v3860_v18  ;;  %v5493_v18 = vld [vmem:[#allocation11 + $0x4c] ss:$16 sps:$4 sm:$0xff]  }
 0x423   :  { %v1710_v22 = vadd.f32 1.0, %v3862_v20  ;;  %1759 = vmatprep.mubr.bf16.mxu0 %v1726_v19  ;;  %1800 = vmatprep.mubr.bf16.mxu1 %v1726_v19  ;;  %v3864_v38 = vpop.eup %3863  ;;  %v5496_v19 = vld [vmem:[#allocation11 + $0x40] ss:$16 sps:$4 sm:$0xff]   ;;  %v5499_v20 = vld [vmem:[#allocation11 + $0x48] ss:$16 sps:$4 sm:$0xff]  }
 0x424   :  { %3867 = vrcp.f32 %v1704_v21  ;;  %v3866_v39 = vpop.eup %3865  ;;  %v1717_v43 = vadd.f32 1.0, %v3864_v38  ;;  %6912 = vst [vmem:[#allocation44_spill] sm:$0xff] %v5496_v19  ;;  %6913 = vst [vmem:[#allocation45_spill] sm:$0xff] %v5499_v20  ;;  %v5502_v21 = vld [vmem:[#allocation11 + $0x64] ss:$16 sps:$4 sm:$0xff]  }
 0x425   :  { %3869 = vrcp.f32 %v1710_v22  ;;  %6914 = vst [vmem:[#allocation46_spill] sm:$0xff] %v5502_v21  ;;  %v5505_v22 = vld [vmem:[#allocation11 + $0x6c] ss:$16 sps:$4 sm:$0xff]   ;;  %v5508_v38 = vld [vmem:[#allocation11 + $0x60] ss:$16 sps:$4 sm:$0xff]  }
 0x426   :  { %3871 = vrcp.f32 %v1717_v43  ;;  %6915 = vst [vmem:[#allocation47_spill] sm:$0xff] %v5505_v22  ;;  %6916 = vst [vmem:[#allocation48_spill] sm:$0xff] %v5508_v38  ;;  %v5523_v43 = vld [vmem:[#allocation11 + $0x88] ss:$16 sps:$4 sm:$0xff]  }
 0x427   :  { %6921 = vst [vmem:[#allocation53_spill] sm:$0xff] %v5523_v43 }
 0x42e   :  { %v3868_v40 = vpop.eup %3867 }
 0x42f   :  { %v3870_v41 = vpop.eup %3869  ;;  %v1721_v42 = vmul.f32 %v3868_v40, %v3866_v39  ;;  %v5511_v39 = vld [vmem:[#allocation11 + $0x68] ss:$16 sps:$4 sm:$0xff]   ;;  %v5514_v40 = vld [vmem:[#allocation11 + $0x84] ss:$16 sps:$4 sm:$0xff]  }
 0x430   :  { %v1720_v46 = vmul.f32 %v3870_v41, %v5251_v36  ;;  %v3872_v49 = vpop.eup %3871  ;;  %v6903_v36 = vld [vmem:[#allocation35_spill] sm:$0xff]  ;;  %6917 = vst [vmem:[#allocation49_spill] sm:$0xff] %v5511_v39  ;;  %6918 = vst [vmem:[#allocation50_spill] sm:$0xff] %v5514_v40 }
 0x431   :  { %v5517_v41 = vld [vmem:[#allocation11 + $0x8c] ss:$16 sps:$4 sm:$0xff]  }
 0x432   :  { %v5431_v47 = vadd.f32 %v1721_v42, %v1720_v46  ;;  %6919 = vst [vmem:[#allocation51_spill] sm:$0xff] %v5517_v41  ;;  %v5520_v42 = vld [vmem:[#allocation11 + $0x80] ss:$16 sps:$4 sm:$0xff]   ;;  %v5526_v46 = vld [vmem:[#allocation11 + $0xa4] ss:$16 sps:$4 sm:$0xff]  }
 0x433   :  { %6920 = vst [vmem:[#allocation52_spill] sm:$0xff] %v5520_v42  ;;  %6922 = vst [vmem:[#allocation54_spill] sm:$0xff] %v5526_v46 }
 0x434   :  { %3873 = vtanh.f32 %v5431_v47 }
 0x43e   :  { %v3874_v51 = vpop.eup %3873 }
 0x43f   :  { %v1724_v52 = vmul.f32 %v3874_v51, %v3872_v49  ;;  %v5529_v49 = vld [vmem:[#allocation11 + $0xac] ss:$16 sps:$4 sm:$0xff]   ;;  %v5532_v51 = vld [vmem:[#allocation11 + $0xa0] ss:$16 sps:$4 sm:$0xff]  }
 0x440   :  { %6923 = vst [vmem:[#allocation55_spill] sm:$0xff] %v5529_v49  ;;  %6924 = vst [vmem:[#allocation56_spill] sm:$0xff] %v5532_v51 }
 0x441   :  { %v1725_v53 = vpack.c.bf16 %v1724_v52, %v1724_v52  ;;  %v5535_v52 = vld [vmem:[#allocation11 + $0xa8] ss:$16 sps:$4 sm:$0xff]  }
 0x442   :  { %6925 = vst [vmem:[#allocation57_spill] sm:$0xff] %v5535_v52 }
 0x443   :  { %1760 = vmatmul.mubr.bf16.vlgmr.msra.gmra.mrb[36].mxu0 %v1725_v53  ;;  %1801 = vmatmul.mubr.bf16.vlgmr.msra.gmra.mrb[36].mxu1 %v1725_v53 }
 0x444   :  { %1838 = vmatpush1.bf16.msra.mxu0 %v5258_v55  ;;  %1879 = vmatpush1.bf16.msra.mxu1 %v5261_v26 }
 0x445   :  { %1839 = vmatprep.subr.bf16.mxu0 %v5264_v23  ;;  %1880 = vmatprep.subr.bf16.mxu1 %v5267_v35 }
 0x446   :  { %1869 = vmatprep.mubr.bf16.mxu0 %v6787_v45  ;;  %1910 = vmatprep.mubr.bf16.mxu1 %v6787_v45 }
 0x448   :  { %1840 = vmatpush1.bf16.msra.mxu0 %v5272_v33  ;;  %1881 = vmatpush1.bf16.msra.mxu1 %v5275_v25 }
 0x449   :  { %1841 = vmatprep.subr.bf16.mxu0 %v5278_v61  ;;  %1882 = vmatprep.subr.bf16.mxu1 %v5281_v28 }
 0x44c   :  { %1842 = vmatpush1.bf16.msra.mxu0 %v5284_v30  ;;  %1883 = vmatpush1.bf16.msra.mxu1 %v5287_v3 }
 0x44d   :  { %1843 = vmatprep.subr.bf16.mxu0 %v5290_v31  ;;  %1884 = vmatprep.subr.bf16.mxu1 %v5293_v48 }
 0x450   :  { %1844 = vmatpush1.bf16.msra.mxu0 %v5296_v37  ;;  %1885 = vmatpush1.bf16.msra.mxu1 %v5299_v27 }
 0x451   :  { %1845 = vmatprep.subr.bf16.mxu0 %v5302_v4  ;;  %1886 = vmatprep.subr.bf16.mxu1 %v6903_v36 }
 0x454   :  { %1846 = vmatpush1.bf16.msra.mxu0 %v6904_v54  ;;  %1887 = vmatpush1.bf16.msra.mxu1 %v6905_v57 }
 0x455   :  { %1847 = vmatprep.subr.bf16.mxu0 %v6906_v60  ;;  %1888 = vmatprep.subr.bf16.mxu1 %v6907_v62 }
 0x458   :  { %1848 = vmatpush1.bf16.msra.mxu0 %v6908_v1  ;;  %1889 = vmatpush1.bf16.msra.mxu1 %v6909_v2 }
 0x459   :  { %1849 = vmatprep.subr.bf16.mxu0 %v6910_v5  ;;  %1890 = vmatprep.subr.bf16.mxu1 %v6911_v7 }
 0x45c   :  { %1850 = vmatpush1.bf16.msra.mxu0 %v5332_v9  ;;  %1891 = vmatpush1.bf16.msra.mxu1 %v5335_v56 }
 0x45d   :  { %1851 = vmatprep.subr.bf16.mxu0 %v5338_v32  ;;  %1892 = vmatprep.subr.bf16.mxu1 %v5341_v0 }
 0x460   :  { %1852 = vmatpush1.bf16.msra.mxu0 %v5344_v34  ;;  %1893 = vmatpush1.bf16.msra.mxu1 %v5347_v29 }
 0x461   :  { %1949 = vmatprep.subr.bf16.mxu0 %v5466_v8  ;;  %1990 = vmatprep.subr.bf16.mxu1 %v5469_v10 }
 0x463   :  { %1870 = vmatmul.mubr.bf16.vlgmr.msra.gmra.mrb[40].mxu0 %v1725_v53  ;;  %1911 = vmatmul.mubr.bf16.vlgmr.msra.gmra.mrb[40].mxu1 %v1725_v53  ;;  %v5538_v53 = vld [vmem:[#allocation11 + $0xc4] ss:$16 sps:$4 sm:$0xff]  }
 0x464   :  { %1950 = vmatpush1.bf16.msra.mxu0 %v5472_v11  ;;  %1991 = vmatpush1.bf16.msra.mxu1 %v5475_v12  ;;  %6926 = vst [vmem:[#allocation58_spill] sm:$0xff] %v5538_v53 }
 0x465   :  { %1951 = vmatprep.subr.bf16.mxu0 %v5478_v13  ;;  %1992 = vmatprep.subr.bf16.mxu1 %v5481_v44 }
 0x468   :  { %1952 = vmatpush1.bf16.msra.mxu0 %v5484_v14  ;;  %1993 = vmatpush1.bf16.msra.mxu1 %v5487_v15 }
 0x469   :  { %1953 = vmatprep.subr.bf16.mxu0 %v5490_v17  ;;  %1994 = vmatprep.subr.bf16.mxu1 %v5493_v18 }
 0x46c   :  { %1954 = vmatpush1.bf16.msra.mxu0 %v5496_v19  ;;  %1995 = vmatpush1.bf16.msra.mxu1 %v5499_v20 }
 0x46d   :  { %1955 = vmatprep.subr.bf16.mxu0 %v5502_v21  ;;  %1996 = vmatprep.subr.bf16.mxu1 %v5505_v22 }
 0x470   :  { %1956 = vmatpush1.bf16.msra.mxu0 %v5508_v38  ;;  %1997 = vmatpush1.bf16.msra.mxu1 %v5511_v39 }
 0x471   :  { %1957 = vmatprep.subr.bf16.mxu0 %v5514_v40  ;;  %1998 = vmatprep.subr.bf16.mxu1 %v5517_v41 }
 0x474   :  { %1958 = vmatpush1.bf16.msra.mxu0 %v5520_v42  ;;  %1999 = vmatpush1.bf16.msra.mxu1 %v5523_v43  ;;  %v5541_v43 = vld [vmem:[#allocation11 + $0xcc] ss:$16 sps:$4 sm:$0xff]  }
 0x475   :  { %1959 = vmatprep.subr.bf16.mxu0 %v5526_v46  ;;  %2000 = vmatprep.subr.bf16.mxu1 %v5529_v49  ;;  %6927 = vst [vmem:[#allocation83_spill] sm:$0xff] %v5541_v43  ;;  %v5544_v46 = vld [vmem:[#allocation11 + $0xc0] ss:$16 sps:$4 sm:$0xff]   ;;  %v5547_v49 = vld [vmem:[#allocation11 + $0xc8] ss:$16 sps:$4 sm:$0xff]  }
 0x476   :  { %6928 = vst [vmem:[#allocation86_spill] sm:$0xff] %v5544_v46  ;;  %6929 = vst [vmem:[#allocation87_spill] sm:$0xff] %v5547_v49 }
 0x478   :  { %1960 = vmatpush1.bf16.msra.mxu0 %v5532_v51  ;;  %2001 = vmatpush1.bf16.msra.mxu1 %v5535_v52  ;;  %v5550_v51 = vld [vmem:[#allocation11 + $0xe4] ss:$16 sps:$4 sm:$0xff]   ;;  %v5553_v52 = vld [vmem:[#allocation11 + $0xec] ss:$16 sps:$4 sm:$0xff]  }
 0x479   :  { %1961 = vmatprep.subr.bf16.mxu0 %v5538_v53  ;;  %2002 = vmatprep.subr.bf16.mxu1 %v5541_v43  ;;  %6930 = vst [vmem:[#allocation88_spill] sm:$0xff] %v5550_v51  ;;  %6931 = vst [vmem:[#allocation89_spill] sm:$0xff] %v5553_v52  ;;  %v5556_v53 = vld [vmem:[#allocation11 + $0xe0] ss:$16 sps:$4 sm:$0xff]   ;;  %v5559_v43 = vld [vmem:[#allocation11 + $0xe8] ss:$16 sps:$4 sm:$0xff]  }
 0x47a   :  { %6932 = vst [vmem:[#allocation59_spill] sm:$0xff] %v5556_v53  ;;  %6933 = vst [vmem:[#allocation60_spill] sm:$0xff] %v5559_v43 }
 0x47c   :  { %1962 = vmatpush1.bf16.msra.mxu0 %v5544_v46  ;;  %2003 = vmatpush1.bf16.msra.mxu1 %v5547_v49  ;;  %v5562_v46 = vld [vmem:[#allocation11 + $0x104] ss:$16 sps:$4 sm:$0xff]   ;;  %v5565_v49 = vld [vmem:[#allocation11 + $0x10c] ss:$16 sps:$4 sm:$0xff]  }
 0x47d   :  { %1963 = vmatprep.subr.bf16.mxu0 %v5550_v51  ;;  %2004 = vmatprep.subr.bf16.mxu1 %v5553_v52  ;;  %6934 = vst [vmem:[#allocation61_spill] sm:$0xff] %v5562_v46  ;;  %6935 = vst [vmem:[#allocation62_spill] sm:$0xff] %v5565_v49  ;;  %v5568_v51 = vld [vmem:[#allocation11 + $0x100] ss:$16 sps:$4 sm:$0xff]   ;;  %v5571_v52 = vld [vmem:[#allocation11 + $0x108] ss:$16 sps:$4 sm:$0xff]  }
 0x47e   :  { %6936 = vst [vmem:[#allocation63_spill] sm:$0xff] %v5568_v51  ;;  %6937 = vst [vmem:[#allocation64_spill] sm:$0xff] %v5571_v52 }
 0x480   :  { %1964 = vmatpush1.bf16.msra.mxu0 %v5556_v53  ;;  %2005 = vmatpush1.bf16.msra.mxu1 %v5559_v43  ;;  %v5574_v53 = vld [vmem:[#allocation11 + $0x124] ss:$16 sps:$4 sm:$0xff]   ;;  %v5577_v43 = vld [vmem:[#allocation11 + $0x12c] ss:$16 sps:$4 sm:$0xff]  }
 0x481   :  { %1965 = vmatprep.subr.bf16.mxu0 %v5562_v46  ;;  %2006 = vmatprep.subr.bf16.mxu1 %v5565_v49  ;;  %6938 = vst [vmem:[#allocation65_spill] sm:$0xff] %v5574_v53  ;;  %6939 = vst [vmem:[#allocation66_spill] sm:$0xff] %v5577_v43  ;;  %v5580_v46 = vld [vmem:[#allocation11 + $0x120] ss:$16 sps:$4 sm:$0xff]   ;;  %v5583_v49 = vld [vmem:[#allocation11 + $0x128] ss:$16 sps:$4 sm:$0xff]  }
 0x482   :  { %6940 = vst [vmem:[#allocation67_spill] sm:$0xff] %v5580_v46  ;;  %6941 = vst [vmem:[#allocation68_spill] sm:$0xff] %v5583_v49 }
 0x484   :  { %1966 = vmatpush1.bf16.msra.mxu0 %v5568_v51  ;;  %2007 = vmatpush1.bf16.msra.mxu1 %v5571_v52  ;;  %v5586_v51 = vld [vmem:[#allocation11 + $0x144] ss:$16 sps:$4 sm:$0xff]   ;;  %v5589_v52 = vld [vmem:[#allocation11 + $0x14c] ss:$16 sps:$4 sm:$0xff]  }
 0x485   :  { %1967 = vmatprep.subr.bf16.mxu0 %v5574_v53  ;;  %2008 = vmatprep.subr.bf16.mxu1 %v5577_v43  ;;  %6942 = vst [vmem:[#allocation69_spill] sm:$0xff] %v5586_v51  ;;  %6943 = vst [vmem:[#allocation70_spill] sm:$0xff] %v5589_v52  ;;  %v5592_v53 = vld [vmem:[#allocation11 + $0x140] ss:$16 sps:$4 sm:$0xff]   ;;  %v5595_v43 = vld [vmem:[#allocation11 + $0x148] ss:$16 sps:$4 sm:$0xff]  }
 0x486   :  { %6944 = vst [vmem:[#allocation71_spill] sm:$0xff] %v5592_v53  ;;  %6945 = vst [vmem:[#allocation72_spill] sm:$0xff] %v5595_v43 }
 0x488   :  { %1968 = vmatpush1.bf16.msra.mxu0 %v5580_v46  ;;  %2009 = vmatpush1.bf16.msra.mxu1 %v5583_v49  ;;  %v5598_v46 = vld [vmem:[#allocation11 + $0x164] ss:$16 sps:$4 sm:$0xff]   ;;  %v5601_v49 = vld [vmem:[#allocation11 + $0x16c] ss:$16 sps:$4 sm:$0xff]  }
 0x489   :  { %1969 = vmatprep.subr.bf16.mxu0 %v5586_v51  ;;  %2010 = vmatprep.subr.bf16.mxu1 %v5589_v52  ;;  %6946 = vst [vmem:[#allocation73_spill] sm:$0xff] %v5598_v46  ;;  %6947 = vst [vmem:[#allocation74_spill] sm:$0xff] %v5601_v49  ;;  %v5604_v51 = vld [vmem:[#allocation11 + $0x160] ss:$16 sps:$4 sm:$0xff]   ;;  %v5607_v52 = vld [vmem:[#allocation11 + $0x168] ss:$16 sps:$4 sm:$0xff]  }
 0x48a   :  { %6948 = vst [vmem:[#allocation75_spill] sm:$0xff] %v5604_v51  ;;  %6949 = vst [vmem:[#allocation76_spill] sm:$0xff] %v5607_v52 }
 0x48c   :  { %1970 = vmatpush1.bf16.msra.mxu0 %v5592_v53  ;;  %2011 = vmatpush1.bf16.msra.mxu1 %v5595_v43  ;;  %v5610_v53 = vld [vmem:[#allocation11 + $0x184] ss:$16 sps:$4 sm:$0xff]   ;;  %v5613_v43 = vld [vmem:[#allocation11 + $0x18c] ss:$16 sps:$4 sm:$0xff]  }
 0x48d   :  { %1971 = vmatprep.subr.bf16.mxu0 %v5598_v46  ;;  %2012 = vmatprep.subr.bf16.mxu1 %v5601_v49  ;;  %6950 = vst [vmem:[#allocation77_spill] sm:$0xff] %v5610_v53  ;;  %6951 = vst [vmem:[#allocation78_spill] sm:$0xff] %v5613_v43  ;;  %v5616_v46 = vld [vmem:[#allocation11 + $0x180] ss:$16 sps:$4 sm:$0xff]   ;;  %v5619_v49 = vld [vmem:[#allocation11 + $0x188] ss:$16 sps:$4 sm:$0xff]  }
 0x48e   :  { %6952 = vst [vmem:[#allocation79_spill] sm:$0xff] %v5616_v46  ;;  %6953 = vst [vmem:[#allocation80_spill] sm:$0xff] %v5619_v49 }
 0x490   :  { %1972 = vmatpush1.bf16.msra.mxu0 %v5604_v51  ;;  %2013 = vmatpush1.bf16.msra.mxu1 %v5607_v52  ;;  %v5622_v51 = vld [vmem:[#allocation11 + $0x1a4] ss:$16 sps:$4 sm:$0xff]   ;;  %v5625_v52 = vld [vmem:[#allocation11 + $0x1ac] ss:$16 sps:$4 sm:$0xff]  }
 0x491   :  { %1973 = vmatprep.subr.bf16.mxu0 %v5610_v53  ;;  %2014 = vmatprep.subr.bf16.mxu1 %v5613_v43  ;;  %6954 = vst [vmem:[#allocation81_spill] sm:$0xff] %v5622_v51  ;;  %6955 = vst [vmem:[#allocation82_spill] sm:$0xff] %v5625_v52  ;;  %v5628_v53 = vld [vmem:[#allocation11 + $0x1a0] ss:$16 sps:$4 sm:$0xff]   ;;  %v5631_v43 = vld [vmem:[#allocation11 + $0x1a8] ss:$16 sps:$4 sm:$0xff]  }
 0x492   :  { %6956 = vst [vmem:[#allocation28_spill] sm:$0xff] %v5628_v53  ;;  %6957 = vst [vmem:[#allocation29_spill] sm:$0xff] %v5631_v43 }
 0x494   :  { %1974 = vmatpush1.bf16.msra.mxu0 %v5616_v46  ;;  %2015 = vmatpush1.bf16.msra.mxu1 %v5619_v49  ;;  %v5634_v46 = vld [vmem:[#allocation11 + $0x1c4] ss:$16 sps:$4 sm:$0xff]   ;;  %v5637_v49 = vld [vmem:[#allocation11 + $0x1cc] ss:$16 sps:$4 sm:$0xff]  }
 0x495   :  { %1975 = vmatprep.subr.bf16.mxu0 %v5622_v51  ;;  %2016 = vmatprep.subr.bf16.mxu1 %v5625_v52  ;;  %6958 = vst [vmem:[#allocation34_spill] sm:$0xff] %v5634_v46  ;;  %6959 = vst [vmem:[#allocation90_spill] sm:$0xff] %v5637_v49  ;;  %v5640_v51 = vld [vmem:[#allocation11 + $0x1c0] ss:$16 sps:$4 sm:$0xff]   ;;  %v5643_v52 = vld [vmem:[#allocation11 + $0x1c8] ss:$16 sps:$4 sm:$0xff]  }
 0x496   :  { %6960 = vst [vmem:[#allocation91_spill] sm:$0xff] %v5640_v51  ;;  %6961 = vst [vmem:[#allocation92_spill] sm:$0xff] %v5643_v52 }
 0x498   :  { %1976 = vmatpush1.bf16.msra.mxu0 %v5628_v53  ;;  %2017 = vmatpush1.bf16.msra.mxu1 %v5631_v43  ;;  %v5646_v53 = vld [vmem:[#allocation11 + $0x1e4] ss:$16 sps:$4 sm:$0xff]   ;;  %v5649_v43 = vld [vmem:[#allocation11 + $0x1ec] ss:$16 sps:$4 sm:$0xff]  }
 0x499   :  { %1977 = vmatprep.subr.bf16.mxu0 %v5634_v46  ;;  %2018 = vmatprep.subr.bf16.mxu1 %v5637_v49  ;;  %6962 = vst [vmem:[#allocation93_spill] sm:$0xff] %v5646_v53  ;;  %6963 = vst [vmem:[#allocation35_spill] sm:$0xff] %v5649_v43  ;;  %v5652_v46 = vld [vmem:[#allocation11 + $0x1e0] ss:$16 sps:$4 sm:$0xff]   ;;  %v5655_v49 = vld [vmem:[#allocation11 + $0x1e8] ss:$16 sps:$4 sm:$0xff]  }
 0x49a   :  { %6964 = vst [vmem:[#allocation36_spill] sm:$0xff] %v5652_v46  ;;  %6965 = vst [vmem:[#allocation37_spill] sm:$0xff] %v5655_v49 }
 0x49c   :  { %1978 = vmatpush1.bf16.msra.mxu0 %v5640_v51  ;;  %2019 = vmatpush1.bf16.msra.mxu1 %v5643_v52 }
 0x49d   :  { %1979 = vmatprep.subr.bf16.mxu0 %v5646_v53  ;;  %2020 = vmatprep.subr.bf16.mxu1 %v5649_v43 }
 0x4a0   :  { %1980 = vmatpush1.bf16.msra.mxu0 %v5652_v46  ;;  %2021 = vmatpush1.bf16.msra.mxu1 %v5655_v49 }
 0x4a1   :  { %2059 = vmatprep.subr.bf16.mxu0 %v6892_v58  ;;  %2100 = vmatprep.subr.bf16.mxu1 %v6893_v59 }
 0x516   :  { %v1761_v52 = vpop.f32.mrb[36].mxu0  ;;  %v1802_v51 = vpop.f32.mrb[36].mxu1 }
 0x517   :  { %v1762_v53 = vadd.f32 %v1761_v52, %v6894_v63  ;;  %v1763_v42 = vpop.f32.mrb[37].mxu0  ;;  %v1804_v41 = vpop.f32.mrb[37].mxu1  ;;  %v1803_v59 = vadd.f32 %v1802_v51, %v6897_v16  ;;  %v6966_v51 = vld [vmem:[#allocation94_spill] sm:$0xff]  ;;  %v6969_v16 = vld [vmem:[#allocation97_spill] sm:$0xff] }
 0x518   :  { %v1764_v43 = vadd.f32 %v1763_v42, %v6895_v6  ;;  %v1765_v40 = vpop.f32.mrb[38].mxu0  ;;  %v1806_v39 = vpop.f32.mrb[38].mxu1  ;;  %v1805_v58 = vadd.f32 %v1804_v41, %v6896_v24 }
 0x519   :  { %v3453_v38 = vmul.f32 -1.442695, %v1762_v53  ;;  %v1766_v46 = vpop.f32.mrb[39].mxu0  ;;  %v1807_v22 = vpop.f32.mrb[39].mxu1 }
 0x51a   :  { %v3454_v21 = vmul.f32 -1.442695, %v1764_v43  ;;  %v3455_v49 = vmul.f32 -1.442695, %v1805_v58 }
 0x51b   :  { %3875 = vpow2.f32 %v3453_v38 }
 0x51c   :  { %3877 = vpow2.f32 %v3454_v21 }
 0x51d   :  { %3879 = vpow2.f32 %v3455_v49  ;;  %v6967_v49 = vld [vmem:[#allocation95_spill] sm:$0xff] }
 0x51e   :  { %3881 = vtanh.f32 %v1803_v59 }
 0x525   :  { %v3876_v20 = vpop.eup %3875 }
 0x526   :  { %v3878_v19 = vpop.eup %3877  ;;  %v1812_v52 = vadd.f32 1.0, %v3876_v20 }
 0x527   :  { %v1818_v63 = vadd.f32 1.0, %v3878_v19  ;;  %v3880_v39 = vpop.eup %3879 }
 0x528   :  { %3883 = vrcp.f32 %v1812_v52  ;;  %v3882_v40 = vpop.eup %3881  ;;  %v1825_v38 = vadd.f32 1.0, %v3880_v39 }
 0x529   :  { %3885 = vrcp.f32 %v1818_v63  ;;  %v6968_v63 = vld [vmem:[#allocation96_spill] sm:$0xff] }
 0x52a   :  { %3887 = vrcp.f32 %v1825_v38 }
 0x532   :  { %v3884_v42 = vpop.eup %3883 }
 0x533   :  { %v3886_v22 = vpop.eup %3885  ;;  %v1829_v43 = vmul.f32 %v3884_v42, %v3882_v40 }
 0x534   :  { %v1828_v21 = vmul.f32 %v3886_v22, %v5423_v50 }
 0x536   :  { %v1871_v41 = vpop.f32.mrb[40].mxu0  ;;  %v1912_v46 = vpop.f32.mrb[40].mxu1  ;;  %v5665_v53 = vadd.f32 %v1829_v43, %v1828_v21 }
 0x537   :  { %v1919_v20 = vadd.f32 %v1871_v41, %v6966_v51  ;;  %v1921_v58 = vadd.f32 %v1912_v46, %v6967_v49  ;;  %v1873_v19 = vpop.f32.mrb[41].mxu0  ;;  %v1914_v59 = vpop.f32.mrb[41].mxu1 }
 0x538   :  { %v1920_v52 = vadd.f32 %v1873_v19, %v6968_v63  ;;  %v1922_v24 = vadd.f32 %v1914_v59, %v6969_v16  ;;  %v1875_v6 = vpop.f32.mrb[42].mxu0  ;;  %v1916_v40 = vpop.f32.mrb[42].mxu1  ;;  %3889 = vtanh.f32 %v5665_v53 }
 0x539   :  { %v3456_v50 = vmul.f32 -1.442695, %v1919_v20  ;;  %v1876_v39 = vpop.f32.mrb[43].mxu0  ;;  %v1917_v42 = vpop.f32.mrb[43].mxu1 }
 0x53a   :  { %v3457_v22 = vmul.f32 -1.442695, %v1920_v52  ;;  %v3888_v43 = vpop.eup %3887  ;;  %v3458_v21 = vmul.f32 -1.442695, %v1922_v24 }
 0x53b   :  { %3891 = vpow2.f32 %v3456_v50 }
 0x53c   :  { %3893 = vpow2.f32 %v3457_v22 }
 0x53d   :  { %3895 = vpow2.f32 %v3458_v21  ;;  %v7003_v21 = vld [vmem:[#allocation72_spill] sm:$0xff] }
 0x53e   :  { %3897 = vtanh.f32 %v1921_v58 }
 0x542   :  { %v3890_v38 = vpop.eup %3889 }
 0x543   :  { %v1832_v41 = vmul.f32 %v3890_v38, %v3888_v43  ;;  %v7001_v43 = vld [vmem:[#allocation70_spill] sm:$0xff]  ;;  %v7002_v38 = vld [vmem:[#allocation71_spill] sm:$0xff] }
 0x545   :  { %v3892_v46 = vpop.eup %3891  ;;  %v1948_v51 = vpack.c.bf16 %v1832_v41, %v1832_v41  ;;  %v7004_v41 = vld [vmem:[#allocation73_spill] sm:$0xff] }
 0x546   :  { %v3894_v49 = vpop.eup %3893  ;;  %v1926_v19 = vadd.f32 1.0, %v3892_v46  ;;  %v7005_v46 = vld [vmem:[#allocation74_spill] sm:$0xff] }
 0x547   :  { %v1932_v6 = vadd.f32 1.0, %v3894_v49  ;;  %1981 = vmatprep.mubr.bf16.mxu0 %v1948_v51  ;;  %2022 = vmatprep.mubr.bf16.mxu1 %v1948_v51  ;;  %v3896_v16 = vpop.eup %3895  ;;  %v7006_v51 = vld [vmem:[#allocation75_spill] sm:$0xff]  ;;  %v7007_v49 = vld [vmem:[#allocation76_spill] sm:$0xff] }
 0x548   :  { %3899 = vrcp.f32 %v1926_v19  ;;  %v3898_v20 = vpop.eup %3897  ;;  %v1939_v40 = vadd.f32 1.0, %v3896_v16  ;;  %v7008_v19 = vld [vmem:[#allocation77_spill] sm:$0xff]  ;;  %v7010_v16 = vld [vmem:[#allocation79_spill] sm:$0xff] }
 0x549   :  { %3901 = vrcp.f32 %v1932_v6  ;;  %v7009_v6 = vld [vmem:[#allocation78_spill] sm:$0xff] }
 0x54a   :  { %3903 = vrcp.f32 %v1939_v40  ;;  %v7015_v40 = vld [vmem:[#allocation29_spill] sm:$0xff] }
 0x552   :  { %v3900_v59 = vpop.eup %3899 }
 0x553   :  { %v3902_v63 = vpop.eup %3901  ;;  %v1943_v52 = vmul.f32 %v3900_v59, %v3898_v20  ;;  %v7011_v20 = vld [vmem:[#allocation80_spill] sm:$0xff]  ;;  %v7012_v59 = vld [vmem:[#allocation81_spill] sm:$0xff] }
 0x554   :  { %v1942_v24 = vmul.f32 %v3902_v63, %v5431_v47  ;;  %v3904_v39 = vpop.eup %3903  ;;  %v6991_v47 = vld [vmem:[#allocation60_spill] sm:$0xff]  ;;  %v7013_v63 = vld [vmem:[#allocation82_spill] sm:$0xff] }
 0x556   :  { %v5673_v50 = vadd.f32 %v1943_v52, %v1942_v24  ;;  %v7014_v52 = vld [vmem:[#allocation28_spill] sm:$0xff]  ;;  %v7016_v24 = vld [vmem:[#allocation34_spill] sm:$0xff] }
 0x558   :  { %3905 = vtanh.f32 %v5673_v50 }
 0x562   :  { %v3906_v58 = vpop.eup %3905 }
 0x563   :  { %v1946_v42 = vmul.f32 %v3906_v58, %v3904_v39  ;;  %v7017_v39 = vld [vmem:[#allocation90_spill] sm:$0xff]  ;;  %v7018_v58 = vld [vmem:[#allocation91_spill] sm:$0xff] }
 0x565   :  { %v1947_v22 = vpack.c.bf16 %v1946_v42, %v1946_v42  ;;  %v7019_v42 = vld [vmem:[#allocation92_spill] sm:$0xff] }
 0x567   :  { %1982 = vmatmul.mubr.bf16.vlgmr.msra.gmra.mrb[44].mxu0 %v1947_v22  ;;  %2023 = vmatmul.mubr.bf16.vlgmr.msra.gmra.mrb[44].mxu1 %v1947_v22 }
 0x568   :  { %2060 = vmatpush1.bf16.msra.mxu0 %v5258_v55  ;;  %2101 = vmatpush1.bf16.msra.mxu1 %v5261_v26  ;;  %v6970_v55 = vld [vmem:[#allocation44_spill] sm:$0xff]  ;;  %v6971_v26 = vld [vmem:[#allocation45_spill] sm:$0xff] }
 0x569   :  { %2061 = vmatprep.subr.bf16.mxu0 %v5264_v23  ;;  %2102 = vmatprep.subr.bf16.mxu1 %v5267_v35  ;;  %v6972_v23 = vld [vmem:[#allocation46_spill] sm:$0xff]  ;;  %v6973_v35 = vld [vmem:[#allocation47_spill] sm:$0xff] }
 0x56a   :  { %2091 = vmatprep.mubr.bf16.mxu0 %v6787_v45  ;;  %2132 = vmatprep.mubr.bf16.mxu1 %v6787_v45 }
 0x56c   :  { %2062 = vmatpush1.bf16.msra.mxu0 %v5272_v33  ;;  %2103 = vmatpush1.bf16.msra.mxu1 %v5275_v25  ;;  %v6974_v33 = vld [vmem:[#allocation48_spill] sm:$0xff]  ;;  %v6975_v25 = vld [vmem:[#allocation49_spill] sm:$0xff] }
 0x56d   :  { %2063 = vmatprep.subr.bf16.mxu0 %v5278_v61  ;;  %2104 = vmatprep.subr.bf16.mxu1 %v5281_v28  ;;  %v6976_v61 = vld [vmem:[#allocation50_spill] sm:$0xff]  ;;  %v6977_v28 = vld [vmem:[#allocation51_spill] sm:$0xff] }
 0x570   :  { %2064 = vmatpush1.bf16.msra.mxu0 %v5284_v30  ;;  %2105 = vmatpush1.bf16.msra.mxu1 %v5287_v3  ;;  %v6978_v30 = vld [vmem:[#allocation52_spill] sm:$0xff]  ;;  %v6979_v3 = vld [vmem:[#allocation53_spill] sm:$0xff] }
 0x571   :  { %2065 = vmatprep.subr.bf16.mxu0 %v5290_v31  ;;  %2106 = vmatprep.subr.bf16.mxu1 %v5293_v48  ;;  %v6980_v31 = vld [vmem:[#allocation54_spill] sm:$0xff]  ;;  %v6981_v48 = vld [vmem:[#allocation55_spill] sm:$0xff] }
 0x574   :  { %2066 = vmatpush1.bf16.msra.mxu0 %v5296_v37  ;;  %2107 = vmatpush1.bf16.msra.mxu1 %v5299_v27  ;;  %v6982_v37 = vld [vmem:[#allocation56_spill] sm:$0xff]  ;;  %v6983_v27 = vld [vmem:[#allocation57_spill] sm:$0xff] }
 0x575   :  { %2067 = vmatprep.subr.bf16.mxu0 %v5302_v4  ;;  %2108 = vmatprep.subr.bf16.mxu1 %v6903_v36  ;;  %v6984_v4 = vld [vmem:[#allocation58_spill] sm:$0xff]  ;;  %v6992_v36 = vld [vmem:[#allocation61_spill] sm:$0xff] }
 0x578   :  { %2068 = vmatpush1.bf16.msra.mxu0 %v6904_v54  ;;  %2109 = vmatpush1.bf16.msra.mxu1 %v6905_v57  ;;  %v6993_v54 = vld [vmem:[#allocation62_spill] sm:$0xff]  ;;  %v6994_v57 = vld [vmem:[#allocation63_spill] sm:$0xff] }
 0x579   :  { %2069 = vmatprep.subr.bf16.mxu0 %v6906_v60  ;;  %2110 = vmatprep.subr.bf16.mxu1 %v6907_v62  ;;  %v6995_v60 = vld [vmem:[#allocation64_spill] sm:$0xff]  ;;  %v6996_v62 = vld [vmem:[#allocation65_spill] sm:$0xff] }
 0x57c   :  { %2070 = vmatpush1.bf16.msra.mxu0 %v6908_v1  ;;  %2111 = vmatpush1.bf16.msra.mxu1 %v6909_v2  ;;  %v6997_v1 = vld [vmem:[#allocation66_spill] sm:$0xff]  ;;  %v6998_v2 = vld [vmem:[#allocation67_spill] sm:$0xff] }
 0x57d   :  { %2071 = vmatprep.subr.bf16.mxu0 %v6910_v5  ;;  %2112 = vmatprep.subr.bf16.mxu1 %v6911_v7  ;;  %v6999_v5 = vld [vmem:[#allocation68_spill] sm:$0xff]  ;;  %v7000_v7 = vld [vmem:[#allocation69_spill] sm:$0xff] }
 0x580   :  { %2072 = vmatpush1.bf16.msra.mxu0 %v5332_v9  ;;  %2113 = vmatpush1.bf16.msra.mxu1 %v5335_v56  ;;  %v6988_v9 = vld [vmem:[#allocation88_spill] sm:$0xff]  ;;  %v6989_v56 = vld [vmem:[#allocation89_spill] sm:$0xff] }
 0x581   :  { %2073 = vmatprep.subr.bf16.mxu0 %v5338_v32  ;;  %2114 = vmatprep.subr.bf16.mxu1 %v5341_v0  ;;  %v6985_v0 = vld [vmem:[#allocation83_spill] sm:$0xff] }
 0x582   :  { %v6990_v32 = vld [vmem:[#allocation59_spill] sm:$0xff] }
 0x584   :  { %2074 = vmatpush1.bf16.msra.mxu0 %v5344_v34  ;;  %2115 = vmatpush1.bf16.msra.mxu1 %v5347_v29  ;;  %v6986_v34 = vld [vmem:[#allocation86_spill] sm:$0xff]  ;;  %v6987_v29 = vld [vmem:[#allocation87_spill] sm:$0xff] }
 0x585   :  { %2171 = vmatprep.subr.bf16.mxu0 %v5466_v8  ;;  %2212 = vmatprep.subr.bf16.mxu1 %v5469_v10 }
 0x587   :  { %2092 = vmatmul.mubr.bf16.vlgmr.msra.gmra.mrb[48].mxu0 %v1947_v22  ;;  %2133 = vmatmul.mubr.bf16.vlgmr.msra.gmra.mrb[48].mxu1 %v1947_v22  ;;  %v7020_v22 = vld [vmem:[#allocation93_spill] sm:$0xff] }
 0x588   :  { %2172 = vmatpush1.bf16.msra.mxu0 %v5472_v11  ;;  %2213 = vmatpush1.bf16.msra.mxu1 %v5475_v12 }
 0x589   :  { %2173 = vmatprep.subr.bf16.mxu0 %v5478_v13  ;;  %2214 = vmatprep.subr.bf16.mxu1 %v5481_v44 }
 0x58c   :  { %2174 = vmatpush1.bf16.msra.mxu0 %v5484_v14  ;;  %2215 = vmatpush1.bf16.msra.mxu1 %v5487_v15 }
 0x58d   :  { %2175 = vmatprep.subr.bf16.mxu0 %v5490_v17  ;;  %2216 = vmatprep.subr.bf16.mxu1 %v5493_v18 }
 0x590   :  { %2176 = vmatpush1.bf16.msra.mxu0 %v6970_v55  ;;  %2217 = vmatpush1.bf16.msra.mxu1 %v6971_v26 }
 0x591   :  { %2177 = vmatprep.subr.bf16.mxu0 %v6972_v23  ;;  %2218 = vmatprep.subr.bf16.mxu1 %v6973_v35 }
 0x594   :  { %2178 = vmatpush1.bf16.msra.mxu0 %v6974_v33  ;;  %2219 = vmatpush1.bf16.msra.mxu1 %v6975_v25 }
 0x595   :  { %2179 = vmatprep.subr.bf16.mxu0 %v6976_v61  ;;  %2220 = vmatprep.subr.bf16.mxu1 %v6977_v28 }
 0x598   :  { %2180 = vmatpush1.bf16.msra.mxu0 %v6978_v30  ;;  %2221 = vmatpush1.bf16.msra.mxu1 %v6979_v3 }
 0x599   :  { %2181 = vmatprep.subr.bf16.mxu0 %v6980_v31  ;;  %2222 = vmatprep.subr.bf16.mxu1 %v6981_v48 }
 0x59c   :  { %2182 = vmatpush1.bf16.msra.mxu0 %v6982_v37  ;;  %2223 = vmatpush1.bf16.msra.mxu1 %v6983_v27 }
 0x59d   :  { %2183 = vmatprep.subr.bf16.mxu0 %v6984_v4  ;;  %2224 = vmatprep.subr.bf16.mxu1 %v6985_v0 }
 0x5a0   :  { %2184 = vmatpush1.bf16.msra.mxu0 %v6986_v34  ;;  %2225 = vmatpush1.bf16.msra.mxu1 %v6987_v29 }
 0x5a1   :  { %2185 = vmatprep.subr.bf16.mxu0 %v6988_v9  ;;  %2226 = vmatprep.subr.bf16.mxu1 %v6989_v56 }
 0x5a4   :  { %2186 = vmatpush1.bf16.msra.mxu0 %v6990_v32  ;;  %2227 = vmatpush1.bf16.msra.mxu1 %v6991_v47 }
 0x5a5   :  { %2187 = vmatprep.subr.bf16.mxu0 %v6992_v36  ;;  %2228 = vmatprep.subr.bf16.mxu1 %v6993_v54 }
 0x5a8   :  { %2188 = vmatpush1.bf16.msra.mxu0 %v6994_v57  ;;  %2229 = vmatpush1.bf16.msra.mxu1 %v6995_v60 }
 0x5a9   :  { %2189 = vmatprep.subr.bf16.mxu0 %v6996_v62  ;;  %2230 = vmatprep.subr.bf16.mxu1 %v6997_v1 }
 0x5ac   :  { %2190 = vmatpush1.bf16.msra.mxu0 %v6998_v2  ;;  %2231 = vmatpush1.bf16.msra.mxu1 %v6999_v5 }
 0x5ad   :  { %2191 = vmatprep.subr.bf16.mxu0 %v7000_v7  ;;  %2232 = vmatprep.subr.bf16.mxu1 %v7001_v43 }
 0x5b0   :  { %2192 = vmatpush1.bf16.msra.mxu0 %v7002_v38  ;;  %2233 = vmatpush1.bf16.msra.mxu1 %v7003_v21 }
 0x5b1   :  { %2193 = vmatprep.subr.bf16.mxu0 %v7004_v41  ;;  %2234 = vmatprep.subr.bf16.mxu1 %v7005_v46 }
 0x5b4   :  { %2194 = vmatpush1.bf16.msra.mxu0 %v7006_v51  ;;  %2235 = vmatpush1.bf16.msra.mxu1 %v7007_v49 }
 0x5b5   :  { %2195 = vmatprep.subr.bf16.mxu0 %v7008_v19  ;;  %2236 = vmatprep.subr.bf16.mxu1 %v7009_v6  ;;  %v7027_v6 = vld [vmem:[#allocation31_spill] sm:$0xff] }
 0x5b8   :  { %2196 = vmatpush1.bf16.msra.mxu0 %v7010_v16  ;;  %2237 = vmatpush1.bf16.msra.mxu1 %v7011_v20  ;;  %v7021_v16 = vld [vmem:[#allocation35_spill] sm:$0xff]  ;;  %v7022_v20 = vld [vmem:[#allocation36_spill] sm:$0xff] }
 0x5b9   :  { %2197 = vmatprep.subr.bf16.mxu0 %v7012_v59  ;;  %2238 = vmatprep.subr.bf16.mxu1 %v7013_v63  ;;  %v7023_v59 = vld [vmem:[#allocation37_spill] sm:$0xff]  ;;  %v5772_v63 = vld [vmem:[#allocation8 + $0x4] ss:$16 sps:$4 sm:$0xff]  }
 0x5ba   :  { %7024 = vst [vmem:[#allocation38_spill] sm:$0xff] %v5772_v63 }
 0x5bc   :  { %2198 = vmatpush1.bf16.msra.mxu0 %v7014_v52  ;;  %2239 = vmatpush1.bf16.msra.mxu1 %v7015_v40  ;;  %v5775_v40 = vld [vmem:[#allocation8 + $0xc] ss:$16 sps:$4 sm:$0xff]  }
 0x5bd   :  { %2199 = vmatprep.subr.bf16.mxu0 %v7016_v24  ;;  %2240 = vmatprep.subr.bf16.mxu1 %v7017_v39  ;;  %7025 = vst [vmem:[#allocation39_spill] sm:$0xff] %v5775_v40  ;;  %v7026_v24 = vld [vmem:[#allocation30_spill] sm:$0xff] }
 0x5c0   :  { %2200 = vmatpush1.bf16.msra.mxu0 %v7018_v58  ;;  %2241 = vmatpush1.bf16.msra.mxu1 %v7019_v42 }
 0x5c1   :  { %2201 = vmatprep.subr.bf16.mxu0 %v7020_v22  ;;  %2242 = vmatprep.subr.bf16.mxu1 %v7021_v16 }
 0x5c4   :  { %2202 = vmatpush1.bf16.msra.mxu0 %v7022_v20  ;;  %2243 = vmatpush1.bf16.msra.mxu1 %v7023_v59 }
 0x5c5   :  { %2281 = vmatprep.subr.bf16.mxu0 %v5772_v63  ;;  %2322 = vmatprep.subr.bf16.mxu1 %v5775_v40  ;;  %v7028_v63 = vld [vmem:[#allocation32_spill] sm:$0xff]  ;;  %v7029_v40 = vld [vmem:[#allocation33_spill] sm:$0xff] }
 0x63a   :  { %v1983_v39 = vpop.f32.mrb[44].mxu0  ;;  %v2024_v58 = vpop.f32.mrb[44].mxu1 }
 0x63b   :  { %v1984_v42 = vadd.f32 %v1983_v39, %v7026_v24  ;;  %v1985_v52 = vpop.f32.mrb[45].mxu0  ;;  %v2026_v22 = vpop.f32.mrb[45].mxu1  ;;  %v2025_v38 = vadd.f32 %v2024_v58, %v7029_v40  ;;  %v7030_v58 = vld [vmem:[#allocation98_spill] sm:$0xff]  ;;  %v7033_v40 = vld [vmem:[#allocation101_spill] sm:$0xff] }
 0x63c   :  { %v1986_v16 = vadd.f32 %v1985_v52, %v7027_v6  ;;  %v1987_v19 = vpop.f32.mrb[46].mxu0  ;;  %v2028_v20 = vpop.f32.mrb[46].mxu1  ;;  %v2027_v41 = vadd.f32 %v2026_v22, %v7028_v63 }
 0x63d   :  { %v3459_v49 = vmul.f32 -1.442695, %v1984_v42  ;;  %v1988_v59 = vpop.f32.mrb[47].mxu0  ;;  %v2029_v51 = vpop.f32.mrb[47].mxu1 }
 0x63e   :  { %v3460_v46 = vmul.f32 -1.442695, %v1986_v16  ;;  %v3461_v21 = vmul.f32 -1.442695, %v2027_v41 }
 0x63f   :  { %3907 = vpow2.f32 %v3459_v49 }
 0x640   :  { %3909 = vpow2.f32 %v3460_v46 }
 0x641   :  { %3911 = vpow2.f32 %v3461_v21  ;;  %v7031_v21 = vld [vmem:[#allocation99_spill] sm:$0xff] }
 0x642   :  { %3913 = vtanh.f32 %v2025_v38 }
 0x649   :  { %v3908_v43 = vpop.eup %3907 }
 0x64a   :  { %v3910_v7 = vpop.eup %3909  ;;  %v2034_v39 = vadd.f32 1.0, %v3908_v43 }
 0x64b   :  { %v2040_v24 = vadd.f32 1.0, %v3910_v7  ;;  %v3912_v19 = vpop.eup %3911 }
 0x64c   :  { %3915 = vrcp.f32 %v2034_v39  ;;  %v3914_v20 = vpop.eup %3913  ;;  %v2047_v49 = vadd.f32 1.0, %v3912_v19 }
 0x64d   :  { %3917 = vrcp.f32 %v2040_v24  ;;  %v7032_v24 = vld [vmem:[#allocation100_spill] sm:$0xff] }
 0x64e   :  { %3919 = vrcp.f32 %v2047_v49 }
 0x656   :  { %v3916_v59 = vpop.eup %3915 }
 0x657   :  { %v3918_v51 = vpop.eup %3917  ;;  %v2051_v16 = vmul.f32 %v3916_v59, %v3914_v20 }
 0x658   :  { %v2050_v46 = vmul.f32 %v3918_v51, %v5665_v53 }
 0x65a   :  { %v2093_v52 = vpop.f32.mrb[48].mxu0  ;;  %v2134_v41 = vpop.f32.mrb[48].mxu1  ;;  %v5783_v42 = vadd.f32 %v2051_v16, %v2050_v46 }
 0x65b   :  { %v2141_v43 = vadd.f32 %v2093_v52, %v7030_v58  ;;  %v2143_v38 = vadd.f32 %v2134_v41, %v7031_v21  ;;  %v2095_v7 = vpop.f32.mrb[49].mxu0  ;;  %v2136_v22 = vpop.f32.mrb[49].mxu1 }
 0x65c   :  { %v2142_v39 = vadd.f32 %v2095_v7, %v7032_v24  ;;  %v2144_v63 = vadd.f32 %v2136_v22, %v7033_v40  ;;  %v2097_v6 = vpop.f32.mrb[50].mxu0  ;;  %v2138_v20 = vpop.f32.mrb[50].mxu1  ;;  %3921 = vtanh.f32 %v5783_v42 }
 0x65d   :  { %v3462_v53 = vmul.f32 -1.442695, %v2141_v43  ;;  %v2098_v19 = vpop.f32.mrb[51].mxu0  ;;  %v2139_v59 = vpop.f32.mrb[51].mxu1 }
 0x65e   :  { %v3463_v51 = vmul.f32 -1.442695, %v2142_v39  ;;  %v3920_v16 = vpop.eup %3919  ;;  %v3464_v46 = vmul.f32 -1.442695, %v2144_v63 }
 0x65f   :  { %3923 = vpow2.f32 %v3462_v53 }
 0x660   :  { %3925 = vpow2.f32 %v3463_v51 }
 0x661   :  { %3927 = vpow2.f32 %v3464_v46  ;;  %v5807_v46 = vld [vmem:[#allocation8 + $0x2c] ss:$16 sps:$4 sm:$0xff]  }
 0x662   :  { %3929 = vtanh.f32 %v2143_v38 }
 0x666   :  { %v3922_v49 = vpop.eup %3921 }
 0x667   :  { %v2054_v52 = vmul.f32 %v3922_v49, %v3920_v16  ;;  %v5798_v16 = vld [vmem:[#allocation8] ss:$16 sps:$4 sm:$0xff]   ;;  %v5801_v49 = vld [vmem:[#allocation8 + $0x8] ss:$16 sps:$4 sm:$0xff]  }
 0x669   :  { %v3924_v41 = vpop.eup %3923  ;;  %v2170_v58 = vpack.c.bf16 %v2054_v52, %v2054_v52  ;;  %v5812_v52 = vld [vmem:[#allocation8 + $0x20] ss:$16 sps:$4 sm:$0xff]  }
 0x66a   :  { %v3926_v21 = vpop.eup %3925  ;;  %v2148_v7 = vadd.f32 1.0, %v3924_v41  ;;  %v5815_v41 = vld [vmem:[#allocation8 + $0x28] ss:$16 sps:$4 sm:$0xff]  }
 0x66b   :  { %v2154_v6 = vadd.f32 1.0, %v3926_v21  ;;  %2203 = vmatprep.mubr.bf16.mxu0 %v2170_v58  ;;  %2244 = vmatprep.mubr.bf16.mxu1 %v2170_v58  ;;  %v3928_v40 = vpop.eup %3927  ;;  %v5818_v58 = vld [vmem:[#allocation8 + $0x44] ss:$16 sps:$4 sm:$0xff]   ;;  %v5821_v21 = vld [vmem:[#allocation8 + $0x4c] ss:$16 sps:$4 sm:$0xff]  }
 0x66c   :  { %3931 = vrcp.f32 %v2148_v7  ;;  %v3930_v43 = vpop.eup %3929  ;;  %v2161_v20 = vadd.f32 1.0, %v3928_v40  ;;  %v5824_v7 = vld [vmem:[#allocation8 + $0x40] ss:$16 sps:$4 sm:$0xff]   ;;  %v5830_v40 = vld [vmem:[#allocation8 + $0x64] ss:$16 sps:$4 sm:$0xff]  }
 0x66d   :  { %3933 = vrcp.f32 %v2154_v6  ;;  %v5827_v6 = vld [vmem:[#allocation8 + $0x48] ss:$16 sps:$4 sm:$0xff]  }
 0x66e   :  { %3935 = vrcp.f32 %v2161_v20  ;;  %v5845_v20 = vld [vmem:[#allocation8 + $0x8c] ss:$16 sps:$4 sm:$0xff]  }
 0x66f   :  { %7035 = vst [vmem:[#allocation41_spill] sm:$0xff] %v5845_v20 }
 0x676   :  { %v3932_v22 = vpop.eup %3931 }
 0x677   :  { %v3934_v24 = vpop.eup %3933  ;;  %v2165_v39 = vmul.f32 %v3932_v22, %v3930_v43  ;;  %v5833_v43 = vld [vmem:[#allocation8 + $0x6c] ss:$16 sps:$4 sm:$0xff]   ;;  %v5836_v22 = vld [vmem:[#allocation8 + $0x60] ss:$16 sps:$4 sm:$0xff]  }
 0x678   :  { %v2164_v63 = vmul.f32 %v3934_v24, %v5673_v50  ;;  %v3936_v19 = vpop.eup %3935  ;;  %v5804_v50 = vld [vmem:[#allocation8 + $0x24] ss:$16 sps:$4 sm:$0xff]   ;;  %v5839_v24 = vld [vmem:[#allocation8 + $0x68] ss:$16 sps:$4 sm:$0xff]  }
 0x67a   :  { %v5791_v53 = vadd.f32 %v2165_v39, %v2164_v63  ;;  %v5842_v39 = vld [vmem:[#allocation8 + $0x84] ss:$16 sps:$4 sm:$0xff]   ;;  %v5848_v63 = vld [vmem:[#allocation8 + $0x80] ss:$16 sps:$4 sm:$0xff]  }
 0x67b   :  { %7034 = vst [vmem:[#allocation40_spill] sm:$0xff] %v5842_v39  ;;  %7036 = vst [vmem:[#allocation42_spill] sm:$0xff] %v5848_v63 }
 0x67c   :  { %3937 = vtanh.f32 %v5791_v53 }
 0x686   :  { %v3938_v38 = vpop.eup %3937 }
 0x687   :  { %v2168_v59 = vmul.f32 %v3938_v38, %v3936_v19  ;;  %v5851_v19 = vld [vmem:[#allocation8 + $0x88] ss:$16 sps:$4 sm:$0xff]   ;;  %v5854_v38 = vld [vmem:[#allocation8 + $0xa4] ss:$16 sps:$4 sm:$0xff]  }
 0x688   :  { %7037 = vst [vmem:[#allocation43_spill] sm:$0xff] %v5851_v19  ;;  %7038 = vst [vmem:[#allocation94_spill] sm:$0xff] %v5854_v38 }
 0x689   :  { %v5794_v51 = vpack.c.bf16 %v2168_v59, %v2168_v59  ;;  %v5857_v59 = vld [vmem:[#allocation8 + $0xac] ss:$16 sps:$4 sm:$0xff]  }
 0x68a   :  { %7039 = vst [vmem:[#allocation95_spill] sm:$0xff] %v5857_v59 }
 0x68b   :  { %2204 = vmatmul.mubr.bf16.vlgmr.msra.gmra.mrb[52].mxu0 %v5794_v51  ;;  %2245 = vmatmul.mubr.bf16.vlgmr.msra.gmra.mrb[52].mxu1 %v5794_v51 }
 0x68c   :  { %2282 = vmatpush1.bf16.msra.mxu0 %v5798_v16  ;;  %2323 = vmatpush1.bf16.msra.mxu1 %v5801_v49 }
 0x68d   :  { %2283 = vmatprep.subr.bf16.mxu0 %v5804_v50  ;;  %2324 = vmatprep.subr.bf16.mxu1 %v5807_v46 }
 0x68e   :  { %2313 = vmatprep.mubr.bf16.mxu0 %v6787_v45  ;;  %2354 = vmatprep.mubr.bf16.mxu1 %v6787_v45 }
 0x690   :  { %2284 = vmatpush1.bf16.msra.mxu0 %v5812_v52  ;;  %2325 = vmatpush1.bf16.msra.mxu1 %v5815_v41 }
 0x691   :  { %2285 = vmatprep.subr.bf16.mxu0 %v5818_v58  ;;  %2326 = vmatprep.subr.bf16.mxu1 %v5821_v21 }
 0x694   :  { %2286 = vmatpush1.bf16.msra.mxu0 %v5824_v7  ;;  %2327 = vmatpush1.bf16.msra.mxu1 %v5827_v6 }
 0x695   :  { %2287 = vmatprep.subr.bf16.mxu0 %v5830_v40  ;;  %2328 = vmatprep.subr.bf16.mxu1 %v5833_v43 }
 0x698   :  { %2288 = vmatpush1.bf16.msra.mxu0 %v5836_v22  ;;  %2329 = vmatpush1.bf16.msra.mxu1 %v5839_v24 }
 0x699   :  { %2289 = vmatprep.subr.bf16.mxu0 %v5842_v39  ;;  %2330 = vmatprep.subr.bf16.mxu1 %v5845_v20  ;;  %v5860_v39 = vld [vmem:[#allocation8 + $0xa0] ss:$16 sps:$4 sm:$0xff]   ;;  %v5863_v20 = vld [vmem:[#allocation8 + $0xa8] ss:$16 sps:$4 sm:$0xff]  }
 0x69a   :  { %7040 = vst [vmem:[#allocation96_spill] sm:$0xff] %v5860_v39  ;;  %7041 = vst [vmem:[#allocation97_spill] sm:$0xff] %v5863_v20 }
 0x69c   :  { %2290 = vmatpush1.bf16.msra.mxu0 %v5848_v63  ;;  %2331 = vmatpush1.bf16.msra.mxu1 %v5851_v19  ;;  %v5866_v63 = vld [vmem:[#allocation8 + $0xc4] ss:$16 sps:$4 sm:$0xff]   ;;  %v5869_v19 = vld [vmem:[#allocation8 + $0xcc] ss:$16 sps:$4 sm:$0xff]  }
 0x69d   :  { %2291 = vmatprep.subr.bf16.mxu0 %v5854_v38  ;;  %2332 = vmatprep.subr.bf16.mxu1 %v5857_v59  ;;  %7042 = vst [vmem:[#allocation44_spill] sm:$0xff] %v5866_v63  ;;  %7043 = vst [vmem:[#allocation45_spill] sm:$0xff] %v5869_v19  ;;  %v5872_v38 = vld [vmem:[#allocation8 + $0xc0] ss:$16 sps:$4 sm:$0xff]   ;;  %v5875_v59 = vld [vmem:[#allocation8 + $0xc8] ss:$16 sps:$4 sm:$0xff]  }
 0x6a0   :  { %2292 = vmatpush1.bf16.msra.mxu0 %v5860_v39  ;;  %2333 = vmatpush1.bf16.msra.mxu1 %v5863_v20  ;;  %v5878_v39 = vld [vmem:[#allocation8 + $0xe4] ss:$16 sps:$4 sm:$0xff]   ;;  %v5881_v20 = vld [vmem:[#allocation8 + $0xec] ss:$16 sps:$4 sm:$0xff]  }
 0x6a1   :  { %2293 = vmatprep.subr.bf16.mxu0 %v5866_v63  ;;  %2334 = vmatprep.subr.bf16.mxu1 %v5869_v19  ;;  %v5884_v63 = vld [vmem:[#allocation8 + $0xe0] ss:$16 sps:$4 sm:$0xff]   ;;  %v5887_v19 = vld [vmem:[#allocation8 + $0xe8] ss:$16 sps:$4 sm:$0xff]  }
 0x6a4   :  { %2294 = vmatpush1.bf16.msra.mxu0 %v5872_v38  ;;  %2335 = vmatpush1.bf16.msra.mxu1 %v5875_v59 }
 0x6a5   :  { %2295 = vmatprep.subr.bf16.mxu0 %v5878_v39  ;;  %2336 = vmatprep.subr.bf16.mxu1 %v5881_v20 }
 0x6a8   :  { %2296 = vmatpush1.bf16.msra.mxu0 %v5884_v63  ;;  %2337 = vmatpush1.bf16.msra.mxu1 %v5887_v19 }
 0x6a9   :  { %2393 = vmatprep.subr.bf16.mxu0 %v5466_v8  ;;  %2434 = vmatprep.subr.bf16.mxu1 %v5469_v10  ;;  %v7044_v8 = vld [vmem:[#allocation69_spill] sm:$0xff]  ;;  %v7045_v10 = vld [vmem:[#allocation70_spill] sm:$0xff] }
 0x6ab   :  { %2314 = vmatmul.mubr.bf16.vlgmr.msra.gmra.mrb[56].mxu0 %v5794_v51  ;;  %2355 = vmatmul.mubr.bf16.vlgmr.msra.gmra.mrb[56].mxu1 %v5794_v51  ;;  %v7072_v51 = vld [vmem:[#allocation32_spill] sm:$0xff] }
 0x6ac   :  { %2394 = vmatpush1.bf16.msra.mxu0 %v5472_v11  ;;  %2435 = vmatpush1.bf16.msra.mxu1 %v5475_v12  ;;  %v7046_v11 = vld [vmem:[#allocation71_spill] sm:$0xff]  ;;  %v7047_v12 = vld [vmem:[#allocation72_spill] sm:$0xff] }
 0x6ad   :  { %2395 = vmatprep.subr.bf16.mxu0 %v5478_v13  ;;  %2436 = vmatprep.subr.bf16.mxu1 %v5481_v44  ;;  %v7048_v13 = vld [vmem:[#allocation73_spill] sm:$0xff]  ;;  %v7049_v44 = vld [vmem:[#allocation74_spill] sm:$0xff] }
 0x6b0   :  { %2396 = vmatpush1.bf16.msra.mxu0 %v5484_v14  ;;  %2437 = vmatpush1.bf16.msra.mxu1 %v5487_v15  ;;  %v7050_v14 = vld [vmem:[#allocation75_spill] sm:$0xff]  ;;  %v7051_v15 = vld [vmem:[#allocation76_spill] sm:$0xff] }
 0x6b1   :  { %2397 = vmatprep.subr.bf16.mxu0 %v5490_v17  ;;  %2438 = vmatprep.subr.bf16.mxu1 %v5493_v18  ;;  %v7052_v17 = vld [vmem:[#allocation77_spill] sm:$0xff]  ;;  %v7053_v18 = vld [vmem:[#allocation78_spill] sm:$0xff] }
 0x6b4   :  { %2398 = vmatpush1.bf16.msra.mxu0 %v6970_v55  ;;  %2439 = vmatpush1.bf16.msra.mxu1 %v6971_v26  ;;  %v7054_v55 = vld [vmem:[#allocation79_spill] sm:$0xff]  ;;  %v7055_v26 = vld [vmem:[#allocation80_spill] sm:$0xff] }
 0x6b5   :  { %2399 = vmatprep.subr.bf16.mxu0 %v6972_v23  ;;  %2440 = vmatprep.subr.bf16.mxu1 %v6973_v35  ;;  %v7056_v23 = vld [vmem:[#allocation81_spill] sm:$0xff]  ;;  %v7057_v35 = vld [vmem:[#allocation82_spill] sm:$0xff] }
 0x6b8   :  { %2400 = vmatpush1.bf16.msra.mxu0 %v6974_v33  ;;  %2441 = vmatpush1.bf16.msra.mxu1 %v6975_v25  ;;  %v7058_v33 = vld [vmem:[#allocation28_spill] sm:$0xff]  ;;  %v7059_v25 = vld [vmem:[#allocation29_spill] sm:$0xff] }
 0x6b9   :  { %2401 = vmatprep.subr.bf16.mxu0 %v6976_v61  ;;  %2442 = vmatprep.subr.bf16.mxu1 %v6977_v28  ;;  %v7060_v61 = vld [vmem:[#allocation34_spill] sm:$0xff] }
 0x6ba   :  { %v7061_v28 = vld [vmem:[#allocation90_spill] sm:$0xff] }
 0x6bc   :  { %2402 = vmatpush1.bf16.msra.mxu0 %v6978_v30  ;;  %2443 = vmatpush1.bf16.msra.mxu1 %v6979_v3  ;;  %v7062_v30 = vld [vmem:[#allocation91_spill] sm:$0xff]  ;;  %v7063_v3 = vld [vmem:[#allocation92_spill] sm:$0xff] }
 0x6bd   :  { %2403 = vmatprep.subr.bf16.mxu0 %v6980_v31  ;;  %2444 = vmatprep.subr.bf16.mxu1 %v6981_v48  ;;  %v7064_v31 = vld [vmem:[#allocation93_spill] sm:$0xff]  ;;  %v7065_v48 = vld [vmem:[#allocation35_spill] sm:$0xff] }
 0x6c0   :  { %2404 = vmatpush1.bf16.msra.mxu0 %v6982_v37  ;;  %2445 = vmatpush1.bf16.msra.mxu1 %v6983_v27  ;;  %v7066_v37 = vld [vmem:[#allocation36_spill] sm:$0xff]  ;;  %v7067_v27 = vld [vmem:[#allocation37_spill] sm:$0xff] }
 0x6c1   :  { %2405 = vmatprep.subr.bf16.mxu0 %v6984_v4  ;;  %2446 = vmatprep.subr.bf16.mxu1 %v6985_v0  ;;  %v7068_v4 = vld [vmem:[#allocation38_spill] sm:$0xff]  ;;  %v7069_v0 = vld [vmem:[#allocation39_spill] sm:$0xff] }
 0x6c4   :  { %2406 = vmatpush1.bf16.msra.mxu0 %v6986_v34  ;;  %2447 = vmatpush1.bf16.msra.mxu1 %v6987_v29 }
 0x6c5   :  { %2407 = vmatprep.subr.bf16.mxu0 %v6988_v9  ;;  %2448 = vmatprep.subr.bf16.mxu1 %v6989_v56  ;;  %v7070_v9 = vld [vmem:[#allocation30_spill] sm:$0xff] }
 0x6c8   :  { %2408 = vmatpush1.bf16.msra.mxu0 %v6990_v32  ;;  %2449 = vmatpush1.bf16.msra.mxu1 %v6991_v47 }
 0x6c9   :  { %2409 = vmatprep.subr.bf16.mxu0 %v6992_v36  ;;  %2450 = vmatprep.subr.bf16.mxu1 %v6993_v54  ;;  %v7071_v36 = vld [vmem:[#allocation31_spill] sm:$0xff] }
 0x6cc   :  { %2410 = vmatpush1.bf16.msra.mxu0 %v6994_v57  ;;  %2451 = vmatpush1.bf16.msra.mxu1 %v6995_v60 }
 0x6cd   :  { %2411 = vmatprep.subr.bf16.mxu0 %v6996_v62  ;;  %2452 = vmatprep.subr.bf16.mxu1 %v6997_v1 }
 0x6d0   :  { %2412 = vmatpush1.bf16.msra.mxu0 %v6998_v2  ;;  %2453 = vmatpush1.bf16.msra.mxu1 %v6999_v5 }
 0x6d1   :  { %2413 = vmatprep.subr.bf16.mxu0 %v7044_v8  ;;  %2454 = vmatprep.subr.bf16.mxu1 %v7045_v10 }
 0x6d4   :  { %2414 = vmatpush1.bf16.msra.mxu0 %v7046_v11  ;;  %2455 = vmatpush1.bf16.msra.mxu1 %v7047_v12  ;;  %v7073_v11 = vld [vmem:[#allocation33_spill] sm:$0xff] }
 0x6d5   :  { %2415 = vmatprep.subr.bf16.mxu0 %v7048_v13  ;;  %2456 = vmatprep.subr.bf16.mxu1 %v7049_v44 }
 0x6d8   :  { %2416 = vmatpush1.bf16.msra.mxu0 %v7050_v14  ;;  %2457 = vmatpush1.bf16.msra.mxu1 %v7051_v15 }
 0x6d9   :  { %2417 = vmatprep.subr.bf16.mxu0 %v7052_v17  ;;  %2458 = vmatprep.subr.bf16.mxu1 %v7053_v18 }
 0x6dc   :  { %2418 = vmatpush1.bf16.msra.mxu0 %v7054_v55  ;;  %2459 = vmatpush1.bf16.msra.mxu1 %v7055_v26 }
 0x6dd   :  { %2419 = vmatprep.subr.bf16.mxu0 %v7056_v23  ;;  %2460 = vmatprep.subr.bf16.mxu1 %v7057_v35 }
 0x6e0   :  { %2420 = vmatpush1.bf16.msra.mxu0 %v7058_v33  ;;  %2461 = vmatpush1.bf16.msra.mxu1 %v7059_v25 }
 0x6e1   :  { %2421 = vmatprep.subr.bf16.mxu0 %v7060_v61  ;;  %2462 = vmatprep.subr.bf16.mxu1 %v7061_v28 }
 0x6e4   :  { %2422 = vmatpush1.bf16.msra.mxu0 %v7062_v30  ;;  %2463 = vmatpush1.bf16.msra.mxu1 %v7063_v3  ;;  %v7074_v30 = vld [vmem:[#allocation102_spill] sm:$0xff] }
 0x6e5   :  { %2423 = vmatprep.subr.bf16.mxu0 %v7064_v31  ;;  %2464 = vmatprep.subr.bf16.mxu1 %v7065_v48  ;;  %v7075_v31 = vld [vmem:[#allocation103_spill] sm:$0xff] }
 0x6e8   :  { %2424 = vmatpush1.bf16.msra.mxu0 %v7066_v37  ;;  %2465 = vmatpush1.bf16.msra.mxu1 %v7067_v27 }
 0x6e9   :  { %2503 = vmatprep.subr.bf16.mxu0 %v7068_v4  ;;  %2544 = vmatprep.subr.bf16.mxu1 %v7069_v0 }
 0x75e   :  { %v2205_v34 = vpop.f32.mrb[52].mxu0  ;;  %v2246_v29 = vpop.f32.mrb[52].mxu1 }
 0x75f   :  { %v2206_v56 = vadd.f32 %v2205_v34, %v7070_v9  ;;  %v2207_v32 = vpop.f32.mrb[53].mxu0  ;;  %v2248_v47 = vpop.f32.mrb[53].mxu1  ;;  %v2247_v12 = vadd.f32 %v2246_v29, %v7073_v11  ;;  %v7076_v34 = vld [vmem:[#allocation104_spill] sm:$0xff] }
 0x760   :  { %v2208_v54 = vadd.f32 %v2207_v32, %v7071_v36  ;;  %v2209_v57 = vpop.f32.mrb[54].mxu0  ;;  %v2250_v60 = vpop.f32.mrb[54].mxu1  ;;  %v2249_v8 = vadd.f32 %v2248_v47, %v7072_v51 }
 0x761   :  { %v3465_v62 = vmul.f32 -1.442695, %v2206_v56  ;;  %v2210_v1 = vpop.f32.mrb[55].mxu0  ;;  %v2251_v2 = vpop.f32.mrb[55].mxu1  ;;  %v7077_v56 = vld [vmem:[#allocation105_spill] sm:$0xff] }
 0x762   :  { %v3466_v5 = vmul.f32 -1.442695, %v2208_v54  ;;  %v3467_v10 = vmul.f32 -1.442695, %v2249_v8 }
 0x763   :  { %3939 = vpow2.f32 %v3465_v62 }
 0x764   :  { %3941 = vpow2.f32 %v3466_v5 }
 0x765   :  { %3943 = vpow2.f32 %v3467_v10 }
 0x766   :  { %3945 = vtanh.f32 %v2247_v12 }
 0x76d   :  { %v3940_v13 = vpop.eup %3939 }
 0x76e   :  { %v3942_v44 = vpop.eup %3941  ;;  %v2256_v14 = vadd.f32 1.0, %v3940_v13 }
 0x76f   :  { %v2262_v15 = vadd.f32 1.0, %v3942_v44  ;;  %v3944_v17 = vpop.eup %3943 }
 0x770   :  { %3947 = vrcp.f32 %v2256_v14  ;;  %v3946_v18 = vpop.eup %3945  ;;  %v2269_v35 = vadd.f32 1.0, %v3944_v17 }
 0x771   :  { %3949 = vrcp.f32 %v2262_v15 }
 0x772   :  { %3951 = vrcp.f32 %v2269_v35 }
 0x77a   :  { %v3948_v55 = vpop.eup %3947 }
 0x77b   :  { %v3950_v26 = vpop.eup %3949  ;;  %v2273_v23 = vmul.f32 %v3948_v55, %v3946_v18 }
 0x77c   :  { %v2272_v33 = vmul.f32 %v3950_v26, %v5783_v42  ;;  %v3952_v1 = vpop.eup %3951 }
 0x77e   :  { %v2315_v25 = vpop.f32.mrb[56].mxu0  ;;  %v2356_v61 = vpop.f32.mrb[56].mxu1  ;;  %v5963_v28 = vadd.f32 %v2273_v23, %v2272_v33 }
 0x77f   :  { %v2363_v3 = vadd.f32 %v2315_v25, %v7074_v30  ;;  %v2365_v48 = vadd.f32 %v2356_v61, %v7075_v31  ;;  %v2317_v37 = vpop.f32.mrb[57].mxu0  ;;  %v2358_v27 = vpop.f32.mrb[57].mxu1  ;;  %v7079_v31 = vld [vmem:[#allocation41_spill] sm:$0xff] }
 0x780   :  { %v2364_v29 = vadd.f32 %v2317_v37, %v7076_v34  ;;  %v2366_v32 = vadd.f32 %v2358_v27, %v7077_v56  ;;  %v2319_v47 = vpop.f32.mrb[58].mxu0  ;;  %v2360_v54 = vpop.f32.mrb[58].mxu1  ;;  %3953 = vtanh.f32 %v5963_v28  ;;  %v7081_v37 = vld [vmem:[#allocation43_spill] sm:$0xff]  ;;  %v7082_v27 = vld [vmem:[#allocation94_spill] sm:$0xff]  ;;  %v7085_v56 = vld [vmem:[#allocation97_spill] sm:$0xff] }
 0x781   :  { %v3468_v42 = vmul.f32 -1.442695, %v2363_v3  ;;  %v2320_v57 = vpop.f32.mrb[59].mxu0  ;;  %v2361_v60 = vpop.f32.mrb[59].mxu1  ;;  %v7083_v34 = vld [vmem:[#allocation95_spill] sm:$0xff]  ;;  %v7087_v47 = vld [vmem:[#allocation45_spill] sm:$0xff] }
 0x782   :  { %v3469_v62 = vmul.f32 -1.442695, %v2364_v29  ;;  %v3470_v5 = vmul.f32 -1.442695, %v2366_v32  ;;  %v7084_v29 = vld [vmem:[#allocation96_spill] sm:$0xff] }
 0x783   :  { %3955 = vpow2.f32 %v3468_v42  ;;  %v7086_v32 = vld [vmem:[#allocation44_spill] sm:$0xff]  ;;  %v6009_v42 = vld [vmem:[#allocation11 + $0xc] ss:$16 sps:$4 sm:$0xff]   ;;  %v6015_v60 = vld [vmem:[#allocation11 + $0x8] ss:$16 sps:$4 sm:$0xff]  }
 0x784   :  { %3957 = vpow2.f32 %v3469_v62  ;;  %v6006_v54 = vld [vmem:[#allocation11 + $0x4] ss:$16 sps:$4 sm:$0xff]   ;;  %v6012_v57 = vld [vmem:[#allocation11] ss:$16 sps:$4 sm:$0xff]  }
 0x785   :  { %3959 = vpow2.f32 %v3470_v5  ;;  %v6018_v62 = vld [vmem:[#allocation11 + $0x24] ss:$16 sps:$4 sm:$0xff]   ;;  %v6027_v5 = vld [vmem:[#allocation11 + $0x28] ss:$16 sps:$4 sm:$0xff]  }
 0x786   :  { %3961 = vtanh.f32 %v2365_v48  ;;  %v7080_v48 = vld [vmem:[#allocation42_spill] sm:$0xff] }
 0x78a   :  { %v3954_v2 = vpop.eup %3953 }
 0x78b   :  { %v2276_v8 = vmul.f32 %v3954_v2, %v3952_v1  ;;  %v6021_v1 = vld [vmem:[#allocation11 + $0x2c] ss:$16 sps:$4 sm:$0xff]   ;;  %v6024_v2 = vld [vmem:[#allocation11 + $0x20] ss:$16 sps:$4 sm:$0xff]  }
 0x78d   :  { %v3956_v10 = vpop.eup %3955  ;;  %v2392_v12 = vpack.c.bf16 %v2276_v8, %v2276_v8  ;;  %v6030_v8 = vld [vmem:[#allocation11 + $0x44] ss:$16 sps:$4 sm:$0xff]  }
 0x78e   :  { %v3958_v13 = vpop.eup %3957  ;;  %v2370_v44 = vadd.f32 1.0, %v3956_v10  ;;  %v6033_v10 = vld [vmem:[#allocation11 + $0x4c] ss:$16 sps:$4 sm:$0xff]  }
 0x78f   :  { %v2376_v14 = vadd.f32 1.0, %v3958_v13  ;;  %2425 = vmatprep.mubr.bf16.mxu0 %v2392_v12  ;;  %2466 = vmatprep.mubr.bf16.mxu1 %v2392_v12  ;;  %v3960_v15 = vpop.eup %3959  ;;  %v6036_v12 = vld [vmem:[#allocation11 + $0x40] ss:$16 sps:$4 sm:$0xff]   ;;  %v6039_v13 = vld [vmem:[#allocation11 + $0x48] ss:$16 sps:$4 sm:$0xff]  }
 0x790   :  { %3963 = vrcp.f32 %v2370_v44  ;;  %v3962_v17 = vpop.eup %3961  ;;  %v2383_v23 = vadd.f32 1.0, %v3960_v15  ;;  %7088 = vst [vmem:[#allocation46_spill] sm:$0xff] %v6036_v12  ;;  %7089 = vst [vmem:[#allocation47_spill] sm:$0xff] %v6039_v13  ;;  %v6042_v44 = vld [vmem:[#allocation11 + $0x64] ss:$16 sps:$4 sm:$0xff]  }
 0x791   :  { %3965 = vrcp.f32 %v2376_v14  ;;  %7090 = vst [vmem:[#allocation48_spill] sm:$0xff] %v6042_v44  ;;  %v6045_v14 = vld [vmem:[#allocation11 + $0x6c] ss:$16 sps:$4 sm:$0xff]   ;;  %v6048_v15 = vld [vmem:[#allocation11 + $0x60] ss:$16 sps:$4 sm:$0xff]  }
 0x792   :  { %3967 = vrcp.f32 %v2383_v23  ;;  %7091 = vst [vmem:[#allocation49_spill] sm:$0xff] %v6045_v14  ;;  %7092 = vst [vmem:[#allocation50_spill] sm:$0xff] %v6048_v15  ;;  %v6063_v23 = vld [vmem:[#allocation11 + $0x88] ss:$16 sps:$4 sm:$0xff]  }
 0x793   :  { %7097 = vst [vmem:[#allocation55_spill] sm:$0xff] %v6063_v23 }
 0x79a   :  { %v3964_v18 = vpop.eup %3963 }
 0x79b   :  { %v3966_v55 = vpop.eup %3965  ;;  %v2387_v26 = vmul.f32 %v3964_v18, %v3962_v17  ;;  %v6051_v17 = vld [vmem:[#allocation11 + $0x68] ss:$16 sps:$4 sm:$0xff]   ;;  %v6054_v18 = vld [vmem:[#allocation11 + $0x84] ss:$16 sps:$4 sm:$0xff]  }
 0x79c   :  { %v2386_v35 = vmul.f32 %v3966_v55, %v5791_v53  ;;  %v3968_v25 = vpop.eup %3967  ;;  %v7078_v53 = vld [vmem:[#allocation40_spill] sm:$0xff]  ;;  %7093 = vst [vmem:[#allocation51_spill] sm:$0xff] %v6051_v17  ;;  %7094 = vst [vmem:[#allocation52_spill] sm:$0xff] %v6054_v18  ;;  %v6057_v55 = vld [vmem:[#allocation11 + $0x8c] ss:$16 sps:$4 sm:$0xff]  }
 0x79d   :  { %7095 = vst [vmem:[#allocation53_spill] sm:$0xff] %v6057_v55 }
 0x79e   :  { %v5971_v33 = vadd.f32 %v2387_v26, %v2386_v35  ;;  %v6060_v26 = vld [vmem:[#allocation11 + $0x80] ss:$16 sps:$4 sm:$0xff]   ;;  %v6066_v35 = vld [vmem:[#allocation11 + $0xa4] ss:$16 sps:$4 sm:$0xff]  }
 0x79f   :  { %7096 = vst [vmem:[#allocation54_spill] sm:$0xff] %v6060_v26  ;;  %7098 = vst [vmem:[#allocation56_spill] sm:$0xff] %v6066_v35 }
 0x7a0   :  { %3969 = vtanh.f32 %v5971_v33 }
 0x7aa   :  { %v3970_v61 = vpop.eup %3969 }
 0x7ab   :  { %v2390_v30 = vmul.f32 %v3970_v61, %v3968_v25  ;;  %v6069_v25 = vld [vmem:[#allocation11 + $0xac] ss:$16 sps:$4 sm:$0xff]   ;;  %v6072_v61 = vld [vmem:[#allocation11 + $0xa0] ss:$16 sps:$4 sm:$0xff]  }
 0x7ac   :  { %7099 = vst [vmem:[#allocation57_spill] sm:$0xff] %v6069_v25  ;;  %7100 = vst [vmem:[#allocation58_spill] sm:$0xff] %v6072_v61 }
 0x7ad   :  { %v2391_v3 = vpack.c.bf16 %v2390_v30, %v2390_v30  ;;  %v6075_v30 = vld [vmem:[#allocation11 + $0xa8] ss:$16 sps:$4 sm:$0xff]  }
 0x7ae   :  { %7101 = vst [vmem:[#allocation83_spill] sm:$0xff] %v6075_v30 }
 0x7af   :  { %2426 = vmatmul.mubr.bf16.vlgmr.msra.gmra.mrb[60].mxu0 %v2391_v3  ;;  %2467 = vmatmul.mubr.bf16.vlgmr.msra.gmra.mrb[60].mxu1 %v2391_v3 }
 0x7b0   :  { %2504 = vmatpush1.bf16.msra.mxu0 %v5798_v16  ;;  %2545 = vmatpush1.bf16.msra.mxu1 %v5801_v49 }
 0x7b1   :  { %2505 = vmatprep.subr.bf16.mxu0 %v5804_v50  ;;  %2546 = vmatprep.subr.bf16.mxu1 %v5807_v46 }
 0x7b2   :  { %2535 = vmatprep.mubr.bf16.mxu0 %v6787_v45  ;;  %2576 = vmatprep.mubr.bf16.mxu1 %v6787_v45 }
 0x7b4   :  { %2506 = vmatpush1.bf16.msra.mxu0 %v5812_v52  ;;  %2547 = vmatpush1.bf16.msra.mxu1 %v5815_v41 }
 0x7b5   :  { %2507 = vmatprep.subr.bf16.mxu0 %v5818_v58  ;;  %2548 = vmatprep.subr.bf16.mxu1 %v5821_v21 }
 0x7b8   :  { %2508 = vmatpush1.bf16.msra.mxu0 %v5824_v7  ;;  %2549 = vmatpush1.bf16.msra.mxu1 %v5827_v6 }
 0x7b9   :  { %2509 = vmatprep.subr.bf16.mxu0 %v5830_v40  ;;  %2550 = vmatprep.subr.bf16.mxu1 %v5833_v43 }
 0x7bc   :  { %2510 = vmatpush1.bf16.msra.mxu0 %v5836_v22  ;;  %2551 = vmatpush1.bf16.msra.mxu1 %v5839_v24 }
 0x7bd   :  { %2511 = vmatprep.subr.bf16.mxu0 %v7078_v53  ;;  %2552 = vmatprep.subr.bf16.mxu1 %v7079_v31 }
 0x7c0   :  { %2512 = vmatpush1.bf16.msra.mxu0 %v7080_v48  ;;  %2553 = vmatpush1.bf16.msra.mxu1 %v7081_v37 }
 0x7c1   :  { %2513 = vmatprep.subr.bf16.mxu0 %v7082_v27  ;;  %2554 = vmatprep.subr.bf16.mxu1 %v7083_v34 }
 0x7c4   :  { %2514 = vmatpush1.bf16.msra.mxu0 %v7084_v29  ;;  %2555 = vmatpush1.bf16.msra.mxu1 %v7085_v56 }
 0x7c5   :  { %2515 = vmatprep.subr.bf16.mxu0 %v7086_v32  ;;  %2556 = vmatprep.subr.bf16.mxu1 %v7087_v47 }
 0x7c8   :  { %2516 = vmatpush1.bf16.msra.mxu0 %v5872_v38  ;;  %2557 = vmatpush1.bf16.msra.mxu1 %v5875_v59 }
 0x7c9   :  { %2517 = vmatprep.subr.bf16.mxu0 %v5878_v39  ;;  %2558 = vmatprep.subr.bf16.mxu1 %v5881_v20 }
 0x7cc   :  { %2518 = vmatpush1.bf16.msra.mxu0 %v5884_v63  ;;  %2559 = vmatpush1.bf16.msra.mxu1 %v5887_v19 }
 0x7cd   :  { %2615 = vmatprep.subr.bf16.mxu0 %v6006_v54  ;;  %2656 = vmatprep.subr.bf16.mxu1 %v6009_v42 }
 0x7cf   :  { %2536 = vmatmul.mubr.bf16.vlgmr.msra.gmra.mrb[64].mxu0 %v2391_v3  ;;  %2577 = vmatmul.mubr.bf16.vlgmr.msra.gmra.mrb[64].mxu1 %v2391_v3  ;;  %v6078_v3 = vld [vmem:[#allocation11 + $0xc4] ss:$16 sps:$4 sm:$0xff]  }
 0x7d0   :  { %2616 = vmatpush1.bf16.msra.mxu0 %v6012_v57  ;;  %2657 = vmatpush1.bf16.msra.mxu1 %v6015_v60  ;;  %7102 = vst [vmem:[#allocation86_spill] sm:$0xff] %v6078_v3 }
 0x7d1   :  { %2617 = vmatprep.subr.bf16.mxu0 %v6018_v62  ;;  %2658 = vmatprep.subr.bf16.mxu1 %v6021_v1 }
 0x7d4   :  { %2618 = vmatpush1.bf16.msra.mxu0 %v6024_v2  ;;  %2659 = vmatpush1.bf16.msra.mxu1 %v6027_v5 }
 0x7d5   :  { %2619 = vmatprep.subr.bf16.mxu0 %v6030_v8  ;;  %2660 = vmatprep.subr.bf16.mxu1 %v6033_v10 }
 0x7d8   :  { %2620 = vmatpush1.bf16.msra.mxu0 %v6036_v12  ;;  %2661 = vmatpush1.bf16.msra.mxu1 %v6039_v13 }
 0x7d9   :  { %2621 = vmatprep.subr.bf16.mxu0 %v6042_v44  ;;  %2662 = vmatprep.subr.bf16.mxu1 %v6045_v14 }
 0x7dc   :  { %2622 = vmatpush1.bf16.msra.mxu0 %v6048_v15  ;;  %2663 = vmatpush1.bf16.msra.mxu1 %v6051_v17 }
 0x7dd   :  { %2623 = vmatprep.subr.bf16.mxu0 %v6054_v18  ;;  %2664 = vmatprep.subr.bf16.mxu1 %v6057_v55 }
 0x7e0   :  { %2624 = vmatpush1.bf16.msra.mxu0 %v6060_v26  ;;  %2665 = vmatpush1.bf16.msra.mxu1 %v6063_v23  ;;  %v6081_v23 = vld [vmem:[#allocation11 + $0xcc] ss:$16 sps:$4 sm:$0xff]  }
 0x7e1   :  { %2625 = vmatprep.subr.bf16.mxu0 %v6066_v35  ;;  %2666 = vmatprep.subr.bf16.mxu1 %v6069_v25  ;;  %7103 = vst [vmem:[#allocation87_spill] sm:$0xff] %v6081_v23  ;;  %v6084_v35 = vld [vmem:[#allocation11 + $0xc0] ss:$16 sps:$4 sm:$0xff]   ;;  %v6087_v25 = vld [vmem:[#allocation11 + $0xc8] ss:$16 sps:$4 sm:$0xff]  }
 0x7e2   :  { %7104 = vst [vmem:[#allocation88_spill] sm:$0xff] %v6084_v35  ;;  %7105 = vst [vmem:[#allocation89_spill] sm:$0xff] %v6087_v25 }
 0x7e4   :  { %2626 = vmatpush1.bf16.msra.mxu0 %v6072_v61  ;;  %2667 = vmatpush1.bf16.msra.mxu1 %v6075_v30  ;;  %v6090_v61 = vld [vmem:[#allocation11 + $0xe4] ss:$16 sps:$4 sm:$0xff]   ;;  %v6093_v30 = vld [vmem:[#allocation11 + $0xec] ss:$16 sps:$4 sm:$0xff]  }
 0x7e5   :  { %2627 = vmatprep.subr.bf16.mxu0 %v6078_v3  ;;  %2668 = vmatprep.subr.bf16.mxu1 %v6081_v23  ;;  %7106 = vst [vmem:[#allocation59_spill] sm:$0xff] %v6090_v61  ;;  %7107 = vst [vmem:[#allocation60_spill] sm:$0xff] %v6093_v30  ;;  %v6096_v3 = vld [vmem:[#allocation11 + $0xe0] ss:$16 sps:$4 sm:$0xff]   ;;  %v6099_v23 = vld [vmem:[#allocation11 + $0xe8] ss:$16 sps:$4 sm:$0xff]  }
 0x7e6   :  { %7108 = vst [vmem:[#allocation61_spill] sm:$0xff] %v6096_v3  ;;  %7109 = vst [vmem:[#allocation62_spill] sm:$0xff] %v6099_v23 }
 0x7e8   :  { %2628 = vmatpush1.bf16.msra.mxu0 %v6084_v35  ;;  %2669 = vmatpush1.bf16.msra.mxu1 %v6087_v25  ;;  %v6102_v35 = vld [vmem:[#allocation11 + $0x104] ss:$16 sps:$4 sm:$0xff]   ;;  %v6105_v25 = vld [vmem:[#allocation11 + $0x10c] ss:$16 sps:$4 sm:$0xff]  }
 0x7e9   :  { %2629 = vmatprep.subr.bf16.mxu0 %v6090_v61  ;;  %2670 = vmatprep.subr.bf16.mxu1 %v6093_v30  ;;  %7110 = vst [vmem:[#allocation63_spill] sm:$0xff] %v6102_v35  ;;  %7111 = vst [vmem:[#allocation64_spill] sm:$0xff] %v6105_v25  ;;  %v6108_v61 = vld [vmem:[#allocation11 + $0x100] ss:$16 sps:$4 sm:$0xff]   ;;  %v6111_v30 = vld [vmem:[#allocation11 + $0x108] ss:$16 sps:$4 sm:$0xff]  }
 0x7ea   :  { %7112 = vst [vmem:[#allocation65_spill] sm:$0xff] %v6108_v61  ;;  %7113 = vst [vmem:[#allocation66_spill] sm:$0xff] %v6111_v30 }
 0x7ec   :  { %2630 = vmatpush1.bf16.msra.mxu0 %v6096_v3  ;;  %2671 = vmatpush1.bf16.msra.mxu1 %v6099_v23  ;;  %v6114_v3 = vld [vmem:[#allocation11 + $0x124] ss:$16 sps:$4 sm:$0xff]   ;;  %v6117_v23 = vld [vmem:[#allocation11 + $0x12c] ss:$16 sps:$4 sm:$0xff]  }
 0x7ed   :  { %2631 = vmatprep.subr.bf16.mxu0 %v6102_v35  ;;  %2672 = vmatprep.subr.bf16.mxu1 %v6105_v25  ;;  %7114 = vst [vmem:[#allocation67_spill] sm:$0xff] %v6114_v3  ;;  %7115 = vst [vmem:[#allocation68_spill] sm:$0xff] %v6117_v23  ;;  %v6120_v35 = vld [vmem:[#allocation11 + $0x120] ss:$16 sps:$4 sm:$0xff]   ;;  %v6123_v25 = vld [vmem:[#allocation11 + $0x128] ss:$16 sps:$4 sm:$0xff]  }
 0x7ee   :  { %7116 = vst [vmem:[#allocation98_spill] sm:$0xff] %v6120_v35  ;;  %7117 = vst [vmem:[#allocation99_spill] sm:$0xff] %v6123_v25 }
 0x7f0   :  { %2632 = vmatpush1.bf16.msra.mxu0 %v6108_v61  ;;  %2673 = vmatpush1.bf16.msra.mxu1 %v6111_v30  ;;  %v6126_v61 = vld [vmem:[#allocation11 + $0x144] ss:$16 sps:$4 sm:$0xff]   ;;  %v6129_v30 = vld [vmem:[#allocation11 + $0x14c] ss:$16 sps:$4 sm:$0xff]  }
 0x7f1   :  { %2633 = vmatprep.subr.bf16.mxu0 %v6114_v3  ;;  %2674 = vmatprep.subr.bf16.mxu1 %v6117_v23  ;;  %7118 = vst [vmem:[#allocation100_spill] sm:$0xff] %v6126_v61  ;;  %7119 = vst [vmem:[#allocation101_spill] sm:$0xff] %v6129_v30  ;;  %v6132_v3 = vld [vmem:[#allocation11 + $0x140] ss:$16 sps:$4 sm:$0xff]   ;;  %v6135_v23 = vld [vmem:[#allocation11 + $0x148] ss:$16 sps:$4 sm:$0xff]  }
 0x7f2   :  { %7120 = vst [vmem:[#allocation69_spill] sm:$0xff] %v6132_v3  ;;  %7121 = vst [vmem:[#allocation70_spill] sm:$0xff] %v6135_v23 }
 0x7f4   :  { %2634 = vmatpush1.bf16.msra.mxu0 %v6120_v35  ;;  %2675 = vmatpush1.bf16.msra.mxu1 %v6123_v25  ;;  %v6138_v35 = vld [vmem:[#allocation11 + $0x164] ss:$16 sps:$4 sm:$0xff]   ;;  %v6141_v25 = vld [vmem:[#allocation11 + $0x16c] ss:$16 sps:$4 sm:$0xff]  }
 0x7f5   :  { %2635 = vmatprep.subr.bf16.mxu0 %v6126_v61  ;;  %2676 = vmatprep.subr.bf16.mxu1 %v6129_v30  ;;  %7122 = vst [vmem:[#allocation71_spill] sm:$0xff] %v6138_v35  ;;  %7123 = vst [vmem:[#allocation72_spill] sm:$0xff] %v6141_v25  ;;  %v6144_v61 = vld [vmem:[#allocation11 + $0x160] ss:$16 sps:$4 sm:$0xff]   ;;  %v6147_v30 = vld [vmem:[#allocation11 + $0x168] ss:$16 sps:$4 sm:$0xff]  }
 0x7f6   :  { %7124 = vst [vmem:[#allocation73_spill] sm:$0xff] %v6144_v61  ;;  %7125 = vst [vmem:[#allocation74_spill] sm:$0xff] %v6147_v30 }
 0x7f8   :  { %2636 = vmatpush1.bf16.msra.mxu0 %v6132_v3  ;;  %2677 = vmatpush1.bf16.msra.mxu1 %v6135_v23  ;;  %v6150_v3 = vld [vmem:[#allocation11 + $0x184] ss:$16 sps:$4 sm:$0xff]   ;;  %v6153_v23 = vld [vmem:[#allocation11 + $0x18c] ss:$16 sps:$4 sm:$0xff]  }
 0x7f9   :  { %2637 = vmatprep.subr.bf16.mxu0 %v6138_v35  ;;  %2678 = vmatprep.subr.bf16.mxu1 %v6141_v25  ;;  %7126 = vst [vmem:[#allocation75_spill] sm:$0xff] %v6150_v3  ;;  %7127 = vst [vmem:[#allocation76_spill] sm:$0xff] %v6153_v23  ;;  %v6156_v35 = vld [vmem:[#allocation11 + $0x180] ss:$16 sps:$4 sm:$0xff]   ;;  %v6159_v25 = vld [vmem:[#allocation11 + $0x188] ss:$16 sps:$4 sm:$0xff]  }
 0x7fa   :  { %7128 = vst [vmem:[#allocation77_spill] sm:$0xff] %v6156_v35  ;;  %7129 = vst [vmem:[#allocation78_spill] sm:$0xff] %v6159_v25 }
 0x7fc   :  { %2638 = vmatpush1.bf16.msra.mxu0 %v6144_v61  ;;  %2679 = vmatpush1.bf16.msra.mxu1 %v6147_v30  ;;  %v6162_v61 = vld [vmem:[#allocation11 + $0x1a4] ss:$16 sps:$4 sm:$0xff]   ;;  %v6165_v30 = vld [vmem:[#allocation11 + $0x1ac] ss:$16 sps:$4 sm:$0xff]  }
 0x7fd   :  { %2639 = vmatprep.subr.bf16.mxu0 %v6150_v3  ;;  %2680 = vmatprep.subr.bf16.mxu1 %v6153_v23  ;;  %7130 = vst [vmem:[#allocation79_spill] sm:$0xff] %v6162_v61  ;;  %7131 = vst [vmem:[#allocation80_spill] sm:$0xff] %v6165_v30  ;;  %v6168_v3 = vld [vmem:[#allocation11 + $0x1a0] ss:$16 sps:$4 sm:$0xff]   ;;  %v6171_v23 = vld [vmem:[#allocation11 + $0x1a8] ss:$16 sps:$4 sm:$0xff]  }
 0x7fe   :  { %7132 = vst [vmem:[#allocation81_spill] sm:$0xff] %v6168_v3  ;;  %7133 = vst [vmem:[#allocation82_spill] sm:$0xff] %v6171_v23 }
 0x800   :  { %2640 = vmatpush1.bf16.msra.mxu0 %v6156_v35  ;;  %2681 = vmatpush1.bf16.msra.mxu1 %v6159_v25  ;;  %v6174_v35 = vld [vmem:[#allocation11 + $0x1c4] ss:$16 sps:$4 sm:$0xff]   ;;  %v6177_v25 = vld [vmem:[#allocation11 + $0x1cc] ss:$16 sps:$4 sm:$0xff]  }
 0x801   :  { %2641 = vmatprep.subr.bf16.mxu0 %v6162_v61  ;;  %2682 = vmatprep.subr.bf16.mxu1 %v6165_v30  ;;  %7134 = vst [vmem:[#allocation28_spill] sm:$0xff] %v6174_v35  ;;  %7135 = vst [vmem:[#allocation29_spill] sm:$0xff] %v6177_v25  ;;  %v6180_v61 = vld [vmem:[#allocation11 + $0x1c0] ss:$16 sps:$4 sm:$0xff]   ;;  %v6183_v30 = vld [vmem:[#allocation11 + $0x1c8] ss:$16 sps:$4 sm:$0xff]  }
 0x802   :  { %7136 = vst [vmem:[#allocation34_spill] sm:$0xff] %v6180_v61  ;;  %7137 = vst [vmem:[#allocation90_spill] sm:$0xff] %v6183_v30 }
 0x804   :  { %2642 = vmatpush1.bf16.msra.mxu0 %v6168_v3  ;;  %2683 = vmatpush1.bf16.msra.mxu1 %v6171_v23  ;;  %v6186_v3 = vld [vmem:[#allocation11 + $0x1e4] ss:$16 sps:$4 sm:$0xff]   ;;  %v6189_v23 = vld [vmem:[#allocation11 + $0x1ec] ss:$16 sps:$4 sm:$0xff]  }
 0x805   :  { %2643 = vmatprep.subr.bf16.mxu0 %v6174_v35  ;;  %2684 = vmatprep.subr.bf16.mxu1 %v6177_v25  ;;  %7138 = vst [vmem:[#allocation91_spill] sm:$0xff] %v6186_v3  ;;  %7139 = vst [vmem:[#allocation92_spill] sm:$0xff] %v6189_v23  ;;  %v6192_v35 = vld [vmem:[#allocation11 + $0x1e0] ss:$16 sps:$4 sm:$0xff]   ;;  %v6195_v25 = vld [vmem:[#allocation11 + $0x1e8] ss:$16 sps:$4 sm:$0xff]  }
 0x806   :  { %7140 = vst [vmem:[#allocation93_spill] sm:$0xff] %v6192_v35  ;;  %7141 = vst [vmem:[#allocation35_spill] sm:$0xff] %v6195_v25 }
 0x808   :  { %2644 = vmatpush1.bf16.msra.mxu0 %v6180_v61  ;;  %2685 = vmatpush1.bf16.msra.mxu1 %v6183_v30 }
 0x809   :  { %2645 = vmatprep.subr.bf16.mxu0 %v6186_v3  ;;  %2686 = vmatprep.subr.bf16.mxu1 %v6189_v23 }
 0x80c   :  { %2646 = vmatpush1.bf16.msra.mxu0 %v6192_v35  ;;  %2687 = vmatpush1.bf16.msra.mxu1 %v6195_v25 }
 0x80d   :  { %2725 = vmatprep.subr.bf16.mxu0 %v7068_v4  ;;  %2766 = vmatprep.subr.bf16.mxu1 %v7069_v0 }
 0x882   :  { %v2427_v30 = vpop.f32.mrb[60].mxu0  ;;  %v2468_v61 = vpop.f32.mrb[60].mxu1 }
 0x883   :  { %v2428_v3 = vadd.f32 %v2427_v30, %v7070_v9  ;;  %v2429_v26 = vpop.f32.mrb[61].mxu0  ;;  %v2470_v55 = vpop.f32.mrb[61].mxu1  ;;  %v2469_v0 = vadd.f32 %v2468_v61, %v7073_v11  ;;  %v7142_v61 = vld [vmem:[#allocation106_spill] sm:$0xff]  ;;  %v7145_v11 = vld [vmem:[#allocation109_spill] sm:$0xff] }
 0x884   :  { %v2430_v23 = vadd.f32 %v2429_v26, %v7071_v36  ;;  %v2431_v18 = vpop.f32.mrb[62].mxu0  ;;  %v2472_v17 = vpop.f32.mrb[62].mxu1  ;;  %v2471_v4 = vadd.f32 %v2470_v55, %v7072_v51 }
 0x885   :  { %v3471_v15 = vmul.f32 -1.442695, %v2428_v3  ;;  %v2432_v35 = vpop.f32.mrb[63].mxu0  ;;  %v2473_v14 = vpop.f32.mrb[63].mxu1 }
 0x886   :  { %v3472_v44 = vmul.f32 -1.442695, %v2430_v23  ;;  %v3473_v25 = vmul.f32 -1.442695, %v2471_v4 }
 0x887   :  { %3971 = vpow2.f32 %v3471_v15 }
 0x888   :  { %3973 = vpow2.f32 %v3472_v44 }
 0x889   :  { %3975 = vpow2.f32 %v3473_v25  ;;  %v7143_v25 = vld [vmem:[#allocation107_spill] sm:$0xff] }
 0x88a   :  { %3977 = vtanh.f32 %v2469_v0 }
 0x891   :  { %v3972_v13 = vpop.eup %3971 }
 0x892   :  { %v3974_v12 = vpop.eup %3973  ;;  %v2478_v30 = vadd.f32 1.0, %v3972_v13 }
 0x893   :  { %v2484_v9 = vadd.f32 1.0, %v3974_v12  ;;  %v3976_v17 = vpop.eup %3975 }
 0x894   :  { %3979 = vrcp.f32 %v2478_v30  ;;  %v3978_v18 = vpop.eup %3977  ;;  %v2491_v15 = vadd.f32 1.0, %v3976_v17 }
 0x895   :  { %3981 = vrcp.f32 %v2484_v9  ;;  %v7144_v9 = vld [vmem:[#allocation108_spill] sm:$0xff] }
 0x896   :  { %3983 = vrcp.f32 %v2491_v15 }
 0x89e   :  { %v3980_v26 = vpop.eup %3979 }
 0x89f   :  { %v3982_v14 = vpop.eup %3981  ;;  %v2495_v23 = vmul.f32 %v3980_v26, %v3978_v18 }
 0x8a0   :  { %v2494_v44 = vmul.f32 %v3982_v14, %v5963_v28 }
 0x8a2   :  { %v2537_v55 = vpop.f32.mrb[64].mxu0  ;;  %v2578_v35 = vpop.f32.mrb[64].mxu1  ;;  %v6205_v3 = vadd.f32 %v2495_v23, %v2494_v44 }
 0x8a3   :  { %v2585_v13 = vadd.f32 %v2537_v55, %v7142_v61  ;;  %v2587_v4 = vadd.f32 %v2578_v35, %v7143_v25  ;;  %v2539_v12 = vpop.f32.mrb[65].mxu0  ;;  %v2580_v0 = vpop.f32.mrb[65].mxu1 }
 0x8a4   :  { %v2586_v30 = vadd.f32 %v2539_v12, %v7144_v9  ;;  %v2588_v51 = vadd.f32 %v2580_v0, %v7145_v11  ;;  %v2541_v36 = vpop.f32.mrb[66].mxu0  ;;  %v2582_v18 = vpop.f32.mrb[66].mxu1  ;;  %3985 = vtanh.f32 %v6205_v3 }
 0x8a5   :  { %v3474_v28 = vmul.f32 -1.442695, %v2585_v13  ;;  %v2542_v17 = vpop.f32.mrb[67].mxu0  ;;  %v2583_v26 = vpop.f32.mrb[67].mxu1 }
 0x8a6   :  { %v3475_v14 = vmul.f32 -1.442695, %v2586_v30  ;;  %v3984_v23 = vpop.eup %3983  ;;  %v3476_v44 = vmul.f32 -1.442695, %v2588_v51 }
 0x8a7   :  { %3987 = vpow2.f32 %v3474_v28 }
 0x8a8   :  { %3989 = vpow2.f32 %v3475_v14 }
 0x8a9   :  { %3991 = vpow2.f32 %v3476_v44  ;;  %v7189_v44 = vld [vmem:[#allocation80_spill] sm:$0xff] }
 0x8aa   :  { %3993 = vtanh.f32 %v2587_v4 }
 0x8ae   :  { %v3986_v15 = vpop.eup %3985 }
 0x8af   :  { %v2498_v55 = vmul.f32 %v3986_v15, %v3984_v23  ;;  %v7187_v23 = vld [vmem:[#allocation78_spill] sm:$0xff]  ;;  %v7188_v15 = vld [vmem:[#allocation79_spill] sm:$0xff] }
 0x8b1   :  { %v3988_v35 = vpop.eup %3987  ;;  %v2614_v61 = vpack.c.bf16 %v2498_v55, %v2498_v55  ;;  %v7190_v55 = vld [vmem:[#allocation81_spill] sm:$0xff] }
 0x8b2   :  { %v3990_v25 = vpop.eup %3989  ;;  %v2592_v12 = vadd.f32 1.0, %v3988_v35  ;;  %v7191_v35 = vld [vmem:[#allocation82_spill] sm:$0xff] }
 0x8b3   :  { %v2598_v36 = vadd.f32 1.0, %v3990_v25  ;;  %2647 = vmatprep.mubr.bf16.mxu0 %v2614_v61  ;;  %2688 = vmatprep.mubr.bf16.mxu1 %v2614_v61  ;;  %v3992_v11 = vpop.eup %3991  ;;  %v7192_v61 = vld [vmem:[#allocation28_spill] sm:$0xff]  ;;  %v7193_v25 = vld [vmem:[#allocation29_spill] sm:$0xff] }
 0x8b4   :  { %3995 = vrcp.f32 %v2592_v12  ;;  %v3994_v13 = vpop.eup %3993  ;;  %v2605_v18 = vadd.f32 1.0, %v3992_v11  ;;  %v7194_v12 = vld [vmem:[#allocation34_spill] sm:$0xff]  ;;  %v7196_v11 = vld [vmem:[#allocation91_spill] sm:$0xff] }
 0x8b5   :  { %3997 = vrcp.f32 %v2598_v36  ;;  %v7195_v36 = vld [vmem:[#allocation90_spill] sm:$0xff] }
 0x8b6   :  { %3999 = vrcp.f32 %v2605_v18 }
 0x8be   :  { %v3996_v0 = vpop.eup %3995 }
 0x8bf   :  { %v3998_v9 = vpop.eup %3997  ;;  %v2609_v30 = vmul.f32 %v3996_v0, %v3994_v13  ;;  %v7197_v13 = vld [vmem:[#allocation92_spill] sm:$0xff]  ;;  %v7198_v0 = vld [vmem:[#allocation93_spill] sm:$0xff] }
 0x8c0   :  { %v2608_v51 = vmul.f32 %v3998_v9, %v5971_v33  ;;  %v4000_v17 = vpop.eup %3999  ;;  %v7166_v33 = vld [vmem:[#allocation61_spill] sm:$0xff]  ;;  %v7199_v9 = vld [vmem:[#allocation35_spill] sm:$0xff] }
 0x8c2   :  { %v6213_v28 = vadd.f32 %v2609_v30, %v2608_v51  ;;  %v7200_v51 = vld [vmem:[#allocation30_spill] sm:$0xff] }
 0x8c4   :  { %4001 = vtanh.f32 %v6213_v28 }
 0x8ce   :  { %v4002_v4 = vpop.eup %4001 }
 0x8cf   :  { %v2612_v26 = vmul.f32 %v4002_v4, %v4000_v17 }
 0x8d1   :  { %v2613_v14 = vpack.c.bf16 %v2612_v26, %v2612_v26 }
 0x8d3   :  { %2648 = vmatmul.mubr.bf16.vlgmr.msra.gmra.mrb[68].mxu0 %v2613_v14  ;;  %2689 = vmatmul.mubr.bf16.vlgmr.msra.gmra.mrb[68].mxu1 %v2613_v14 }
 0x8d4   :  { %2726 = vmatpush1.bf16.msra.mxu0 %v5798_v16  ;;  %2767 = vmatpush1.bf16.msra.mxu1 %v5801_v49  ;;  %v7146_v16 = vld [vmem:[#allocation46_spill] sm:$0xff]  ;;  %v7147_v49 = vld [vmem:[#allocation47_spill] sm:$0xff] }
 0x8d5   :  { %2727 = vmatprep.subr.bf16.mxu0 %v5804_v50  ;;  %2768 = vmatprep.subr.bf16.mxu1 %v5807_v46  ;;  %v7148_v50 = vld [vmem:[#allocation48_spill] sm:$0xff]  ;;  %v7149_v46 = vld [vmem:[#allocation49_spill] sm:$0xff] }
 0x8d6   :  { %2757 = vmatprep.mubr.bf16.mxu0 %v6787_v45  ;;  %2798 = vmatprep.mubr.bf16.mxu1 %v6787_v45 }
 0x8d8   :  { %2728 = vmatpush1.bf16.msra.mxu0 %v5812_v52  ;;  %2769 = vmatpush1.bf16.msra.mxu1 %v5815_v41  ;;  %v7150_v52 = vld [vmem:[#allocation50_spill] sm:$0xff]  ;;  %v7151_v41 = vld [vmem:[#allocation51_spill] sm:$0xff] }
 0x8d9   :  { %2729 = vmatprep.subr.bf16.mxu0 %v5818_v58  ;;  %2770 = vmatprep.subr.bf16.mxu1 %v5821_v21  ;;  %v7152_v58 = vld [vmem:[#allocation52_spill] sm:$0xff]  ;;  %v7153_v21 = vld [vmem:[#allocation53_spill] sm:$0xff] }
 0x8dc   :  { %2730 = vmatpush1.bf16.msra.mxu0 %v5824_v7  ;;  %2771 = vmatpush1.bf16.msra.mxu1 %v5827_v6  ;;  %v7154_v7 = vld [vmem:[#allocation54_spill] sm:$0xff]  ;;  %v7155_v6 = vld [vmem:[#allocation55_spill] sm:$0xff] }
 0x8dd   :  { %2731 = vmatprep.subr.bf16.mxu0 %v5830_v40  ;;  %2772 = vmatprep.subr.bf16.mxu1 %v5833_v43  ;;  %v7156_v40 = vld [vmem:[#allocation56_spill] sm:$0xff]  ;;  %v7157_v43 = vld [vmem:[#allocation57_spill] sm:$0xff] }
 0x8e0   :  { %2732 = vmatpush1.bf16.msra.mxu0 %v5836_v22  ;;  %2773 = vmatpush1.bf16.msra.mxu1 %v5839_v24  ;;  %v7158_v22 = vld [vmem:[#allocation58_spill] sm:$0xff]  ;;  %v7159_v24 = vld [vmem:[#allocation83_spill] sm:$0xff] }
 0x8e1   :  { %2733 = vmatprep.subr.bf16.mxu0 %v7078_v53  ;;  %2774 = vmatprep.subr.bf16.mxu1 %v7079_v31  ;;  %v7167_v53 = vld [vmem:[#allocation62_spill] sm:$0xff]  ;;  %v7168_v31 = vld [vmem:[#allocation63_spill] sm:$0xff] }
 0x8e4   :  { %2734 = vmatpush1.bf16.msra.mxu0 %v7080_v48  ;;  %2775 = vmatpush1.bf16.msra.mxu1 %v7081_v37  ;;  %v7169_v48 = vld [vmem:[#allocation64_spill] sm:$0xff]  ;;  %v7170_v37 = vld [vmem:[#allocation65_spill] sm:$0xff] }
 0x8e5   :  { %2735 = vmatprep.subr.bf16.mxu0 %v7082_v27  ;;  %2776 = vmatprep.subr.bf16.mxu1 %v7083_v34  ;;  %v7171_v27 = vld [vmem:[#allocation66_spill] sm:$0xff]  ;;  %v7172_v34 = vld [vmem:[#allocation67_spill] sm:$0xff] }
 0x8e8   :  { %2736 = vmatpush1.bf16.msra.mxu0 %v7084_v29  ;;  %2777 = vmatpush1.bf16.msra.mxu1 %v7085_v56  ;;  %v7173_v29 = vld [vmem:[#allocation68_spill] sm:$0xff]  ;;  %v7174_v56 = vld [vmem:[#allocation98_spill] sm:$0xff] }
 0x8e9   :  { %2737 = vmatprep.subr.bf16.mxu0 %v7086_v32  ;;  %2778 = vmatprep.subr.bf16.mxu1 %v7087_v47  ;;  %v7175_v32 = vld [vmem:[#allocation99_spill] sm:$0xff]  ;;  %v7176_v47 = vld [vmem:[#allocation100_spill] sm:$0xff] }
 0x8ec   :  { %2738 = vmatpush1.bf16.msra.mxu0 %v5872_v38  ;;  %2779 = vmatpush1.bf16.msra.mxu1 %v5875_v59  ;;  %v7164_v38 = vld [vmem:[#allocation59_spill] sm:$0xff]  ;;  %v7165_v59 = vld [vmem:[#allocation60_spill] sm:$0xff] }
 0x8ed   :  { %2739 = vmatprep.subr.bf16.mxu0 %v5878_v39  ;;  %2780 = vmatprep.subr.bf16.mxu1 %v5881_v20  ;;  %v7160_v39 = vld [vmem:[#allocation86_spill] sm:$0xff]  ;;  %v7161_v20 = vld [vmem:[#allocation87_spill] sm:$0xff] }
 0x8f0   :  { %2740 = vmatpush1.bf16.msra.mxu0 %v5884_v63  ;;  %2781 = vmatpush1.bf16.msra.mxu1 %v5887_v19  ;;  %v7162_v63 = vld [vmem:[#allocation88_spill] sm:$0xff]  ;;  %v7163_v19 = vld [vmem:[#allocation89_spill] sm:$0xff] }
 0x8f1   :  { %2837 = vmatprep.subr.bf16.mxu0 %v6006_v54  ;;  %2878 = vmatprep.subr.bf16.mxu1 %v6009_v42  ;;  %v7177_v54 = vld [vmem:[#allocation101_spill] sm:$0xff] }
 0x8f2   :  { %v7178_v42 = vld [vmem:[#allocation69_spill] sm:$0xff] }
 0x8f3   :  { %2758 = vmatmul.mubr.bf16.vlgmr.msra.gmra.mrb[72].mxu0 %v2613_v14  ;;  %2799 = vmatmul.mubr.bf16.vlgmr.msra.gmra.mrb[72].mxu1 %v2613_v14  ;;  %v7201_v14 = vld [vmem:[#allocation31_spill] sm:$0xff] }
 0x8f4   :  { %2838 = vmatpush1.bf16.msra.mxu0 %v6012_v57  ;;  %2879 = vmatpush1.bf16.msra.mxu1 %v6015_v60  ;;  %v7179_v57 = vld [vmem:[#allocation70_spill] sm:$0xff]  ;;  %v7180_v60 = vld [vmem:[#allocation71_spill] sm:$0xff] }
 0x8f5   :  { %2839 = vmatprep.subr.bf16.mxu0 %v6018_v62  ;;  %2880 = vmatprep.subr.bf16.mxu1 %v6021_v1  ;;  %v7181_v62 = vld [vmem:[#allocation72_spill] sm:$0xff]  ;;  %v7182_v1 = vld [vmem:[#allocation73_spill] sm:$0xff] }
 0x8f8   :  { %2840 = vmatpush1.bf16.msra.mxu0 %v6024_v2  ;;  %2881 = vmatpush1.bf16.msra.mxu1 %v6027_v5  ;;  %v7183_v2 = vld [vmem:[#allocation74_spill] sm:$0xff]  ;;  %v7184_v5 = vld [vmem:[#allocation75_spill] sm:$0xff] }
 0x8f9   :  { %2841 = vmatprep.subr.bf16.mxu0 %v6030_v8  ;;  %2882 = vmatprep.subr.bf16.mxu1 %v6033_v10  ;;  %v7185_v8 = vld [vmem:[#allocation76_spill] sm:$0xff]  ;;  %v7186_v10 = vld [vmem:[#allocation77_spill] sm:$0xff] }
 0x8fc   :  { %2842 = vmatpush1.bf16.msra.mxu0 %v7146_v16  ;;  %2883 = vmatpush1.bf16.msra.mxu1 %v7147_v49 }
 0x8fd   :  { %2843 = vmatprep.subr.bf16.mxu0 %v7148_v50  ;;  %2884 = vmatprep.subr.bf16.mxu1 %v7149_v46 }
 0x900   :  { %2844 = vmatpush1.bf16.msra.mxu0 %v7150_v52  ;;  %2885 = vmatpush1.bf16.msra.mxu1 %v7151_v41 }
 0x901   :  { %2845 = vmatprep.subr.bf16.mxu0 %v7152_v58  ;;  %2886 = vmatprep.subr.bf16.mxu1 %v7153_v21  ;;  %v7202_v21 = vld [vmem:[#allocation32_spill] sm:$0xff] }
 0x904   :  { %2846 = vmatpush1.bf16.msra.mxu0 %v7154_v7  ;;  %2887 = vmatpush1.bf16.msra.mxu1 %v7155_v6 }
 0x905   :  { %2847 = vmatprep.subr.bf16.mxu0 %v7156_v40  ;;  %2888 = vmatprep.subr.bf16.mxu1 %v7157_v43  ;;  %v7203_v40 = vld [vmem:[#allocation33_spill] sm:$0xff] }
 0x908   :  { %2848 = vmatpush1.bf16.msra.mxu0 %v7158_v22  ;;  %2889 = vmatpush1.bf16.msra.mxu1 %v7159_v24 }
 0x909   :  { %2849 = vmatprep.subr.bf16.mxu0 %v7160_v39  ;;  %2890 = vmatprep.subr.bf16.mxu1 %v7161_v20 }
 0x90c   :  { %2850 = vmatpush1.bf16.msra.mxu0 %v7162_v63  ;;  %2891 = vmatpush1.bf16.msra.mxu1 %v7163_v19 }
 0x90d   :  { %2851 = vmatprep.subr.bf16.mxu0 %v7164_v38  ;;  %2892 = vmatprep.subr.bf16.mxu1 %v7165_v59 }
 0x910   :  { %2852 = vmatpush1.bf16.msra.mxu0 %v7166_v33  ;;  %2893 = vmatpush1.bf16.msra.mxu1 %v7167_v53 }
 0x911   :  { %2853 = vmatprep.subr.bf16.mxu0 %v7168_v31  ;;  %2894 = vmatprep.subr.bf16.mxu1 %v7169_v48 }
 0x914   :  { %2854 = vmatpush1.bf16.msra.mxu0 %v7170_v37  ;;  %2895 = vmatpush1.bf16.msra.mxu1 %v7171_v27 }
 0x915   :  { %2855 = vmatprep.subr.bf16.mxu0 %v7172_v34  ;;  %2896 = vmatprep.subr.bf16.mxu1 %v7173_v29  ;;  %v7204_v34 = vld [vmem:[#allocation110_spill] sm:$0xff] }
 0x918   :  { %2856 = vmatpush1.bf16.msra.mxu0 %v7174_v56  ;;  %2897 = vmatpush1.bf16.msra.mxu1 %v7175_v32  ;;  %v7205_v56 = vld [vmem:[#allocation111_spill] sm:$0xff] }
 0x919   :  { %2857 = vmatprep.subr.bf16.mxu0 %v7176_v47  ;;  %2898 = vmatprep.subr.bf16.mxu1 %v7177_v54 }
 0x91c   :  { %2858 = vmatpush1.bf16.msra.mxu0 %v7178_v42  ;;  %2899 = vmatpush1.bf16.msra.mxu1 %v7179_v57  ;;  %v7206_v42 = vld [vmem:[#allocation112_spill] sm:$0xff] }
 0x91d   :  { %2859 = vmatprep.subr.bf16.mxu0 %v7180_v60  ;;  %2900 = vmatprep.subr.bf16.mxu1 %v7181_v62  ;;  %v7207_v60 = vld [vmem:[#allocation113_spill] sm:$0xff] }
 0x920   :  { %2860 = vmatpush1.bf16.msra.mxu0 %v7182_v1  ;;  %2901 = vmatpush1.bf16.msra.mxu1 %v7183_v2 }
 0x921   :  { %2861 = vmatprep.subr.bf16.mxu0 %v7184_v5  ;;  %2902 = vmatprep.subr.bf16.mxu1 %v7185_v8 }
 0x924   :  { %2862 = vmatpush1.bf16.msra.mxu0 %v7186_v10  ;;  %2903 = vmatpush1.bf16.msra.mxu1 %v7187_v23 }
 0x925   :  { %2863 = vmatprep.subr.bf16.mxu0 %v7188_v15  ;;  %2904 = vmatprep.subr.bf16.mxu1 %v7189_v44 }
 0x928   :  { %2864 = vmatpush1.bf16.msra.mxu0 %v7190_v55  ;;  %2905 = vmatpush1.bf16.msra.mxu1 %v7191_v35 }
 0x929   :  { %2865 = vmatprep.subr.bf16.mxu0 %v7192_v61  ;;  %2906 = vmatprep.subr.bf16.mxu1 %v7193_v25 }
 0x92c   :  { %2866 = vmatpush1.bf16.msra.mxu0 %v7194_v12  ;;  %2907 = vmatpush1.bf16.msra.mxu1 %v7195_v36 }
 0x92d   :  { %2867 = vmatprep.subr.bf16.mxu0 %v7196_v11  ;;  %2908 = vmatprep.subr.bf16.mxu1 %v7197_v13 }
 0x930   :  { %2868 = vmatpush1.bf16.msra.mxu0 %v7198_v0  ;;  %2909 = vmatpush1.bf16.msra.mxu1 %v7199_v9 }
 0x9a6   :  { %v2649_v30 = vpop.f32.mrb[68].mxu0  ;;  %v2690_v18 = vpop.f32.mrb[68].mxu1 }
 0x9a7   :  { %v2650_v17 = vadd.f32 %v2649_v30, %v7200_v51  ;;  %v2651_v4 = vpop.f32.mrb[69].mxu0  ;;  %v2692_v26 = vpop.f32.mrb[69].mxu1  ;;  %v2691_v43 = vadd.f32 %v2690_v18, %v7203_v40 }
 0x9a8   :  { %v2652_v16 = vadd.f32 %v2651_v4, %v7201_v14  ;;  %v2653_v49 = vpop.f32.mrb[70].mxu0  ;;  %v2694_v50 = vpop.f32.mrb[70].mxu1  ;;  %v2693_v7 = vadd.f32 %v2692_v26, %v7202_v21 }
 0x9a9   :  { %v3477_v46 = vmul.f32 -1.442695, %v2650_v17  ;;  %v2654_v52 = vpop.f32.mrb[71].mxu0  ;;  %v2695_v41 = vpop.f32.mrb[71].mxu1 }
 0x9aa   :  { %v3478_v58 = vmul.f32 -1.442695, %v2652_v16  ;;  %v3479_v6 = vmul.f32 -1.442695, %v2693_v7  ;;  %v3755_v52 = vld [vmem:[#allocation14] ss:$8 sps:$4 sm:$0xff]  }
 0x9ab   :  { %4003 = vpow2.f32 %v3477_v46  ;;  %v3757_v46 = vld [vmem:[#allocation14 + $0x4] ss:$8 sps:$4 sm:$0xff]   ;;  %v3760_v41 = vld [vmem:[#allocation14 + $0x14] ss:$8 sps:$4 sm:$0xff]   ;;  %v3761_v7 = vld [vmem:[#allocation14 + $0x20] ss:$8 sps:$4 sm:$0xff]  }
 0x9ac   :  { %4005 = vpow2.f32 %v3478_v58  ;;  %3053 = vmatprep.subr.bf16.mxu0 %v3757_v46  ;;  %v3758_v58 = vld [vmem:[#allocation14 + $0x10] ss:$8 sps:$4 sm:$0xff]   ;;  %v2961_v46 = vld [vmem:[#allocation15] sm:$0x3] }
 0x9ad   :  { %4007 = vpow2.f32 %v3479_v6  ;;  %v3766_v6 = vld [vmem:[#allocation14 + $0x34] ss:$8 sps:$4 sm:$0xff]  }
 0x9ae   :  { %4009 = vtanh.f32 %v2691_v43  ;;  %v3764_v43 = vld [vmem:[#allocation14 + $0x30] ss:$8 sps:$4 sm:$0xff]  }
 0x9b5   :  { %v4004_v22 = vpop.eup %4003 }
 0x9b6   :  { %v4006_v24 = vpop.eup %4005  ;;  %v2700_v39 = vadd.f32 1.0, %v4004_v22  ;;  %v3767_v22 = vld [vmem:[#allocation14 + $0x40] ss:$8 sps:$4 sm:$0xff]  }
 0x9b7   :  { %v2706_v20 = vadd.f32 1.0, %v4006_v24  ;;  %v4008_v63 = vpop.eup %4007  ;;  %v3769_v24 = vld [vmem:[#allocation14 + $0x44] ss:$8 sps:$4 sm:$0xff]  }
 0x9b8   :  { %4011 = vrcp.f32 %v2700_v39  ;;  %v4010_v19 = vpop.eup %4009  ;;  %v2713_v53 = vadd.f32 1.0, %v4008_v63  ;;  %v3772_v39 = vld [vmem:[#allocation14 + $0x54] ss:$8 sps:$4 sm:$0xff]   ;;  %v3773_v63 = vld [vmem:[#allocation14 + $0x60] ss:$8 sps:$4 sm:$0xff]  }
 0x9b9   :  { %4013 = vrcp.f32 %v2706_v20  ;;  %v3775_v20 = vld [vmem:[#allocation14 + $0x64] ss:$8 sps:$4 sm:$0xff]  }
 0x9ba   :  { %4015 = vrcp.f32 %v2713_v53 }
 0x9c2   :  { %v4012_v38 = vpop.eup %4011 }
 0x9c3   :  { %v4014_v59 = vpop.eup %4013  ;;  %v2717_v33 = vmul.f32 %v4012_v38, %v4010_v19  ;;  %v3778_v19 = vld [vmem:[#allocation14 + $0x74] ss:$8 sps:$4 sm:$0xff]   ;;  %v3776_v38 = vld [vmem:[#allocation14 + $0x70] ss:$8 sps:$4 sm:$0xff]  }
 0x9c4   :  { %v2716_v31 = vmul.f32 %v4014_v59, %v6205_v3  ;;  %v4016_v23 = vpop.eup %4015 }
 0x9c6   :  { %v2759_v48 = vpop.f32.mrb[72].mxu0  ;;  %v2800_v37 = vpop.f32.mrb[72].mxu1  ;;  %v6317_v27 = vadd.f32 %v2717_v33, %v2716_v31 }
 0x9c7   :  { %v2807_v29 = vadd.f32 %v2759_v48, %v7204_v34  ;;  %v2809_v32 = vadd.f32 %v2800_v37, %v7205_v56  ;;  %v2761_v47 = vpop.f32.mrb[73].mxu0  ;;  %v2802_v54 = vpop.f32.mrb[73].mxu1 }
 0x9c8   :  { %v2808_v57 = vadd.f32 %v2761_v47, %v7206_v42  ;;  %v2810_v62 = vadd.f32 %v2802_v54, %v7207_v60  ;;  %v2763_v1 = vpop.f32.mrb[74].mxu0  ;;  %v2804_v2 = vpop.f32.mrb[74].mxu1  ;;  %4017 = vtanh.f32 %v6317_v27 }
 0x9c9   :  { %v3480_v3 = vmul.f32 -1.442695, %v2807_v29  ;;  %v2764_v5 = vpop.f32.mrb[75].mxu0  ;;  %v2805_v8 = vpop.f32.mrb[75].mxu1 }
 0x9ca   :  { %v3481_v10 = vmul.f32 -1.442695, %v2808_v57  ;;  %v3482_v44 = vmul.f32 -1.442695, %v2810_v62 }
 0x9cb   :  { %4019 = vpow2.f32 %v3480_v3 }
 0x9cc   :  { %4021 = vpow2.f32 %v3481_v10 }
 0x9cd   :  { %4023 = vpow2.f32 %v3482_v44 }
 0x9ce   :  { %4025 = vtanh.f32 %v2809_v32 }
 0x9d2   :  { %v4018_v15 = vpop.eup %4017 }
 0x9d3   :  { %v2720_v55 = vmul.f32 %v4018_v15, %v4016_v23 }
 0x9d5   :  { %v4020_v35 = vpop.eup %4019  ;;  %v2836_v61 = vpack.c.bf16 %v2720_v55, %v2720_v55 }
 0x9d6   :  { %v4022_v25 = vpop.eup %4021  ;;  %v2814_v12 = vadd.f32 1.0, %v4020_v35 }
 0x9d7   :  { %v2820_v36 = vadd.f32 1.0, %v4022_v25  ;;  %2869 = vmatprep.mubr.bf16.mxu0 %v2836_v61  ;;  %2910 = vmatprep.mubr.bf16.mxu1 %v2836_v61  ;;  %v4024_v11 = vpop.eup %4023  ;;  %v3779_v25 = vld [vmem:[#allocation17 + $0x40] sm:$0xff]  }
 0x9d8   :  { %4027 = vrcp.f32 %v2814_v12  ;;  %v4026_v13 = vpop.eup %4025  ;;  %v2827_v18 = vadd.f32 1.0, %v4024_v11  ;;  %v3780_v12 = vld [vmem:[#allocation17] sm:$0xff]   ;;  %3522 = vmatprep.subr.bf16.mxu1 %v3779_v25  ;;  %v3782_v11 = vld [vmem:[#allocation17 + $0x8] sm:$0xff]  }
 0x9d9   :  { %4029 = vrcp.f32 %v2820_v36  ;;  %v3781_v36 = vld [vmem:[#allocation17 + $0x48] sm:$0xff]  }
 0x9da   :  { %4031 = vrcp.f32 %v2827_v18  ;;  %v3788_v18 = vld [vmem:[#allocation17 + $0x20] sm:$0xff]  }
 0x9e2   :  { %v4028_v0 = vpop.eup %4027 }
 0x9e3   :  { %v4030_v9 = vpop.eup %4029  ;;  %v2831_v30 = vmul.f32 %v4028_v0, %v4026_v13  ;;  %v3783_v13 = vld [vmem:[#allocation17 + $0x50] sm:$0xff]  }
 0x9e4   :  { %v2830_v17 = vmul.f32 %v4030_v9, %v6213_v28  ;;  %v4032_v26 = vpop.eup %4031  ;;  %v3763_v28 = vld [vmem:[#allocation14 + $0x24] ss:$8 sps:$4 sm:$0xff]   ;;  %v3784_v0 = vld [vmem:[#allocation17 + $0x10] sm:$0xff]   ;;  %v3786_v9 = vld [vmem:[#allocation17 + $0x18] sm:$0xff]  }
 0x9e6   :  { %v2832_v4 = vadd.f32 %v2831_v30, %v2830_v17  ;;  %v3787_v30 = vld [vmem:[#allocation17 + $0x60] sm:$0xff]   ;;  %v3789_v17 = vld [vmem:[#allocation17 + $0x68] sm:$0xff]  }
 0x9e8   :  { %4033 = vtanh.f32 %v2832_v4  ;;  %v3790_v4 = vld [vmem:[#allocation17 + $0x28] sm:$0xff]  }
 0x9f2   :  { %v4034_v16 = vpop.eup %4033 }
 0x9f3   :  { %v2834_v49 = vmul.f32 %v4034_v16, %v4032_v26  ;;  %v3791_v26 = vld [vmem:[#allocation17 + $0x70] sm:$0xff]  }
 0x9f4   :  { %v3792_v16 = vld [vmem:[#allocation17 + $0x30] sm:$0xff]  }
 0x9f5   :  { %v2835_v50 = vpack.c.bf16 %v2834_v49, %v2834_v49  ;;  %v3793_v49 = vld [vmem:[#allocation17 + $0x78] sm:$0xff]  }
 0x9f7   :  { %2870 = vmatmul.mubr.bf16.vlgmr.msra.gmra.mrb[76].mxu0 %v2835_v50  ;;  %2911 = vmatmul.mubr.bf16.vlgmr.msra.gmra.mrb[76].mxu1 %v2835_v50  ;;  %v3794_v50 = vld [vmem:[#allocation17 + $0x38] sm:$0xff]  }
 0x9f8   :  { %3085 = vmatprep.mubr.bf16.mxu0 %v6787_v45  ;;  %3054 = vmatpush1.bf16.msra.mxu0 %v3755_v52  ;;  %v3770_v45 = vld [vmem:[#allocation14 + $0x50] ss:$8 sps:$4 sm:$0xff]  }
 0x9f9   :  { %3055 = vmatprep.subr.bf16.mxu0 %v3760_v41  ;;  %3523 = vmatpush3.bf16.msra.mxu1 %v3780_v12  ;;  %v7208_v52 = vld [vmem:[#allocation84_spill] sm:$0xff] }
 0x9fa   :  { %3524 = vmatprep.subr.bf16.mxu1 %v3781_v36  ;;  %v2966_v41 = vrot.slane %v2961_v46, %v7208_v52 }
 0x9fc   :  { %3056 = vmatpush1.bf16.msra.mxu0 %v3758_v58  ;;  %v7209_v58 = vld [vmem:[#allocation85_spill] sm:$0xff] }
 0x9fd   :  { %3057 = vmatprep.subr.bf16.mxu0 %v3763_v28  ;;  %3525 = vmatpush3.bf16.msra.mxu1 %v3782_v11  ;;  %v2970_v28 = vrot.slane %v2961_v46, %v7209_v58 }
 0x9fe   :  { %3526 = vmatprep.subr.bf16.mxu1 %v3783_v13 }
 0xa00   :  { %3058 = vmatpush1.bf16.msra.mxu0 %v3761_v7 }
 0xa01   :  { %3059 = vmatprep.subr.bf16.mxu0 %v3766_v6  ;;  %3527 = vmatpush3.bf16.msra.mxu1 %v3784_v0 }
 0xa04   :  { %3060 = vmatpush1.bf16.msra.mxu0 %v3764_v43 }
 0xa05   :  { %3061 = vmatprep.subr.bf16.mxu0 %v3769_v24 }
 0xa08   :  { %3062 = vmatpush1.bf16.msra.mxu0 %v3767_v22 }
 0xa09   :  { %3063 = vmatprep.subr.bf16.mxu0 %v3772_v39 }
 0xa0c   :  { %3064 = vmatpush1.bf16.msra.mxu0 %v3770_v45 }
 0xa0d   :  { %3065 = vmatprep.subr.bf16.mxu0 %v3775_v20 }
 0xa10   :  { %3066 = vmatpush1.bf16.msra.mxu0 %v3773_v63 }
 0xa11   :  { %3067 = vmatprep.subr.bf16.mxu0 %v3778_v19 }
 0xa14   :  { %3068 = vmatpush1.bf16.msra.mxu0 %v3776_v38 }
 0xaca   :  { %v2871_v59 = vpop.f32.mrb[76].mxu0  ;;  %v2912_v33 = vpop.f32.mrb[76].mxu1 }
 0xacb   :  { %v2872_v53 = vadd.f32 %v2871_v59, %v7200_v51  ;;  %v2873_v31 = vpop.f32.mrb[77].mxu0  ;;  %v2914_v48 = vpop.f32.mrb[77].mxu1  ;;  %v2913_v60 = vadd.f32 %v2912_v33, %v7203_v40 }
 0xacc   :  { %v2874_v37 = vadd.f32 %v2873_v31, %v7201_v14  ;;  %v2875_v34 = vpop.f32.mrb[78].mxu0  ;;  %v2916_v29 = vpop.f32.mrb[78].mxu1  ;;  %v2915_v42 = vadd.f32 %v2914_v48, %v7202_v21 }
 0xacd   :  { %v3483_v56 = vmul.f32 -1.442695, %v2872_v53  ;;  %v2876_v32 = vpop.f32.mrb[79].mxu0  ;;  %v2917_v47 = vpop.f32.mrb[79].mxu1  ;;  %v3504_v34 = vld [vmem:[#allocation18] ss:$0 sm:$0xff] }
 0xace   :  { %v3484_v54 = vmul.f32 -1.442695, %v2874_v37  ;;  %v3485_v57 = vmul.f32 -1.442695, %v2915_v42 }
 0xacf   :  { %4035 = vpow2.f32 %v3483_v56 }
 0xad0   :  { %4037 = vpow2.f32 %v3484_v54 }
 0xad1   :  { %4039 = vpow2.f32 %v3485_v57 }
 0xad2   :  { %4041 = vtanh.f32 %v2913_v60 }
 0xad9   :  { %v4036_v62 = vpop.eup %4035 }
 0xada   :  { %v4038_v1 = vpop.eup %4037  ;;  %v2922_v51 = vadd.f32 1.0, %v4036_v62 }
 0xadb   :  { %v2928_v2 = vadd.f32 1.0, %v4038_v1  ;;  %v4040_v14 = vpop.eup %4039 }
 0xadc   :  { %4043 = vrcp.f32 %v2922_v51  ;;  %v4042_v3 = vpop.eup %4041  ;;  %v2935_v23 = vadd.f32 1.0, %v4040_v14 }
 0xadd   :  { %4045 = vrcp.f32 %v2928_v2 }
 0xade   :  { %4047 = vrcp.f32 %v2935_v23 }
 0xae6   :  { %v4044_v5 = vpop.eup %4043 }
 0xae7   :  { %v4046_v8 = vpop.eup %4045  ;;  %v2939_v10 = vmul.f32 %v4044_v5, %v4042_v3 }
 0xae8   :  { %v2938_v15 = vmul.f32 %v4046_v8, %v6317_v27  ;;  %v4048_v40 = vpop.eup %4047  ;;  %v3785_v27 = vld [vmem:[#allocation17 + $0x58] sm:$0xff]  }
 0xae9   :  { %3528 = vmatprep.subr.bf16.mxu1 %v3785_v27 }
 0xaea   :  { %v2940_v21 = vadd.f32 %v2939_v10, %v2938_v15  ;;  %3529 = vmatpush3.bf16.msra.mxu1 %v3786_v9 }
 0xaeb   :  { %3530 = vmatprep.subr.bf16.mxu1 %v3787_v30 }
 0xaec   :  { %4049 = vtanh.f32 %v2940_v21 }
 0xaee   :  { %3531 = vmatpush3.bf16.msra.mxu1 %v3788_v18 }
 0xaef   :  { %3532 = vmatprep.subr.bf16.mxu1 %v3789_v17 }
 0xaf2   :  { %3533 = vmatpush3.bf16.msra.mxu1 %v3790_v4 }
 0xaf3   :  { %3534 = vmatprep.subr.bf16.mxu1 %v3791_v26 }
 0xaf6   :  { %v4050_v44 = vpop.eup %4049  ;;  %3535 = vmatpush3.bf16.msra.mxu1 %v3792_v16 }
 0xaf7   :  { %v2942_v55 = vmul.f32 %v4050_v44, %v4048_v40  ;;  %3536 = vmatprep.subr.bf16.mxu1 %v3793_v49 }
 0xaf9   :  { %v2943_v35 = vmax.f32 %v2942_v55, 0.0 }
 0xafa   :  { %3537 = vmatpush3.bf16.msra.mxu1 %v3794_v50 }
 0xafb   :  { %v2944_v61 = vpack.c.bf16 %v2943_v35, %v2943_v35 }
 0xafd   :  { %3086 = vmatmul.mubr.bf16.vlgmr.msra.gmra.mrb[80].mxu0 %v2944_v61 }
 0xbd0   :  { %v3087_v7 = vpop.f32.mrb[80].mxu0 }
 0xbd1   :  { %v3088_v6 = vadd.f32 %v3087_v7, %v2966_v41  ;;  %v3089_v43 = vpop.f32.mrb[81].mxu0 }
 0xbd2   :  { %v3090_v22 = vadd.f32 %v3089_v43, %v2970_v28  ;;  %v3091_v24 = vpop.f32.mrb[82].mxu0 }
 0xbd3   :  { %v3502_v39 = vmul.f32 -1.442695, %v3088_v6  ;;  %v3092_v45 = vpop.f32.mrb[83].mxu0 }
 0xbd4   :  { %v3503_v20 = vmul.f32 -1.442695, %v3090_v22 }
 0xbd5   :  { %4051 = vpow2.f32 %v3502_v39 }
 0xbd6   :  { %4053 = vpow2.f32 %v3503_v20 }
 0xbdf   :  { %v4052_v63 = vpop.eup %4051 }
 0xbe0   :  { %v4054_v19 = vpop.eup %4053  ;;  %v3100_v38 = vadd.f32 1.0, %v4052_v63 }
 0xbe1   :  { %v3101_v59 = vadd.f32 1.0, %v4054_v19 }
 0xbe2   :  { %4055 = vrcp.f32 %v3100_v38 }
 0xbe3   :  { %4057 = vrcp.f32 %v3101_v59 }
 0xbec   :  { %v4056_v33 = vpop.eup %4055 }
 0xbed   :  { %v4058_v53 = vpop.eup %4057  ;;  %v3106_v48 = vpack.c.bf16 %v4056_v33, %v4056_v33 }
 0xbee   :  { %v3107_v31 = vpack.c.bf16 %v4058_v53, %v4058_v53 }
 0xbf0   :  { %3275 = vmatprep.mubr.bf16.mxu1 %v3107_v31 }
 0xbf1   :  { %3276 = vmatmul.mubr.bf16.vlgmr.msra.gmra.mrb[80].mxu1 %v3106_v48 }
 0xcc4   :  { %v3538_v37 = vpop.f32.mrb[80].mxu1 }
 0xcc5   :  { %v3539_v29 = vpop.f32.mrb[81].mxu1 }
 0xcc6   :  { %v3540_v56 = vadd.f32 %v3539_v29, %v3538_v37  ;;  %v3541_v32 = vpop.f32.mrb[82].mxu1 }
 0xcc7   :  { %v3542_v47 = vpop.f32.mrb[83].mxu1 }
 0xcc8   :  { %v3278_v54 = vadd.f32 %v3540_v56, %v3504_v34 }
 0xcca   :  { %v3521_v42 = vmul.f32 -1.442695, %v3278_v54 }
 0xccc   :  { %4059 = vpow2.f32 %v3521_v42 }
 0xcd6   :  { %v4060_v57 = vpop.eup %4059 }
 0xcd7   :  { %v3286_v60 = vadd.f32 1.0, %v4060_v57 }
 0xcd9   :  { %4061 = vrcp.f32 %v3286_v60 }
 0xce3   :  { %v4062_v62 = vpop.eup %4061 }
 0xce4   :  { %3289 = vst [vmem:[#allocation20] sm:$0xff] %v4062_v62 }
 0xce5   :  { %4486 = shalt.err (!%p4483_p0)
}
 0xce6   :  { %s4487_s19 = scalar_lea.hbm %s6355_s10, 128 }
 0xce7   :  { %p4488_p1 = scmp.ne.s32.totalorder %s6355_s10, %s4487_s19  ;;  %p4491_p2 = scmp.lt.u32.totalorder %s4487_s19, %s6355_s10 }
 0xce9   :  { %p4493_p3 = pnand %p4491_p2, %p4488_p1 }
 0xceb   :  { %4496 = shalt.err (!%p4493_p3)
}
 0xcec   :  { %3299 = dma.vmem_to_hbm [thread:$0]  %s3297_s27, 128, %s6355_s10, [#allocation5]  }
 0xced   :  { %4509 = dma.done.wait [#allocation5], 128  }
 0xcee   :  { %4510 = vsyncadd [#allocation5], 4294967168 }
 0xcef   :  { %3303 = vsyncpa [#allocation4], 1 }
 0xcf0   :  { %3304 = vsyncpa [#allocation7], 1 }
 0xcf1   :  { %3305 = vsyncpa [#allocation10], 1 }
 0xcf2   :  { %3306 = vsyncpa [#allocation13], 1 }
 0xcf3   :  { %3307 = vsyncpa [#allocation16], 1 }
 0xcf4   :  { %3308 = vsyncpa [#allocation19], 1 }
 0xcf5   :  { %3309 = vsyncpa [#allocation5], 1 }

</bundles_post_ra>
